<compile_context>
chip_gen: v5e
topology: v5e:2x2
jax: 0.10.0
libtpu: 0.0.40
codegen_flags: <defaults>
</compile_context>

<pallas_src>
import math

import jax
import jax.numpy as jnp
from jax.experimental import pallas as pl
from jax.experimental.pallas import tpu as pltpu

# ---- tiny BERT config (synthetic, deterministic) ----
VOCAB = 512
MAX_POS = 64
TYPE_VOCAB = 2
HIDDEN = 128
NUM_HEADS = 4
HEAD_DIM = HIDDEN // NUM_HEADS
INTERMEDIATE = 256
NUM_LAYERS = 2
MAX_SEQ_LEN = 16            # MLP head output dim = MAX_SEQ_LEN + 1
HEAD_OUT = MAX_SEQ_LEN + 1
HEAD_PAD = 128              # pad head output to a full lane width
LN_EPS = 1e-12              # BERT LayerNorm eps
NEG_INF = -1e9


# ---------------------------------------------------------------------------
# Fused kernel
# ---------------------------------------------------------------------------
def _layer_norm(x, gamma, beta):
    # One-pass variance: sum(x) and sum(x*x) are independent reductions.
    mean = jnp.mean(x, axis=-1, keepdims=True)
    mean_sq = jnp.mean(x * x, axis=-1, keepdims=True)
    var = mean_sq - mean * mean
    return (x - mean) * jax.lax.rsqrt(var + LN_EPS) * gamma + beta


def fused_forward_kernel(ids_ref, tt_ref, mask_ref,
                         word_ref, pos_ref, type_ref,
                         emb_ln_g_ref, emb_ln_b_ref,
                         wqkv_ref, bqkv_ref, wo_ref, bo_ref,
                         ln1g_ref, ln1b_ref,
                         w1_ref, b1_ref, w2_ref, b2_ref,
                         ln2g_ref, ln2b_ref,
                         head_w_ref, head_b_ref,
                         o_ref):
    B, S = mask_ref.shape
    BS = B * S
    H, NH, HD = HIDDEN, NUM_HEADS, HEAD_DIM

    # ---- fused embedding lookup (no XLA gather, no HBM round-trip) ----
    ids = ids_ref[...]                                          # (BS, 1) int32
    vocab_iota = jax.lax.broadcasted_iota(jnp.int32, (BS, VOCAB), 1)
    onehot = (vocab_iota == ids).astype(jnp.bfloat16)           # (BS, VOCAB)
    word = jnp.dot(onehot, word_ref[...],
                   preferred_element_type=jnp.float32)          # (BS, H)

    pos = jnp.broadcast_to(pos_ref[0:S, :][None], (B, S, H)).reshape(BS, H)
    tt = tt_ref[...]                                            # (BS, 1) int32
    typ = jnp.where(tt == 0, type_ref[0:1, :], type_ref[1:2, :])  # (BS, H)

    # Embedding LayerNorm; hidden state stays (BS, H) for the whole forward.
    h = _layer_norm(word + pos + typ, emb_ln_g_ref[...], emb_ln_b_ref[...])

    # Additive key mask, built once, head-major ordering (head*B + b).
    mask = mask_ref[...].astype(jnp.float32)                    # (B, S)
    add_mask = ((1.0 - mask) * NEG_INF)[:, None, :]             # (B, 1, S)
    add_mask_h = jnp.broadcast_to(add_mask[None],
                                  (NH, B, 1, S)).reshape(NH * B, 1, S)

    scale = 1.0 / math.sqrt(HD)

    for l in range(NUM_LAYERS):                                 # static unroll
        # Fused QKV projection: one (BS,H)@(H,3H) matmul, bf16 MXU, f32 accum.
        qkv = (jnp.dot(h.astype(jnp.bfloat16), wqkv_ref[l],
                       preferred_element_type=jnp.float32)
               + bqkv_ref[l])                                   # (BS, 3H)

        # Head-major batched layout (NH*B, S, HD): static lane slices +
        # leading-axis concat.  One softmax / mask-add / einsum pair per layer.
        def to_heads(x2d):
            return jnp.concatenate(
                [x2d[:, hd * HD:(hd + 1) * HD].reshape(B, S, HD)
                 for hd in range(NH)], axis=0)

        qh = to_heads(qkv[:, 0 * H:1 * H]).astype(jnp.bfloat16)
        kh = to_heads(qkv[:, 1 * H:2 * H]).astype(jnp.bfloat16)
        vh = to_heads(qkv[:, 2 * H:3 * H]).astype(jnp.bfloat16)

        scores = jnp.einsum('bqd,bkd->bqk', qh, kh,
                            preferred_element_type=jnp.float32) * scale
        scores = scores + add_mask_h                            # (NH*B, S, S)

        # Open-coded softmax: exp + approx reciprocal both hit the EUP slot.
        m = jnp.max(scores, axis=-1, keepdims=True)
        e = jnp.exp(scores - m)
        denom = jnp.sum(e, axis=-1, keepdims=True)
        probs = e * pl.reciprocal(denom, approx=True)

        ctx_h = jnp.einsum('bqk,bkd->bqd', probs.astype(jnp.bfloat16), vh,
                           preferred_element_type=jnp.float32)  # (NH*B, S, HD)
        ctx = jnp.concatenate(
            [ctx_h[hd * B:(hd + 1) * B].reshape(BS, HD) for hd in range(NH)],
            axis=-1)                                            # (BS, H)

        attn = (jnp.dot(ctx.astype(jnp.bfloat16), wo_ref[l],
                        preferred_element_type=jnp.float32)
                + bo_ref[l])                                    # (BS, H)
        h1 = _layer_norm(attn + h, ln1g_ref[l], ln1b_ref[l])

        # Feed-forward (kept 2-D).
        ff = (jnp.dot(h1.astype(jnp.bfloat16), w1_ref[l],
                      preferred_element_type=jnp.float32)
              + b1_ref[l])
        # TODO(synk): HF BERT uses exact erf-GELU; tanh approximation used here.
        ff = jax.nn.gelu(ff, approximate=True)                  # f32 elementwise
        ff = (jnp.dot(ff.astype(jnp.bfloat16), w2_ref[l],
                      preferred_element_type=jnp.float32)
              + b2_ref[l])
        h = _layer_norm(ff + h1, ln2g_ref[l], ln2b_ref[l])

    # CLS pooling + SiLU + Linear head (output padded to 128 lanes).
    pooled = h.reshape(B, S, H)[:, 0, :]                        # (B, H)
    pooled = pooled * jax.nn.sigmoid(pooled)                    # SiLU, f32
    logits = (jnp.dot(pooled.astype(jnp.bfloat16), head_w_ref[...],
                      preferred_element_type=jnp.float32)
              + head_b_ref[...])                                # (B, HEAD_PAD)
    o_ref[...] = logits.astype(o_ref.dtype)


# ---------------------------------------------------------------------------
# Parameters + forward
# ---------------------------------------------------------------------------
def init_params(key):
    def normal(k, shape, scale=0.02, dtype=jnp.float32):
        return (scale * jax.random.normal(k, shape, dtype=jnp.float32)).astype(dtype)

    keys = iter(jax.random.split(key, 32))
    L, H, I = NUM_LAYERS, HIDDEN, INTERMEDIATE

    head_w = jnp.zeros((H, HEAD_PAD), jnp.float32)
    head_w = head_w.at[:, :HEAD_OUT].set(normal(next(keys), (H, HEAD_OUT)))

    params = {
        'word_emb': normal(next(keys), (VOCAB, H), dtype=jnp.bfloat16),
        'pos_emb': normal(next(keys), (MAX_POS, H)),
        'type_emb': normal(next(keys), (TYPE_VOCAB, H)),
        'emb_ln_g': jnp.ones((1, H), jnp.float32),
        'emb_ln_b': jnp.zeros((1, H), jnp.float32),
        # Per-layer weights stacked with a leading layer dim; MXU operands bf16.
        'wqkv': normal(next(keys), (L, H, 3 * H), dtype=jnp.bfloat16),
        'bqkv': jnp.zeros((L, 1, 3 * H), jnp.float32),
        'wo': normal(next(keys), (L, H, H), dtype=jnp.bfloat16),
        'bo': jnp.zeros((L, 1, H), jnp.float32),
        'ln1_g': jnp.ones((L, 1, H), jnp.float32),
        'ln1_b': jnp.zeros((L, 1, H), jnp.float32),
        'w1': normal(next(keys), (L, H, I), dtype=jnp.bfloat16),
        'b1': jnp.zeros((L, 1, I), jnp.float32),
        'w2': normal(next(keys), (L, I, H), dtype=jnp.bfloat16),
        'b2': jnp.zeros((L, 1, H), jnp.float32),
        'ln2_g': jnp.ones((L, 1, H), jnp.float32),
        'ln2_b': jnp.zeros((L, 1, H), jnp.float32),
        'head_w': head_w.astype(jnp.bfloat16),
        'head_b': jnp.zeros((1, HEAD_PAD), jnp.float32),
    }
    return params


def forward(params, input_ids, attention_mask, token_type_ids=None):
    # TODO(synk): the HuggingFace string tokenizer has no Pallas equivalent;
    # this forward takes integer token ids + attention mask directly.
    B, S = input_ids.shape
    if token_type_ids is None:
        token_type_ids = jnp.zeros_like(input_ids)

    ids2d = input_ids.reshape(B * S, 1).astype(jnp.int32)
    tt2d = token_type_ids.reshape(B * S, 1).astype(jnp.int32)
    mask_f = attention_mask.astype(jnp.float32)

    args = (ids2d, tt2d, mask_f,
            params['word_emb'], params['pos_emb'], params['type_emb'],
            params['emb_ln_g'], params['emb_ln_b'],
            params['wqkv'], params['bqkv'], params['wo'], params['bo'],
            params['ln1_g'], params['ln1_b'],
            params['w1'], params['b1'], params['w2'], params['b2'],
            params['ln2_g'], params['ln2_b'],
            params['head_w'], params['head_b'])

    # Advisory cost estimate for XLA scheduling around the custom call.
    bs = B * S
    per_layer = (2 * bs * HIDDEN * (3 * HIDDEN + HIDDEN + 2 * INTERMEDIATE)
                 + 4 * NUM_HEADS * B * S * S * HEAD_DIM)
    flops = (2 * bs * VOCAB * HIDDEN + NUM_LAYERS * per_layer
             + 2 * B * HIDDEN * HEAD_PAD)
    trans = NUM_LAYERS * (NUM_HEADS * B * S * S + bs * INTERMEDIATE) + B * HIDDEN
    bytes_acc = (VOCAB * HIDDEN * 2
                 + NUM_LAYERS * 2 * (3 * HIDDEN * HIDDEN + HIDDEN * HIDDEN
                                     + 2 * HIDDEN * INTERMEDIATE)
                 + bs * HIDDEN * 4 + B * HEAD_PAD * 4)

    vmem = pl.BlockSpec(memory_space=pltpu.MemorySpace.VMEM)
    padded_logits = pl.pallas_call(
        fused_forward_kernel,
        out_shape=jax.ShapeDtypeStruct((B, HEAD_PAD), jnp.float32),
        in_specs=[vmem] * len(args),
        out_specs=vmem,
        compiler_params=pltpu.CompilerParams(
            vmem_limit_bytes=32 * 1024 * 1024),
        cost_estimate=pl.CostEstimate(
            flops=int(flops), transcendentals=int(trans),
            bytes_accessed=int(bytes_acc)),
    )(*args)
    return padded_logits[:, :HEAD_OUT]                          # (B, max_seq_len+1)


if __name__ == "__main__":
    key = jax.random.PRNGKey(0)
    pkey, dkey = jax.random.split(key)
    params = init_params(pkey)

    B, S = 2, 8
    input_ids = jax.random.randint(dkey, (B, S), 0, VOCAB, dtype=jnp.int32)
    # simulate tokenizer padding: second sequence has 2 padded positions
    attention_mask = jnp.ones((B, S), jnp.int32).at[1, 6:].set(0)

    logits = forward(params, input_ids, attention_mask)
    jax.block_until_ready(logits)
    assert logits.shape == (B, MAX_SEQ_LEN + 1), logits.shape
    assert bool(jnp.all(jnp.isfinite(logits)))
    print("KERNEL_OK")
</pallas_src>

<mosaic_0001>
module attributes {stable_mosaic.version = 11 : i64} {
  func.func @fused_forward_kernel(%arg0: memref<16x1xi32, #tpu.memory_space<vmem>>, %arg1: memref<16x1xi32, #tpu.memory_space<vmem>>, %arg2: memref<2x8xf32, #tpu.memory_space<vmem>>, %arg3: memref<512x128xbf16, #tpu.memory_space<vmem>>, %arg4: memref<64x128xf32, #tpu.memory_space<vmem>>, %arg5: memref<2x128xf32, #tpu.memory_space<vmem>>, %arg6: memref<1x128xf32, #tpu.memory_space<vmem>>, %arg7: memref<1x128xf32, #tpu.memory_space<vmem>>, %arg8: memref<2x128x384xbf16, #tpu.memory_space<vmem>>, %arg9: memref<2x1x384xf32, #tpu.memory_space<vmem>>, %arg10: memref<2x128x128xbf16, #tpu.memory_space<vmem>>, %arg11: memref<2x1x128xf32, #tpu.memory_space<vmem>>, %arg12: memref<2x1x128xf32, #tpu.memory_space<vmem>>, %arg13: memref<2x1x128xf32, #tpu.memory_space<vmem>>, %arg14: memref<2x128x256xbf16, #tpu.memory_space<vmem>>, %arg15: memref<2x1x256xf32, #tpu.memory_space<vmem>>, %arg16: memref<2x256x128xbf16, #tpu.memory_space<vmem>>, %arg17: memref<2x1x128xf32, #tpu.memory_space<vmem>>, %arg18: memref<2x1x128xf32, #tpu.memory_space<vmem>>, %arg19: memref<2x1x128xf32, #tpu.memory_space<vmem>>, %arg20: memref<128x128xbf16, #tpu.memory_space<vmem>>, %arg21: memref<1x128xf32, #tpu.memory_space<vmem>>, %arg22: memref<2x128xf32, #tpu.memory_space<vmem>>) attributes {dimension_semantics = [], scalar_prefetch = 0 : i64, scratch_operands = 0 : i64, tpu.core_type = #tpu.core_type<tc>} {
    %c0 = arith.constant 0 : index
    %c0_0 = arith.constant 0 : index
    %0 = vector.load %arg0[%c0, %c0_0] : memref<16x1xi32, #tpu.memory_space<vmem>>, vector<16x1xi32>
    %1 = tpu.iota {dimensions = array<i32: 1>} : vector<16x512xi32>
    %2 = vector.broadcast %0 : vector<16x1xi32> to vector<16x512xi32>
    %3 = arith.cmpi eq, %1, %2 : vector<16x512xi32>
    %4 = arith.extui %3 : vector<16x512xi1> to vector<16x512xi32>
    %5 = arith.sitofp %4 : vector<16x512xi32> to vector<16x512xf32>
    %6 = arith.truncf %5 : vector<16x512xf32> to vector<16x512xbf16>
    %c0_1 = arith.constant 0 : index
    %c0_2 = arith.constant 0 : index
    %7 = vector.load %arg3[%c0_1, %c0_2] : memref<512x128xbf16, #tpu.memory_space<vmem>>, vector<512x128xbf16>
    %cst = arith.constant dense<0.000000e+00> : vector<16x128xf32>
    %8 = tpu.matmul %6, %7, %cst {dimension_numbers = #tpu.dot_dimension_numbers<[1], [0], [0], [1], [0, 0, 1, 1], [], []>} : vector<16x512xbf16>, vector<512x128xbf16>, vector<16x128xf32> -> vector<16x128xf32>
    %c0_3 = arith.constant 0 : index
    %c0_4 = arith.constant 0 : index
    %9 = vector.load %arg4[%c0_3, %c0_4] : memref<64x128xf32, #tpu.memory_space<vmem>>, vector<8x128xf32>
    %10 = vector.shape_cast %9 : vector<8x128xf32> to vector<1x8x128xf32>
    %11 = vector.shape_cast %10 : vector<1x8x128xf32> to vector<1x8x128xf32>
    %12 = vector.broadcast %11 : vector<1x8x128xf32> to vector<2x8x128xf32>
    %13 = vector.shape_cast %12 : vector<2x8x128xf32> to vector<16x128xf32>
    %c0_5 = arith.constant 0 : index
    %c0_6 = arith.constant 0 : index
    %14 = vector.load %arg1[%c0_5, %c0_6] : memref<16x1xi32, #tpu.memory_space<vmem>>, vector<16x1xi32>
    %c0_i32 = arith.constant 0 : i32
    %15 = vector.broadcast %c0_i32 : i32 to vector<16x1xi32>
    %16 = arith.cmpi eq, %14, %15 : vector<16x1xi32>
    %c0_7 = arith.constant 0 : index
    %c0_8 = arith.constant 0 : index
    %17 = vector.load %arg5[%c0_7, %c0_8] : memref<2x128xf32, #tpu.memory_space<vmem>>, vector<1x128xf32>
    %c1 = arith.constant 1 : index
    %c0_9 = arith.constant 0 : index
    %18 = vector.load %arg5[%c1, %c0_9] : memref<2x128xf32, #tpu.memory_space<vmem>>, vector<1x128xf32>
    %19 = vector.shape_cast %16 : vector<16x1xi1> to vector<16x1xi1>
    %20 = vector.broadcast %19 : vector<16x1xi1> to vector<16x128xi1>
    %21 = vector.shape_cast %17 : vector<1x128xf32> to vector<1x128xf32>
    %22 = vector.broadcast %21 : vector<1x128xf32> to vector<16x128xf32>
    %23 = vector.shape_cast %18 : vector<1x128xf32> to vector<1x128xf32>
    %24 = vector.broadcast %23 : vector<1x128xf32> to vector<16x128xf32>
    %25 = arith.select %20, %22, %24 : vector<16x128xi1>, vector<16x128xf32>
    %26 = arith.addf %8, %13 : vector<16x128xf32>
    %27 = arith.addf %26, %25 : vector<16x128xf32>
    %c0_10 = arith.constant 0 : index
    %c0_11 = arith.constant 0 : index
    %28 = vector.load %arg6[%c0_10, %c0_11] : memref<1x128xf32, #tpu.memory_space<vmem>>, vector<1x128xf32>
    %c0_12 = arith.constant 0 : index
    %c0_13 = arith.constant 0 : index
    %29 = vector.load %arg7[%c0_12, %c0_13] : memref<1x128xf32, #tpu.memory_space<vmem>>, vector<1x128xf32>
    %cst_14 = arith.constant dense<0.000000e+00> : vector<16xf32>
    %30 = vector.multi_reduction <add>, %27, %cst_14 [1] : vector<16x128xf32> to vector<16xf32>
    %31 = vector.shape_cast %30 : vector<16xf32> to vector<16x1xf32>
    %cst_15 = arith.constant 1.280000e+02 : f32
    %32 = vector.broadcast %cst_15 : f32 to vector<16x1xf32>
    %33 = arith.divf %31, %32 : vector<16x1xf32>
    %34 = arith.mulf %27, %27 : vector<16x128xf32>
    %cst_16 = arith.constant dense<0.000000e+00> : vector<16xf32>
    %35 = vector.multi_reduction <add>, %34, %cst_16 [1] : vector<16x128xf32> to vector<16xf32>
    %36 = vector.shape_cast %35 : vector<16xf32> to vector<16x1xf32>
    %cst_17 = arith.constant 1.280000e+02 : f32
    %37 = vector.broadcast %cst_17 : f32 to vector<16x1xf32>
    %38 = arith.divf %36, %37 : vector<16x1xf32>
    %39 = arith.mulf %33, %33 : vector<16x1xf32>
    %40 = arith.subf %38, %39 : vector<16x1xf32>
    %41 = vector.broadcast %33 : vector<16x1xf32> to vector<16x128xf32>
    %42 = arith.subf %27, %41 : vector<16x128xf32>
    %cst_18 = arith.constant 9.99999996E-13 : f32
    %43 = vector.broadcast %cst_18 : f32 to vector<16x1xf32>
    %44 = arith.addf %40, %43 : vector<16x1xf32>
    %45 = math.rsqrt %44 : vector<16x1xf32>
    %46 = vector.broadcast %45 : vector<16x1xf32> to vector<16x128xf32>
    %47 = arith.mulf %42, %46 : vector<16x128xf32>
    %48 = vector.broadcast %28 : vector<1x128xf32> to vector<16x128xf32>
    %49 = arith.mulf %47, %48 : vector<16x128xf32>
    %50 = vector.broadcast %29 : vector<1x128xf32> to vector<16x128xf32>
    %51 = arith.addf %49, %50 : vector<16x128xf32>
    %c0_19 = arith.constant 0 : index
    %c0_20 = arith.constant 0 : index
    %52 = vector.load %arg2[%c0_19, %c0_20] : memref<2x8xf32, #tpu.memory_space<vmem>>, vector<2x8xf32>
    %cst_21 = arith.constant 1.000000e+00 : f32
    %53 = vector.broadcast %cst_21 : f32 to vector<2x8xf32>
    %54 = arith.subf %53, %52 : vector<2x8xf32>
    %cst_22 = arith.constant -1.000000e+09 : f32
    %55 = vector.broadcast %cst_22 : f32 to vector<2x8xf32>
    %56 = arith.mulf %54, %55 : vector<2x8xf32>
    %57 = vector.shape_cast %56 : vector<2x8xf32> to vector<2x1x8xf32>
    %58 = vector.shape_cast %57 : vector<2x1x8xf32> to vector<1x2x1x8xf32>
    %59 = vector.shape_cast %58 : vector<1x2x1x8xf32> to vector<1x2x1x8xf32>
    %60 = vector.broadcast %59 : vector<1x2x1x8xf32> to vector<4x2x1x8xf32>
    %61 = vector.shape_cast %60 : vector<4x2x1x8xf32> to vector<8x1x8xf32>
    %62 = arith.truncf %51 : vector<16x128xf32> to vector<16x128xbf16>
    %c0_23 = arith.constant 0 : index
    %c0_24 = arith.constant 0 : index
    %c0_25 = arith.constant 0 : index
    %63 = vector.load %arg8[%c0_23, %c0_24, %c0_25] : memref<2x128x384xbf16, #tpu.memory_space<vmem>>, vector<1x128x384xbf16>
    %64 = vector.shape_cast %63 : vector<1x128x384xbf16> to vector<128x384xbf16>
    %cst_26 = arith.constant dense<0.000000e+00> : vector<16x384xf32>
    %65 = tpu.matmul %62, %64, %cst_26 {dimension_numbers = #tpu.dot_dimension_numbers<[1], [0], [0], [1], [0, 0, 1, 1], [], []>} : vector<16x128xbf16>, vector<128x384xbf16>, vector<16x384xf32> -> vector<16x384xf32>
    %c0_27 = arith.constant 0 : index
    %c0_28 = arith.constant 0 : index
    %c0_29 = arith.constant 0 : index
    %66 = vector.load %arg9[%c0_27, %c0_28, %c0_29] : memref<2x1x384xf32, #tpu.memory_space<vmem>>, vector<1x1x384xf32>
    %67 = vector.shape_cast %66 : vector<1x1x384xf32> to vector<1x384xf32>
    %68 = vector.broadcast %67 : vector<1x384xf32> to vector<16x384xf32>
    %69 = arith.addf %65, %68 : vector<16x384xf32>
    %70 = vector.extract_strided_slice %69 {offsets = [0, 0], sizes = [16, 128], strides = [1, 1]} : vector<16x384xf32> to vector<16x128xf32>
    %71 = vector.extract_strided_slice %70 {offsets = [0, 0], sizes = [16, 32], strides = [1, 1]} : vector<16x128xf32> to vector<16x32xf32>
    %72 = vector.shape_cast %71 : vector<16x32xf32> to vector<2x8x32xf32>
    %73 = vector.extract_strided_slice %70 {offsets = [0, 32], sizes = [16, 32], strides = [1, 1]} : vector<16x128xf32> to vector<16x32xf32>
    %74 = vector.shape_cast %73 : vector<16x32xf32> to vector<2x8x32xf32>
    %75 = vector.extract_strided_slice %70 {offsets = [0, 64], sizes = [16, 32], strides = [1, 1]} : vector<16x128xf32> to vector<16x32xf32>
    %76 = vector.shape_cast %75 : vector<16x32xf32> to vector<2x8x32xf32>
    %77 = vector.extract_strided_slice %70 {offsets = [0, 96], sizes = [16, 32], strides = [1, 1]} : vector<16x128xf32> to vector<16x32xf32>
    %78 = vector.shape_cast %77 : vector<16x32xf32> to vector<2x8x32xf32>
    %79 = tpu.concatenate %72, %74, %76, %78 in 0 : vector<2x8x32xf32>, vector<2x8x32xf32>, vector<2x8x32xf32>, vector<2x8x32xf32> -> vector<8x8x32xf32>
    %80 = arith.truncf %79 : vector<8x8x32xf32> to vector<8x8x32xbf16>
    %81 = vector.extract_strided_slice %69 {offsets = [0, 128], sizes = [16, 128], strides = [1, 1]} : vector<16x384xf32> to vector<16x128xf32>
    %82 = vector.extract_strided_slice %81 {offsets = [0, 0], sizes = [16, 32], strides = [1, 1]} : vector<16x128xf32> to vector<16x32xf32>
    %83 = vector.shape_cast %82 : vector<16x32xf32> to vector<2x8x32xf32>
    %84 = vector.extract_strided_slice %81 {offsets = [0, 32], sizes = [16, 32], strides = [1, 1]} : vector<16x128xf32> to vector<16x32xf32>
    %85 = vector.shape_cast %84 : vector<16x32xf32> to vector<2x8x32xf32>
    %86 = vector.extract_strided_slice %81 {offsets = [0, 64], sizes = [16, 32], strides = [1, 1]} : vector<16x128xf32> to vector<16x32xf32>
    %87 = vector.shape_cast %86 : vector<16x32xf32> to vector<2x8x32xf32>
    %88 = vector.extract_strided_slice %81 {offsets = [0, 96], sizes = [16, 32], strides = [1, 1]} : vector<16x128xf32> to vector<16x32xf32>
    %89 = vector.shape_cast %88 : vector<16x32xf32> to vector<2x8x32xf32>
    %90 = tpu.concatenate %83, %85, %87, %89 in 0 : vector<2x8x32xf32>, vector<2x8x32xf32>, vector<2x8x32xf32>, vector<2x8x32xf32> -> vector<8x8x32xf32>
    %91 = arith.truncf %90 : vector<8x8x32xf32> to vector<8x8x32xbf16>
    %92 = vector.extract_strided_slice %69 {offsets = [0, 256], sizes = [16, 128], strides = [1, 1]} : vector<16x384xf32> to vector<16x128xf32>
    %93 = vector.extract_strided_slice %92 {offsets = [0, 0], sizes = [16, 32], strides = [1, 1]} : vector<16x128xf32> to vector<16x32xf32>
    %94 = vector.shape_cast %93 : vector<16x32xf32> to vector<2x8x32xf32>
    %95 = vector.extract_strided_slice %92 {offsets = [0, 32], sizes = [16, 32], strides = [1, 1]} : vector<16x128xf32> to vector<16x32xf32>
    %96 = vector.shape_cast %95 : vector<16x32xf32> to vector<2x8x32xf32>
    %97 = vector.extract_strided_slice %92 {offsets = [0, 64], sizes = [16, 32], strides = [1, 1]} : vector<16x128xf32> to vector<16x32xf32>
    %98 = vector.shape_cast %97 : vector<16x32xf32> to vector<2x8x32xf32>
    %99 = vector.extract_strided_slice %92 {offsets = [0, 96], sizes = [16, 32], strides = [1, 1]} : vector<16x128xf32> to vector<16x32xf32>
    %100 = vector.shape_cast %99 : vector<16x32xf32> to vector<2x8x32xf32>
    %101 = tpu.concatenate %94, %96, %98, %100 in 0 : vector<2x8x32xf32>, vector<2x8x32xf32>, vector<2x8x32xf32>, vector<2x8x32xf32> -> vector<8x8x32xf32>
    %102 = arith.truncf %101 : vector<8x8x32xf32> to vector<8x8x32xbf16>
    "tpu.trace_start"() <{level = 10 : i32, message = "bqd,bkd->bqk"}> : () -> ()
    %cst_30 = arith.constant dense<0.000000e+00> : vector<8x8x8xf32>
    %103 = tpu.matmul %80, %91, %cst_30 {dimension_numbers = #tpu.dot_dimension_numbers<[2], [2], [1], [1], [0, 0, 0, 1, 1, 1], [0], [0]>} : vector<8x8x32xbf16>, vector<8x8x32xbf16>, vector<8x8x8xf32> -> vector<8x8x8xf32>
    "tpu.trace_stop"() : () -> ()
    %cst_31 = arith.constant 0.176776692 : f32
    %104 = vector.broadcast %cst_31 : f32 to vector<8x8x8xf32>
    %105 = arith.mulf %103, %104 : vector<8x8x8xf32>
    %106 = vector.broadcast %61 : vector<8x1x8xf32> to vector<8x8x8xf32>
    %107 = arith.addf %105, %106 : vector<8x8x8xf32>
    %cst_32 = arith.constant dense<0xFF800000> : vector<8x8xf32>
    %108 = vector.multi_reduction <maximumf>, %107, %cst_32 [2] : vector<8x8x8xf32> to vector<8x8xf32>
    %109 = vector.shape_cast %108 : vector<8x8xf32> to vector<8x8x1xf32>
    %110 = vector.broadcast %109 : vector<8x8x1xf32> to vector<8x8x8xf32>
    %111 = arith.subf %107, %110 : vector<8x8x8xf32>
    %112 = math.exp %111 : vector<8x8x8xf32>
    %cst_33 = arith.constant dense<0.000000e+00> : vector<8x8xf32>
    %113 = vector.multi_reduction <add>, %112, %cst_33 [2] : vector<8x8x8xf32> to vector<8x8xf32>
    %114 = vector.shape_cast %113 : vector<8x8xf32> to vector<8x8x1xf32>
    %115 = tpu.reciprocal %114 {approx = true} : vector<8x8x1xf32> -> vector<8x8x1xf32>
    %116 = vector.broadcast %115 : vector<8x8x1xf32> to vector<8x8x8xf32>
    %117 = arith.mulf %112, %116 : vector<8x8x8xf32>
    %118 = arith.truncf %117 : vector<8x8x8xf32> to vector<8x8x8xbf16>
    "tpu.trace_start"() <{level = 10 : i32, message = "bqk,bkd->bqd"}> : () -> ()
    %cst_34 = arith.constant dense<0.000000e+00> : vector<8x8x32xf32>
    %119 = tpu.matmul %118, %102, %cst_34 {dimension_numbers = #tpu.dot_dimension_numbers<[2], [1], [1], [2], [0, 0, 0, 1, 1, 2], [0], [0]>} : vector<8x8x8xbf16>, vector<8x8x32xbf16>, vector<8x8x32xf32> -> vector<8x8x32xf32>
    "tpu.trace_stop"() : () -> ()
    %120 = vector.extract_strided_slice %119 {offsets = [0, 0, 0], sizes = [2, 8, 32], strides = [1, 1, 1]} : vector<8x8x32xf32> to vector<2x8x32xf32>
    %121 = vector.shape_cast %120 : vector<2x8x32xf32> to vector<16x32xf32>
    %122 = vector.extract_strided_slice %119 {offsets = [2, 0, 0], sizes = [2, 8, 32], strides = [1, 1, 1]} : vector<8x8x32xf32> to vector<2x8x32xf32>
    %123 = vector.shape_cast %122 : vector<2x8x32xf32> to vector<16x32xf32>
    %124 = vector.extract_strided_slice %119 {offsets = [4, 0, 0], sizes = [2, 8, 32], strides = [1, 1, 1]} : vector<8x8x32xf32> to vector<2x8x32xf32>
    %125 = vector.shape_cast %124 : vector<2x8x32xf32> to vector<16x32xf32>
    %126 = vector.extract_strided_slice %119 {offsets = [6, 0, 0], sizes = [2, 8, 32], strides = [1, 1, 1]} : vector<8x8x32xf32> to vector<2x8x32xf32>
    %127 = vector.shape_cast %126 : vector<2x8x32xf32> to vector<16x32xf32>
    %128 = tpu.concatenate %121, %123, %125, %127 in 1 : vector<16x32xf32>, vector<16x32xf32>, vector<16x32xf32>, vector<16x32xf32> -> vector<16x128xf32>
    %129 = arith.truncf %128 : vector<16x128xf32> to vector<16x128xbf16>
    %c0_35 = arith.constant 0 : index
    %c0_36 = arith.constant 0 : index
    %c0_37 = arith.constant 0 : index
    %130 = vector.load %arg10[%c0_35, %c0_36, %c0_37] : memref<2x128x128xbf16, #tpu.memory_space<vmem>>, vector<1x128x128xbf16>
    %131 = vector.shape_cast %130 : vector<1x128x128xbf16> to vector<128x128xbf16>
    %cst_38 = arith.constant dense<0.000000e+00> : vector<16x128xf32>
    %132 = tpu.matmul %129, %131, %cst_38 {dimension_numbers = #tpu.dot_dimension_numbers<[1], [0], [0], [1], [0, 0, 1, 1], [], []>} : vector<16x128xbf16>, vector<128x128xbf16>, vector<16x128xf32> -> vector<16x128xf32>
    %c0_39 = arith.constant 0 : index
    %c0_40 = arith.constant 0 : index
    %c0_41 = arith.constant 0 : index
    %133 = vector.load %arg11[%c0_39, %c0_40, %c0_41] : memref<2x1x128xf32, #tpu.memory_space<vmem>>, vector<1x1x128xf32>
    %134 = vector.shape_cast %133 : vector<1x1x128xf32> to vector<1x128xf32>
    %135 = vector.broadcast %134 : vector<1x128xf32> to vector<16x128xf32>
    %136 = arith.addf %132, %135 : vector<16x128xf32>
    %137 = arith.addf %136, %51 : vector<16x128xf32>
    %c0_42 = arith.constant 0 : index
    %c0_43 = arith.constant 0 : index
    %c0_44 = arith.constant 0 : index
    %138 = vector.load %arg12[%c0_42, %c0_43, %c0_44] : memref<2x1x128xf32, #tpu.memory_space<vmem>>, vector<1x1x128xf32>
    %139 = vector.shape_cast %138 : vector<1x1x128xf32> to vector<1x128xf32>
    %c0_45 = arith.constant 0 : index
    %c0_46 = arith.constant 0 : index
    %c0_47 = arith.constant 0 : index
    %140 = vector.load %arg13[%c0_45, %c0_46, %c0_47] : memref<2x1x128xf32, #tpu.memory_space<vmem>>, vector<1x1x128xf32>
    %141 = vector.shape_cast %140 : vector<1x1x128xf32> to vector<1x128xf32>
    %cst_48 = arith.constant dense<0.000000e+00> : vector<16xf32>
    %142 = vector.multi_reduction <add>, %137, %cst_48 [1] : vector<16x128xf32> to vector<16xf32>
    %143 = vector.shape_cast %142 : vector<16xf32> to vector<16x1xf32>
    %cst_49 = arith.constant 1.280000e+02 : f32
    %144 = vector.broadcast %cst_49 : f32 to vector<16x1xf32>
    %145 = arith.divf %143, %144 : vector<16x1xf32>
    %146 = arith.mulf %137, %137 : vector<16x128xf32>
    %cst_50 = arith.constant dense<0.000000e+00> : vector<16xf32>
    %147 = vector.multi_reduction <add>, %146, %cst_50 [1] : vector<16x128xf32> to vector<16xf32>
    %148 = vector.shape_cast %147 : vector<16xf32> to vector<16x1xf32>
    %cst_51 = arith.constant 1.280000e+02 : f32
    %149 = vector.broadcast %cst_51 : f32 to vector<16x1xf32>
    %150 = arith.divf %148, %149 : vector<16x1xf32>
    %151 = arith.mulf %145, %145 : vector<16x1xf32>
    %152 = arith.subf %150, %151 : vector<16x1xf32>
    %153 = vector.broadcast %145 : vector<16x1xf32> to vector<16x128xf32>
    %154 = arith.subf %137, %153 : vector<16x128xf32>
    %cst_52 = arith.constant 9.99999996E-13 : f32
    %155 = vector.broadcast %cst_52 : f32 to vector<16x1xf32>
    %156 = arith.addf %152, %155 : vector<16x1xf32>
    %157 = math.rsqrt %156 : vector<16x1xf32>
    %158 = vector.broadcast %157 : vector<16x1xf32> to vector<16x128xf32>
    %159 = arith.mulf %154, %158 : vector<16x128xf32>
    %160 = vector.broadcast %139 : vector<1x128xf32> to vector<16x128xf32>
    %161 = arith.mulf %159, %160 : vector<16x128xf32>
    %162 = vector.broadcast %141 : vector<1x128xf32> to vector<16x128xf32>
    %163 = arith.addf %161, %162 : vector<16x128xf32>
    %164 = arith.truncf %163 : vector<16x128xf32> to vector<16x128xbf16>
    %c0_53 = arith.constant 0 : index
    %c0_54 = arith.constant 0 : index
    %c0_55 = arith.constant 0 : index
    %165 = vector.load %arg14[%c0_53, %c0_54, %c0_55] : memref<2x128x256xbf16, #tpu.memory_space<vmem>>, vector<1x128x256xbf16>
    %166 = vector.shape_cast %165 : vector<1x128x256xbf16> to vector<128x256xbf16>
    %cst_56 = arith.constant dense<0.000000e+00> : vector<16x256xf32>
    %167 = tpu.matmul %164, %166, %cst_56 {dimension_numbers = #tpu.dot_dimension_numbers<[1], [0], [0], [1], [0, 0, 1, 1], [], []>} : vector<16x128xbf16>, vector<128x256xbf16>, vector<16x256xf32> -> vector<16x256xf32>
    %c0_57 = arith.constant 0 : index
    %c0_58 = arith.constant 0 : index
    %c0_59 = arith.constant 0 : index
    %168 = vector.load %arg15[%c0_57, %c0_58, %c0_59] : memref<2x1x256xf32, #tpu.memory_space<vmem>>, vector<1x1x256xf32>
    %169 = vector.shape_cast %168 : vector<1x1x256xf32> to vector<1x256xf32>
    %170 = vector.broadcast %169 : vector<1x256xf32> to vector<16x256xf32>
    %171 = arith.addf %167, %170 : vector<16x256xf32>
    %172 = arith.mulf %171, %171 : vector<16x256xf32>
    %173 = arith.mulf %171, %172 : vector<16x256xf32>
    %cst_60 = arith.constant 4.471500e-02 : f32
    %174 = vector.broadcast %cst_60 : f32 to vector<16x256xf32>
    %175 = arith.mulf %174, %173 : vector<16x256xf32>
    %176 = arith.addf %171, %175 : vector<16x256xf32>
    %cst_61 = arith.constant 0.797884583 : f32
    %177 = vector.broadcast %cst_61 : f32 to vector<16x256xf32>
    %178 = arith.mulf %177, %176 : vector<16x256xf32>
    %179 = math.tanh %178 : vector<16x256xf32>
    %cst_62 = arith.constant 1.000000e+00 : f32
    %180 = vector.broadcast %cst_62 : f32 to vector<16x256xf32>
    %181 = arith.addf %180, %179 : vector<16x256xf32>
    %cst_63 = arith.constant 5.000000e-01 : f32
    %182 = vector.broadcast %cst_63 : f32 to vector<16x256xf32>
    %183 = arith.mulf %182, %181 : vector<16x256xf32>
    %184 = arith.mulf %171, %183 : vector<16x256xf32>
    %185 = arith.truncf %184 : vector<16x256xf32> to vector<16x256xbf16>
    %c0_64 = arith.constant 0 : index
    %c0_65 = arith.constant 0 : index
    %c0_66 = arith.constant 0 : index
    %186 = vector.load %arg16[%c0_64, %c0_65, %c0_66] : memref<2x256x128xbf16, #tpu.memory_space<vmem>>, vector<1x256x128xbf16>
    %187 = vector.shape_cast %186 : vector<1x256x128xbf16> to vector<256x128xbf16>
    %cst_67 = arith.constant dense<0.000000e+00> : vector<16x128xf32>
    %188 = tpu.matmul %185, %187, %cst_67 {dimension_numbers = #tpu.dot_dimension_numbers<[1], [0], [0], [1], [0, 0, 1, 1], [], []>} : vector<16x256xbf16>, vector<256x128xbf16>, vector<16x128xf32> -> vector<16x128xf32>
    %c0_68 = arith.constant 0 : index
    %c0_69 = arith.constant 0 : index
    %c0_70 = arith.constant 0 : index
    %189 = vector.load %arg17[%c0_68, %c0_69, %c0_70] : memref<2x1x128xf32, #tpu.memory_space<vmem>>, vector<1x1x128xf32>
    %190 = vector.shape_cast %189 : vector<1x1x128xf32> to vector<1x128xf32>
    %191 = vector.broadcast %190 : vector<1x128xf32> to vector<16x128xf32>
    %192 = arith.addf %188, %191 : vector<16x128xf32>
    %193 = arith.addf %192, %163 : vector<16x128xf32>
    %c0_71 = arith.constant 0 : index
    %c0_72 = arith.constant 0 : index
    %c0_73 = arith.constant 0 : index
    %194 = vector.load %arg18[%c0_71, %c0_72, %c0_73] : memref<2x1x128xf32, #tpu.memory_space<vmem>>, vector<1x1x128xf32>
    %195 = vector.shape_cast %194 : vector<1x1x128xf32> to vector<1x128xf32>
    %c0_74 = arith.constant 0 : index
    %c0_75 = arith.constant 0 : index
    %c0_76 = arith.constant 0 : index
    %196 = vector.load %arg19[%c0_74, %c0_75, %c0_76] : memref<2x1x128xf32, #tpu.memory_space<vmem>>, vector<1x1x128xf32>
    %197 = vector.shape_cast %196 : vector<1x1x128xf32> to vector<1x128xf32>
    %cst_77 = arith.constant dense<0.000000e+00> : vector<16xf32>
    %198 = vector.multi_reduction <add>, %193, %cst_77 [1] : vector<16x128xf32> to vector<16xf32>
    %199 = vector.shape_cast %198 : vector<16xf32> to vector<16x1xf32>
    %cst_78 = arith.constant 1.280000e+02 : f32
    %200 = vector.broadcast %cst_78 : f32 to vector<16x1xf32>
    %201 = arith.divf %199, %200 : vector<16x1xf32>
    %202 = arith.mulf %193, %193 : vector<16x128xf32>
    %cst_79 = arith.constant dense<0.000000e+00> : vector<16xf32>
    %203 = vector.multi_reduction <add>, %202, %cst_79 [1] : vector<16x128xf32> to vector<16xf32>
    %204 = vector.shape_cast %203 : vector<16xf32> to vector<16x1xf32>
    %cst_80 = arith.constant 1.280000e+02 : f32
    %205 = vector.broadcast %cst_80 : f32 to vector<16x1xf32>
    %206 = arith.divf %204, %205 : vector<16x1xf32>
    %207 = arith.mulf %201, %201 : vector<16x1xf32>
    %208 = arith.subf %206, %207 : vector<16x1xf32>
    %209 = vector.broadcast %201 : vector<16x1xf32> to vector<16x128xf32>
    %210 = arith.subf %193, %209 : vector<16x128xf32>
    %cst_81 = arith.constant 9.99999996E-13 : f32
    %211 = vector.broadcast %cst_81 : f32 to vector<16x1xf32>
    %212 = arith.addf %208, %211 : vector<16x1xf32>
    %213 = math.rsqrt %212 : vector<16x1xf32>
    %214 = vector.broadcast %213 : vector<16x1xf32> to vector<16x128xf32>
    %215 = arith.mulf %210, %214 : vector<16x128xf32>
    %216 = vector.broadcast %195 : vector<1x128xf32> to vector<16x128xf32>
    %217 = arith.mulf %215, %216 : vector<16x128xf32>
    %218 = vector.broadcast %197 : vector<1x128xf32> to vector<16x128xf32>
    %219 = arith.addf %217, %218 : vector<16x128xf32>
    %220 = arith.truncf %219 : vector<16x128xf32> to vector<16x128xbf16>
    %c1_82 = arith.constant 1 : index
    %c0_83 = arith.constant 0 : index
    %c0_84 = arith.constant 0 : index
    %221 = vector.load %arg8[%c1_82, %c0_83, %c0_84] : memref<2x128x384xbf16, #tpu.memory_space<vmem>>, vector<1x128x384xbf16>
    %222 = vector.shape_cast %221 : vector<1x128x384xbf16> to vector<128x384xbf16>
    %cst_85 = arith.constant dense<0.000000e+00> : vector<16x384xf32>
    %223 = tpu.matmul %220, %222, %cst_85 {dimension_numbers = #tpu.dot_dimension_numbers<[1], [0], [0], [1], [0, 0, 1, 1], [], []>} : vector<16x128xbf16>, vector<128x384xbf16>, vector<16x384xf32> -> vector<16x384xf32>
    %c1_86 = arith.constant 1 : index
    %c0_87 = arith.constant 0 : index
    %c0_88 = arith.constant 0 : index
    %224 = vector.load %arg9[%c1_86, %c0_87, %c0_88] : memref<2x1x384xf32, #tpu.memory_space<vmem>>, vector<1x1x384xf32>
    %225 = vector.shape_cast %224 : vector<1x1x384xf32> to vector<1x384xf32>
    %226 = vector.broadcast %225 : vector<1x384xf32> to vector<16x384xf32>
    %227 = arith.addf %223, %226 : vector<16x384xf32>
    %228 = vector.extract_strided_slice %227 {offsets = [0, 0], sizes = [16, 128], strides = [1, 1]} : vector<16x384xf32> to vector<16x128xf32>
    %229 = vector.extract_strided_slice %228 {offsets = [0, 0], sizes = [16, 32], strides = [1, 1]} : vector<16x128xf32> to vector<16x32xf32>
    %230 = vector.shape_cast %229 : vector<16x32xf32> to vector<2x8x32xf32>
    %231 = vector.extract_strided_slice %228 {offsets = [0, 32], sizes = [16, 32], strides = [1, 1]} : vector<16x128xf32> to vector<16x32xf32>
    %232 = vector.shape_cast %231 : vector<16x32xf32> to vector<2x8x32xf32>
    %233 = vector.extract_strided_slice %228 {offsets = [0, 64], sizes = [16, 32], strides = [1, 1]} : vector<16x128xf32> to vector<16x32xf32>
    %234 = vector.shape_cast %233 : vector<16x32xf32> to vector<2x8x32xf32>
    %235 = vector.extract_strided_slice %228 {offsets = [0, 96], sizes = [16, 32], strides = [1, 1]} : vector<16x128xf32> to vector<16x32xf32>
    %236 = vector.shape_cast %235 : vector<16x32xf32> to vector<2x8x32xf32>
    %237 = tpu.concatenate %230, %232, %234, %236 in 0 : vector<2x8x32xf32>, vector<2x8x32xf32>, vector<2x8x32xf32>, vector<2x8x32xf32> -> vector<8x8x32xf32>
    %238 = arith.truncf %237 : vector<8x8x32xf32> to vector<8x8x32xbf16>
    %239 = vector.extract_strided_slice %227 {offsets = [0, 128], sizes = [16, 128], strides = [1, 1]} : vector<16x384xf32> to vector<16x128xf32>
    %240 = vector.extract_strided_slice %239 {offsets = [0, 0], sizes = [16, 32], strides = [1, 1]} : vector<16x128xf32> to vector<16x32xf32>
    %241 = vector.shape_cast %240 : vector<16x32xf32> to vector<2x8x32xf32>
    %242 = vector.extract_strided_slice %239 {offsets = [0, 32], sizes = [16, 32], strides = [1, 1]} : vector<16x128xf32> to vector<16x32xf32>
    %243 = vector.shape_cast %242 : vector<16x32xf32> to vector<2x8x32xf32>
    %244 = vector.extract_strided_slice %239 {offsets = [0, 64], sizes = [16, 32], strides = [1, 1]} : vector<16x128xf32> to vector<16x32xf32>
    %245 = vector.shape_cast %244 : vector<16x32xf32> to vector<2x8x32xf32>
    %246 = vector.extract_strided_slice %239 {offsets = [0, 96], sizes = [16, 32], strides = [1, 1]} : vector<16x128xf32> to vector<16x32xf32>
    %247 = vector.shape_cast %246 : vector<16x32xf32> to vector<2x8x32xf32>
    %248 = tpu.concatenate %241, %243, %245, %247 in 0 : vector<2x8x32xf32>, vector<2x8x32xf32>, vector<2x8x32xf32>, vector<2x8x32xf32> -> vector<8x8x32xf32>
    %249 = arith.truncf %248 : vector<8x8x32xf32> to vector<8x8x32xbf16>
    %250 = vector.extract_strided_slice %227 {offsets = [0, 256], sizes = [16, 128], strides = [1, 1]} : vector<16x384xf32> to vector<16x128xf32>
    %251 = vector.extract_strided_slice %250 {offsets = [0, 0], sizes = [16, 32], strides = [1, 1]} : vector<16x128xf32> to vector<16x32xf32>
    %252 = vector.shape_cast %251 : vector<16x32xf32> to vector<2x8x32xf32>
    %253 = vector.extract_strided_slice %250 {offsets = [0, 32], sizes = [16, 32], strides = [1, 1]} : vector<16x128xf32> to vector<16x32xf32>
    %254 = vector.shape_cast %253 : vector<16x32xf32> to vector<2x8x32xf32>
    %255 = vector.extract_strided_slice %250 {offsets = [0, 64], sizes = [16, 32], strides = [1, 1]} : vector<16x128xf32> to vector<16x32xf32>
    %256 = vector.shape_cast %255 : vector<16x32xf32> to vector<2x8x32xf32>
    %257 = vector.extract_strided_slice %250 {offsets = [0, 96], sizes = [16, 32], strides = [1, 1]} : vector<16x128xf32> to vector<16x32xf32>
    %258 = vector.shape_cast %257 : vector<16x32xf32> to vector<2x8x32xf32>
    %259 = tpu.concatenate %252, %254, %256, %258 in 0 : vector<2x8x32xf32>, vector<2x8x32xf32>, vector<2x8x32xf32>, vector<2x8x32xf32> -> vector<8x8x32xf32>
    %260 = arith.truncf %259 : vector<8x8x32xf32> to vector<8x8x32xbf16>
    "tpu.trace_start"() <{level = 10 : i32, message = "bqd,bkd->bqk"}> : () -> ()
    %cst_89 = arith.constant dense<0.000000e+00> : vector<8x8x8xf32>
    %261 = tpu.matmul %238, %249, %cst_89 {dimension_numbers = #tpu.dot_dimension_numbers<[2], [2], [1], [1], [0, 0, 0, 1, 1, 1], [0], [0]>} : vector<8x8x32xbf16>, vector<8x8x32xbf16>, vector<8x8x8xf32> -> vector<8x8x8xf32>
    "tpu.trace_stop"() : () -> ()
    %cst_90 = arith.constant 0.176776692 : f32
    %262 = vector.broadcast %cst_90 : f32 to vector<8x8x8xf32>
    %263 = arith.mulf %261, %262 : vector<8x8x8xf32>
    %264 = vector.broadcast %61 : vector<8x1x8xf32> to vector<8x8x8xf32>
    %265 = arith.addf %263, %264 : vector<8x8x8xf32>
    %cst_91 = arith.constant dense<0xFF800000> : vector<8x8xf32>
    %266 = vector.multi_reduction <maximumf>, %265, %cst_91 [2] : vector<8x8x8xf32> to vector<8x8xf32>
    %267 = vector.shape_cast %266 : vector<8x8xf32> to vector<8x8x1xf32>
    %268 = vector.broadcast %267 : vector<8x8x1xf32> to vector<8x8x8xf32>
    %269 = arith.subf %265, %268 : vector<8x8x8xf32>
    %270 = math.exp %269 : vector<8x8x8xf32>
    %cst_92 = arith.constant dense<0.000000e+00> : vector<8x8xf32>
    %271 = vector.multi_reduction <add>, %270, %cst_92 [2] : vector<8x8x8xf32> to vector<8x8xf32>
    %272 = vector.shape_cast %271 : vector<8x8xf32> to vector<8x8x1xf32>
    %273 = tpu.reciprocal %272 {approx = true} : vector<8x8x1xf32> -> vector<8x8x1xf32>
    %274 = vector.broadcast %273 : vector<8x8x1xf32> to vector<8x8x8xf32>
    %275 = arith.mulf %270, %274 : vector<8x8x8xf32>
    %276 = arith.truncf %275 : vector<8x8x8xf32> to vector<8x8x8xbf16>
    "tpu.trace_start"() <{level = 10 : i32, message = "bqk,bkd->bqd"}> : () -> ()
    %cst_93 = arith.constant dense<0.000000e+00> : vector<8x8x32xf32>
    %277 = tpu.matmul %276, %260, %cst_93 {dimension_numbers = #tpu.dot_dimension_numbers<[2], [1], [1], [2], [0, 0, 0, 1, 1, 2], [0], [0]>} : vector<8x8x8xbf16>, vector<8x8x32xbf16>, vector<8x8x32xf32> -> vector<8x8x32xf32>
    "tpu.trace_stop"() : () -> ()
    %278 = vector.extract_strided_slice %277 {offsets = [0, 0, 0], sizes = [2, 8, 32], strides = [1, 1, 1]} : vector<8x8x32xf32> to vector<2x8x32xf32>
    %279 = vector.shape_cast %278 : vector<2x8x32xf32> to vector<16x32xf32>
    %280 = vector.extract_strided_slice %277 {offsets = [2, 0, 0], sizes = [2, 8, 32], strides = [1, 1, 1]} : vector<8x8x32xf32> to vector<2x8x32xf32>
    %281 = vector.shape_cast %280 : vector<2x8x32xf32> to vector<16x32xf32>
    %282 = vector.extract_strided_slice %277 {offsets = [4, 0, 0], sizes = [2, 8, 32], strides = [1, 1, 1]} : vector<8x8x32xf32> to vector<2x8x32xf32>
    %283 = vector.shape_cast %282 : vector<2x8x32xf32> to vector<16x32xf32>
    %284 = vector.extract_strided_slice %277 {offsets = [6, 0, 0], sizes = [2, 8, 32], strides = [1, 1, 1]} : vector<8x8x32xf32> to vector<2x8x32xf32>
    %285 = vector.shape_cast %284 : vector<2x8x32xf32> to vector<16x32xf32>
    %286 = tpu.concatenate %279, %281, %283, %285 in 1 : vector<16x32xf32>, vector<16x32xf32>, vector<16x32xf32>, vector<16x32xf32> -> vector<16x128xf32>
    %287 = arith.truncf %286 : vector<16x128xf32> to vector<16x128xbf16>
    %c1_94 = arith.constant 1 : index
    %c0_95 = arith.constant 0 : index
    %c0_96 = arith.constant 0 : index
    %288 = vector.load %arg10[%c1_94, %c0_95, %c0_96] : memref<2x128x128xbf16, #tpu.memory_space<vmem>>, vector<1x128x128xbf16>
    %289 = vector.shape_cast %288 : vector<1x128x128xbf16> to vector<128x128xbf16>
    %cst_97 = arith.constant dense<0.000000e+00> : vector<16x128xf32>
    %290 = tpu.matmul %287, %289, %cst_97 {dimension_numbers = #tpu.dot_dimension_numbers<[1], [0], [0], [1], [0, 0, 1, 1], [], []>} : vector<16x128xbf16>, vector<128x128xbf16>, vector<16x128xf32> -> vector<16x128xf32>
    %c1_98 = arith.constant 1 : index
    %c0_99 = arith.constant 0 : index
    %c0_100 = arith.constant 0 : index
    %291 = vector.load %arg11[%c1_98, %c0_99, %c0_100] : memref<2x1x128xf32, #tpu.memory_space<vmem>>, vector<1x1x128xf32>
    %292 = vector.shape_cast %291 : vector<1x1x128xf32> to vector<1x128xf32>
    %293 = vector.broadcast %292 : vector<1x128xf32> to vector<16x128xf32>
    %294 = arith.addf %290, %293 : vector<16x128xf32>
    %295 = arith.addf %294, %219 : vector<16x128xf32>
    %c1_101 = arith.constant 1 : index
    %c0_102 = arith.constant 0 : index
    %c0_103 = arith.constant 0 : index
    %296 = vector.load %arg12[%c1_101, %c0_102, %c0_103] : memref<2x1x128xf32, #tpu.memory_space<vmem>>, vector<1x1x128xf32>
    %297 = vector.shape_cast %296 : vector<1x1x128xf32> to vector<1x128xf32>
    %c1_104 = arith.constant 1 : index
    %c0_105 = arith.constant 0 : index
    %c0_106 = arith.constant 0 : index
    %298 = vector.load %arg13[%c1_104, %c0_105, %c0_106] : memref<2x1x128xf32, #tpu.memory_space<vmem>>, vector<1x1x128xf32>
    %299 = vector.shape_cast %298 : vector<1x1x128xf32> to vector<1x128xf32>
    %cst_107 = arith.constant dense<0.000000e+00> : vector<16xf32>
    %300 = vector.multi_reduction <add>, %295, %cst_107 [1] : vector<16x128xf32> to vector<16xf32>
    %301 = vector.shape_cast %300 : vector<16xf32> to vector<16x1xf32>
    %cst_108 = arith.constant 1.280000e+02 : f32
    %302 = vector.broadcast %cst_108 : f32 to vector<16x1xf32>
    %303 = arith.divf %301, %302 : vector<16x1xf32>
    %304 = arith.mulf %295, %295 : vector<16x128xf32>
    %cst_109 = arith.constant dense<0.000000e+00> : vector<16xf32>
    %305 = vector.multi_reduction <add>, %304, %cst_109 [1] : vector<16x128xf32> to vector<16xf32>
    %306 = vector.shape_cast %305 : vector<16xf32> to vector<16x1xf32>
    %cst_110 = arith.constant 1.280000e+02 : f32
    %307 = vector.broadcast %cst_110 : f32 to vector<16x1xf32>
    %308 = arith.divf %306, %307 : vector<16x1xf32>
    %309 = arith.mulf %303, %303 : vector<16x1xf32>
    %310 = arith.subf %308, %309 : vector<16x1xf32>
    %311 = vector.broadcast %303 : vector<16x1xf32> to vector<16x128xf32>
    %312 = arith.subf %295, %311 : vector<16x128xf32>
    %cst_111 = arith.constant 9.99999996E-13 : f32
    %313 = vector.broadcast %cst_111 : f32 to vector<16x1xf32>
    %314 = arith.addf %310, %313 : vector<16x1xf32>
    %315 = math.rsqrt %314 : vector<16x1xf32>
    %316 = vector.broadcast %315 : vector<16x1xf32> to vector<16x128xf32>
    %317 = arith.mulf %312, %316 : vector<16x128xf32>
    %318 = vector.broadcast %297 : vector<1x128xf32> to vector<16x128xf32>
    %319 = arith.mulf %317, %318 : vector<16x128xf32>
    %320 = vector.broadcast %299 : vector<1x128xf32> to vector<16x128xf32>
    %321 = arith.addf %319, %320 : vector<16x128xf32>
    %322 = arith.truncf %321 : vector<16x128xf32> to vector<16x128xbf16>
    %c1_112 = arith.constant 1 : index
    %c0_113 = arith.constant 0 : index
    %c0_114 = arith.constant 0 : index
    %323 = vector.load %arg14[%c1_112, %c0_113, %c0_114] : memref<2x128x256xbf16, #tpu.memory_space<vmem>>, vector<1x128x256xbf16>
    %324 = vector.shape_cast %323 : vector<1x128x256xbf16> to vector<128x256xbf16>
    %cst_115 = arith.constant dense<0.000000e+00> : vector<16x256xf32>
    %325 = tpu.matmul %322, %324, %cst_115 {dimension_numbers = #tpu.dot_dimension_numbers<[1], [0], [0], [1], [0, 0, 1, 1], [], []>} : vector<16x128xbf16>, vector<128x256xbf16>, vector<16x256xf32> -> vector<16x256xf32>
    %c1_116 = arith.constant 1 : index
    %c0_117 = arith.constant 0 : index
    %c0_118 = arith.constant 0 : index
    %326 = vector.load %arg15[%c1_116, %c0_117, %c0_118] : memref<2x1x256xf32, #tpu.memory_space<vmem>>, vector<1x1x256xf32>
    %327 = vector.shape_cast %326 : vector<1x1x256xf32> to vector<1x256xf32>
    %328 = vector.broadcast %327 : vector<1x256xf32> to vector<16x256xf32>
    %329 = arith.addf %325, %328 : vector<16x256xf32>
    %330 = arith.mulf %329, %329 : vector<16x256xf32>
    %331 = arith.mulf %329, %330 : vector<16x256xf32>
    %cst_119 = arith.constant 4.471500e-02 : f32
    %332 = vector.broadcast %cst_119 : f32 to vector<16x256xf32>
    %333 = arith.mulf %332, %331 : vector<16x256xf32>
    %334 = arith.addf %329, %333 : vector<16x256xf32>
    %cst_120 = arith.constant 0.797884583 : f32
    %335 = vector.broadcast %cst_120 : f32 to vector<16x256xf32>
    %336 = arith.mulf %335, %334 : vector<16x256xf32>
    %337 = math.tanh %336 : vector<16x256xf32>
    %cst_121 = arith.constant 1.000000e+00 : f32
    %338 = vector.broadcast %cst_121 : f32 to vector<16x256xf32>
    %339 = arith.addf %338, %337 : vector<16x256xf32>
    %cst_122 = arith.constant 5.000000e-01 : f32
    %340 = vector.broadcast %cst_122 : f32 to vector<16x256xf32>
    %341 = arith.mulf %340, %339 : vector<16x256xf32>
    %342 = arith.mulf %329, %341 : vector<16x256xf32>
    %343 = arith.truncf %342 : vector<16x256xf32> to vector<16x256xbf16>
    %c1_123 = arith.constant 1 : index
    %c0_124 = arith.constant 0 : index
    %c0_125 = arith.constant 0 : index
    %344 = vector.load %arg16[%c1_123, %c0_124, %c0_125] : memref<2x256x128xbf16, #tpu.memory_space<vmem>>, vector<1x256x128xbf16>
    %345 = vector.shape_cast %344 : vector<1x256x128xbf16> to vector<256x128xbf16>
    %cst_126 = arith.constant dense<0.000000e+00> : vector<16x128xf32>
    %346 = tpu.matmul %343, %345, %cst_126 {dimension_numbers = #tpu.dot_dimension_numbers<[1], [0], [0], [1], [0, 0, 1, 1], [], []>} : vector<16x256xbf16>, vector<256x128xbf16>, vector<16x128xf32> -> vector<16x128xf32>
    %c1_127 = arith.constant 1 : index
    %c0_128 = arith.constant 0 : index
    %c0_129 = arith.constant 0 : index
    %347 = vector.load %arg17[%c1_127, %c0_128, %c0_129] : memref<2x1x128xf32, #tpu.memory_space<vmem>>, vector<1x1x128xf32>
    %348 = vector.shape_cast %347 : vector<1x1x128xf32> to vector<1x128xf32>
    %349 = vector.broadcast %348 : vector<1x128xf32> to vector<16x128xf32>
    %350 = arith.addf %346, %349 : vector<16x128xf32>
    %351 = arith.addf %350, %321 : vector<16x128xf32>
    %c1_130 = arith.constant 1 : index
    %c0_131 = arith.constant 0 : index
    %c0_132 = arith.constant 0 : index
    %352 = vector.load %arg18[%c1_130, %c0_131, %c0_132] : memref<2x1x128xf32, #tpu.memory_space<vmem>>, vector<1x1x128xf32>
    %353 = vector.shape_cast %352 : vector<1x1x128xf32> to vector<1x128xf32>
    %c1_133 = arith.constant 1 : index
    %c0_134 = arith.constant 0 : index
    %c0_135 = arith.constant 0 : index
    %354 = vector.load %arg19[%c1_133, %c0_134, %c0_135] : memref<2x1x128xf32, #tpu.memory_space<vmem>>, vector<1x1x128xf32>
    %355 = vector.shape_cast %354 : vector<1x1x128xf32> to vector<1x128xf32>
    %cst_136 = arith.constant dense<0.000000e+00> : vector<16xf32>
    %356 = vector.multi_reduction <add>, %351, %cst_136 [1] : vector<16x128xf32> to vector<16xf32>
    %357 = vector.shape_cast %356 : vector<16xf32> to vector<16x1xf32>
    %cst_137 = arith.constant 1.280000e+02 : f32
    %358 = vector.broadcast %cst_137 : f32 to vector<16x1xf32>
    %359 = arith.divf %357, %358 : vector<16x1xf32>
    %360 = arith.mulf %351, %351 : vector<16x128xf32>
    %cst_138 = arith.constant dense<0.000000e+00> : vector<16xf32>
    %361 = vector.multi_reduction <add>, %360, %cst_138 [1] : vector<16x128xf32> to vector<16xf32>
    %362 = vector.shape_cast %361 : vector<16xf32> to vector<16x1xf32>
    %cst_139 = arith.constant 1.280000e+02 : f32
    %363 = vector.broadcast %cst_139 : f32 to vector<16x1xf32>
    %364 = arith.divf %362, %363 : vector<16x1xf32>
    %365 = arith.mulf %359, %359 : vector<16x1xf32>
    %366 = arith.subf %364, %365 : vector<16x1xf32>
    %367 = vector.broadcast %359 : vector<16x1xf32> to vector<16x128xf32>
    %368 = arith.subf %351, %367 : vector<16x128xf32>
    %cst_140 = arith.constant 9.99999996E-13 : f32
    %369 = vector.broadcast %cst_140 : f32 to vector<16x1xf32>
    %370 = arith.addf %366, %369 : vector<16x1xf32>
    %371 = math.rsqrt %370 : vector<16x1xf32>
    %372 = vector.broadcast %371 : vector<16x1xf32> to vector<16x128xf32>
    %373 = arith.mulf %368, %372 : vector<16x128xf32>
    %374 = vector.broadcast %353 : vector<1x128xf32> to vector<16x128xf32>
    %375 = arith.mulf %373, %374 : vector<16x128xf32>
    %376 = vector.broadcast %355 : vector<1x128xf32> to vector<16x128xf32>
    %377 = arith.addf %375, %376 : vector<16x128xf32>
    %378 = vector.shape_cast %377 : vector<16x128xf32> to vector<2x8x128xf32>
    %379 = vector.extract_strided_slice %378 {offsets = [0, 0, 0], sizes = [2, 1, 128], strides = [1, 1, 1]} : vector<2x8x128xf32> to vector<2x1x128xf32>
    %380 = vector.shape_cast %379 : vector<2x1x128xf32> to vector<2x128xf32>
    %381 = arith.negf %380 : vector<2x128xf32>
    %382 = math.exp %381 : vector<2x128xf32>
    %cst_141 = arith.constant 1.000000e+00 : f32
    %383 = vector.broadcast %cst_141 : f32 to vector<2x128xf32>
    %384 = arith.addf %383, %382 : vector<2x128xf32>
    %385 = arith.divf %383, %384 : vector<2x128xf32>
    %386 = arith.mulf %380, %385 : vector<2x128xf32>
    %387 = arith.truncf %386 : vector<2x128xf32> to vector<2x128xbf16>
    %c0_142 = arith.constant 0 : index
    %c0_143 = arith.constant 0 : index
    %388 = vector.load %arg20[%c0_142, %c0_143] : memref<128x128xbf16, #tpu.memory_space<vmem>>, vector<128x128xbf16>
    %cst_144 = arith.constant dense<0.000000e+00> : vector<2x128xf32>
    %389 = tpu.matmul %387, %388, %cst_144 {dimension_numbers = #tpu.dot_dimension_numbers<[1], [0], [0], [1], [0, 0, 1, 1], [], []>} : vector<2x128xbf16>, vector<128x128xbf16>, vector<2x128xf32> -> vector<2x128xf32>
    %c0_145 = arith.constant 0 : index
    %c0_146 = arith.constant 0 : index
    %390 = vector.load %arg21[%c0_145, %c0_146] : memref<1x128xf32, #tpu.memory_space<vmem>>, vector<1x128xf32>
    %391 = vector.broadcast %390 : vector<1x128xf32> to vector<2x128xf32>
    %392 = arith.addf %389, %391 : vector<2x128xf32>
    %c0_147 = arith.constant 0 : index
    %c0_148 = arith.constant 0 : index
    %393 = vector.load %arg22[%c0_147, %c0_148] : memref<2x128xf32, #tpu.memory_space<vmem>>, vector<2x128xf32>
    tpu.vector_store %arg22[%c0_147, %c0_148], %392 {strides = array<i32>} : memref<2x128xf32, #tpu.memory_space<vmem>>, vector<2x128xf32>,
    return
  }
}

</mosaic_0001>

<bundles_post_ra>
// kernel: tpu_custom_call.1
= control target key start
LH: loop header
LB: loop body
LE: loop exit
PB: predicated region body
PF: predicated region fallthrough
CT: control target
= control target key end

     0   :  { %s5274_s0 = inlined_call_operand.vmem [shape: s32[16,1], index: 0, kind: input, shape index: {}]   ;;  %s5275_s1 = inlined_call_operand.vmem [shape: s32[16,1], index: 1, kind: input, shape index: {}]   ;;  %s5276_s2 = inlined_call_operand.vmem [shape: f32[2,8], index: 2, kind: input, shape index: {}]   ;;  %s5277_s3 = inlined_call_operand.hbm [shape: bf16[512,128], index: 3, kind: input, shape index: {}]   ;;  %s5278_s4 = inlined_call_operand.hbm [shape: f32[64,128], index: 4, kind: input, shape index: {}]   ;;  %s5279_s5 = inlined_call_operand.vmem [shape: f32[2,128], index: 5, kind: input, shape index: {}]   ;;  %s5280_s6 = inlined_call_operand.vmem [shape: f32[1,128], index: 6, kind: input, shape index: {}]   ;;  %s5281_s7 = inlined_call_operand.vmem [shape: f32[1,128], index: 7, kind: input, shape index: {}]   ;;  %s5282_s8 = inlined_call_operand.hbm [shape: bf16[2,128,384], index: 8, kind: input, shape index: {}]   ;;  %s5283_s9 = inlined_call_operand.vmem [shape: f32[2,1,384], index: 9, kind: input, shape index: {}]   ;;  %s5284_s10 = inlined_call_operand.hbm [shape: bf16[2,128,128], index: 10, kind: input, shape index: {}]   ;;  %s5285_s11 = inlined_call_operand.vmem [shape: f32[2,1,128], index: 11, kind: input, shape index: {}]   ;;  %s5286_s12 = inlined_call_operand.vmem [shape: f32[2,1,128], index: 12, kind: input, shape index: {}]   ;;  %s5287_s13 = inlined_call_operand.vmem [shape: f32[2,1,128], index: 13, kind: input, shape index: {}]   ;;  %s5288_s14 = inlined_call_operand.hbm [shape: bf16[2,128,256], index: 14, kind: input, shape index: {}]   ;;  %s5289_s15 = inlined_call_operand.vmem [shape: f32[2,1,256], index: 15, kind: input, shape index: {}]   ;;  %s5290_s16 = inlined_call_operand.hbm [shape: bf16[2,256,128], index: 16, kind: input, shape index: {}]   ;;  %s5291_s17 = inlined_call_operand.vmem [shape: f32[2,1,128], index: 17, kind: input, shape index: {}]   ;;  %s5292_s18 = inlined_call_operand.vmem [shape: f32[2,1,128], index: 18, kind: input, shape index: {}]   ;;  %s5293_s19 = inlined_call_operand.vmem [shape: f32[2,1,128], index: 19, kind: input, shape index: {}]   ;;  %s5294_s20 = inlined_call_operand.hbm [shape: bf16[128,128], index: 20, kind: input, shape index: {}]   ;;  %s5295_s21 = inlined_call_operand.vmem [shape: f32[1,128], index: 21, kind: input, shape index: {}]   ;;  %s5296_s22 = inlined_call_operand.hbm [shape: f32[2,128], index: 22, kind: output, shape index: {}]  }
   0x1   :  { %5301 = sst [smem:[#allocation20_spill]] %s5274_s0 }
   0x2   :  { %5302 = sst [smem:[#allocation21_spill]] %s5275_s1 }
   0x3   :  { %5303 = sst [smem:[#allocation22_spill]] %s5276_s2 }
   0x4   :  { %5304 = sst [smem:[#allocation23_spill]] %s5277_s3 }
   0x5   :  { %5305 = sst [smem:[#allocation24_spill]] %s5278_s4 }
   0x6   :  { %5306 = sst [smem:[#allocation25_spill]] %s5279_s5 }
   0x7   :  { %5307 = sst [smem:[#allocation26_spill]] %s5280_s6 }
   0x8   :  { %27 = vsyncpa [#allocation3], 0 }
   0x9   :  { %28 = vsyncpa [#allocation6], 0 }
   0xa   :  { %29 = vsyncpa [#allocation9], 0 }
   0xb   :  { %30 = vsyncpa [#allocation12], 0  ;;  %s5308_s29 = sld [smem:[#allocation24_spill]] }
  0x11   :  { %s55_s30 = sshll.u32 %s5308_s29, 4  ;;  %s56_s30 = int_to_ptr.hbm [resolvable:$true] %s55_s30 }
  0x12   :  { %31 = vsyncpa [#allocation4], 0  ;;  %s4706_s4 = smov [#allocation5]   ;;  %s5300_s23 = smov 128  }
  0x13   :  { %s57_s0 = sshll.u32 %s4706_s4, 4  ;;  %s4708_s1 = smov 8   ;;  %s58_s0 = int_to_ptr.vmem [resolvable:$true] %s57_s0 }
  0x14   :  { %63 = dma.hbm_to_vmem [thread:$0]  %s56_s30, 1024, %s58_s0, [#allocation6], %s5300_s23, %s5300_s23, %s4708_s1  }
  0x15   :  { %s89_s6 = sshll.u32 %s5284_s10, 4  ;;  %s4709_s25 = smov [#allocation8]   ;;  %s90_s6 = int_to_ptr.hbm [resolvable:$true] %s89_s6 }
  0x16   :  { %s91_s26 = sshll.u32 %s4709_s25, 4  ;;  %s123_s3 = sshll.u32 %s5290_s16, 4  ;;  %s92_s26 = int_to_ptr.vmem [resolvable:$true] %s91_s26  ;;  %s124_s3 = int_to_ptr.hbm [resolvable:$true] %s123_s3 }
  0x17   :  { %s4710_s28 = smov 64   ;;  %s4711_s29 = smov 4  }
  0x18   :  { %97 = dma.hbm_to_vmem [thread:$0]  %s90_s6, 2048, %s92_s26, [#allocation9], %s4710_s28, %s4710_s28, %s4711_s29  }
  0x19   :  { %s5309_s0 = sld [smem:[#allocation23_spill]]  ;;  %s4712_s10 = smov [#allocation11]  }
  0x1a   :  { %s125_s24 = sshll.u32 %s4712_s10, 4  ;;  %s4713_s16 = smov [#allocation2]   ;;  %s126_s24 = int_to_ptr.vmem [resolvable:$true] %s125_s24 }
  0x1b   :  { %131 = dma.hbm_to_vmem [thread:$0]  %s124_s3, 4096, %s126_s24, [#allocation12], %s4710_s28, %s4710_s28, %s4711_s29  }
  0x1c   :  { %s44_s25 = sshll.u32 %s4713_s16, 4  ;;  %s74_s23 = sshll.u32 %s5282_s8, 4  ;;  %s45_s25 = int_to_ptr.vmem [resolvable:$true] %s44_s25  ;;  %s75_s23 = int_to_ptr.hbm [resolvable:$true] %s74_s23 }
  0x1d   :  { %s4714_s6 = smov [#allocation7]   ;;  %s4715_s3 = smov 192  }
  0x1e   :  { %s76_s26 = sshll.u32 %s4714_s6, 4  ;;  %s4716_s10 = smov 12   ;;  %s77_s26 = int_to_ptr.vmem [resolvable:$true] %s76_s26 }
  0x1f   :  { %s42_s5 = sshll.u32 %s5309_s0, 4  ;;  %s108_s0 = sshll.u32 %s5288_s14, 4  ;;  %s43_s5 = int_to_ptr.hbm [resolvable:$true] %s42_s5  ;;  %s109_s0 = int_to_ptr.hbm [resolvable:$true] %s108_s0 }
  0x20   :  { %50 = dma.hbm_to_vmem [thread:$0]  %s43_s5, 4096, %s45_s25, [#allocation3], %s4710_s28, %s4710_s28, %s4711_s29  }
  0x21   :  { %82 = dma.hbm_to_vmem [thread:$0]  %s75_s23, 6144, %s77_s26, [#allocation6], %s4715_s3, %s4715_s3, %s4716_s10  }
  0x22   :  { %s4717_s24 = smov [#allocation10]   ;;  %s142_s27 = sshll.u32 %s5294_s20, 4  ;;  %s143_s27 = int_to_ptr.hbm [resolvable:$true] %s142_s27 }
  0x23   :  { %s110_s16 = sshll.u32 %s4717_s24, 4  ;;  %s5310_s5 = smov 128   ;;  %s111_s16 = int_to_ptr.vmem [resolvable:$true] %s110_s16 }
  0x24   :  { %116 = dma.hbm_to_vmem [thread:$0]  %s109_s0, 4096, %s111_s16, [#allocation9], %s5310_s5, %s5310_s5, %s4708_s1  }
  0x25   :  { %s4718_s25 = smov [#allocation13]  }
  0x26   :  { %s144_s6 = sshll.u32 %s4718_s25, 4  ;;  %s145_s6 = int_to_ptr.vmem [resolvable:$true] %s144_s6 }
  0x27   :  { %150 = dma.hbm_to_vmem [thread:$0]  %s143_s27, 1024, %s145_s6, [#allocation12], %s4710_s28, %s4710_s28, %s4711_s29  }
  0x28   :  { %4696 = dma.done.wait [#allocation3], 4096  }
  0x29   :  { %4697 = vsyncadd [#allocation3], 4294963200 }
  0x2a   :  { %4698 = dma.done.wait [#allocation6], 7168  }
  0x2b   :  { %4699 = vsyncadd [#allocation6], 4294960128 }
  0x2c   :  { %4700 = dma.done.wait [#allocation9], 6144  }
  0x2d   :  { %4701 = vsyncadd [#allocation9], 4294961152 }
  0x2e   :  { %4702 = dma.done.wait [#allocation12], 5120  }
  0x2f   :  { %4703 = vsyncadd [#allocation12], 4294962176  ;;  %v4719_v0 = vmov 0   ;;  %s5311_s23 = sld [smem:[#allocation20_spill]]  ;;  %v4075_v2 = vld [vmem:[#allocation2 + $0x38] sm:$0xff]  ;;  %v4074_v6 = vld [vmem:[#allocation2 + $0x30] sm:$0xff]  ;;  %v184_v39 = vlaneseq }
  0x30   :  { %4255 = vset.pattern.permute.xlu0 %v4719_v0  ;;  %4256 = vset.pattern.permute.xlu1 %v4719_v0  ;;  %v4083_v3 = vld [vmem:[#allocation2 + $0x78] sm:$0xff]  ;;  %v4082_v7 = vld [vmem:[#allocation2 + $0x70] sm:$0xff]  ;;  %v4073_v11 = vld [vmem:[#allocation2 + $0x28] sm:$0xff]  ;;  %s5312_s4 = sld [smem:[#allocation21_spill]]  ;;  %v4720_v46 = vmov 1.0|1.0  }
  0x31   :  { %v4091_v4 = vld [vmem:[#allocation2 + $0xb8] sm:$0xff]  ;;  %500 = vmatpush.bf16.msra.mxu0 %v4075_v2  ;;  %514 = vmatpush.bf16.msra.mxu1 %v4083_v3  ;;  %v4090_v8 = vld [vmem:[#allocation2 + $0xb0] sm:$0xff]  ;;  %v4081_v12 = vld [vmem:[#allocation2 + $0x68] sm:$0xff]  ;;  %v185_v41 = vand.u32 127, %v184_v39  ;;  %s5313_s16 = sld [smem:[#allocation25_spill]]  ;;  %s4723_s1 = smov 96  }
  0x32   :  { %v4099_v5 = vld [vmem:[#allocation2 + $0xf8] sm:$0xff]  ;;  %528 = vmatpush.bf16.msra.mxu2 %v4091_v4  ;;  %v4098_v9 = vld [vmem:[#allocation2 + $0xf0] sm:$0xff]  ;;  %v4089_v13 = vld [vmem:[#allocation2 + $0xa8] sm:$0xff]  ;;  %s5314_s25 = sld [smem:[#allocation26_spill]]  ;;  %s4724_s10 = smov [#allocation14]  }
  0x33   :  { %542 = vmatpush.bf16.msra.mxu3 %v4099_v5  ;;  %v4097_v14 = vld [vmem:[#allocation2 + $0xe8] sm:$0xff]  ;;  %v4072_v15 = vld [vmem:[#allocation2 + $0x20] sm:$0xff]  ;;  %v4071_v19 = vld [vmem:[#allocation2 + $0x18] sm:$0xff]  ;;  %v186_v42 = vadd.s32 128, %v185_v41  ;;  %v187_v43 = vadd.s32 256, %v185_v41  ;;  %v188_v45 = vadd.s32 384, %v185_v41 }
  0x34   :  { %v4080_v16 = vld [vmem:[#allocation2 + $0x60] sm:$0xff]  ;;  %v4079_v20 = vld [vmem:[#allocation2 + $0x58] sm:$0xff]  ;;  %v4070_v23 = vld [vmem:[#allocation2 + $0x10] sm:$0xff]  ;;  %s5315_s30 = sld [smem:[#allocation22_spill]]  ;;  %s3323_s24 = sshll.u32 %s4724_s10, 4  ;;  %s3324_s24 = int_to_ptr.vmem [resolvable:$true] %s3323_s24 }
  0x35   :  { %v182_v1 = vld [vmem:[%s5311_s23] sm:$0xff]  ;;  %v183_v10 = vld [vmem:[%s5311_s23 + $0x8] sm:$0xff]  ;;  %501 = vmatpush.bf16.msra.mxu0 %v4074_v6  ;;  %515 = vmatpush.bf16.msra.mxu1 %v4082_v7  ;;  %v4087_v21 = vld [vmem:[#allocation2 + $0x98] sm:$0xff]  ;;  %s3325_s2 = sshll.u32 %s5296_s22, 4  ;;  %s3326_s2 = int_to_ptr.hbm [resolvable:$true] %s3325_s2 }
  0x36   :  { %190 = vperm.xlu0 %4255, %v182_v1   ;;  %529 = vmatpush.bf16.msra.mxu2 %v4090_v8  ;;  %v4088_v17 = vld [vmem:[#allocation2 + $0xa0] sm:$0xff]  ;;  %v4095_v22 = vld [vmem:[#allocation2 + $0xd8] sm:$0xff]  ;;  %v4078_v24 = vld [vmem:[#allocation2 + $0x50] sm:$0xff] }
  0x37   :  { %543 = vmatpush.bf16.msra.mxu3 %v4098_v9  ;;  %v4096_v18 = vld [vmem:[#allocation2 + $0xe0] sm:$0xff]  ;;  %v4086_v25 = vld [vmem:[#allocation2 + $0x90] sm:$0xff]  ;;  %v4069_v27 = vld [vmem:[#allocation2 + $0x8] sm:$0xff] }
  0x38   :  { %v4094_v26 = vld [vmem:[#allocation2 + $0xd0] sm:$0xff]  ;;  %v4077_v28 = vld [vmem:[#allocation2 + $0x48] sm:$0xff]  ;;  %v4068_v31 = vld [vmem:[#allocation2] sm:$0xff] }
  0x39   :  { %502 = vmatpush.bf16.msra.mxu0 %v4073_v11  ;;  %516 = vmatpush.bf16.msra.mxu1 %v4081_v12  ;;  %v4085_v29 = vld [vmem:[#allocation2 + $0x88] sm:$0xff]  ;;  %v4076_v32 = vld [vmem:[#allocation2 + $0x40] sm:$0xff] }
  0x3a   :  { %530 = vmatpush.bf16.msra.mxu2 %v4089_v13  ;;  %v4093_v30 = vld [vmem:[#allocation2 + $0xc8] sm:$0xff]  ;;  %v4084_v33 = vld [vmem:[#allocation2 + $0x80] sm:$0xff]  ;;  %v4122_v13 = vld [vmem:[#allocation7 + $0xb0] sm:$0xf0] }
  0x3b   :  { %544 = vmatpush.bf16.msra.mxu3 %v4097_v14  ;;  %v4092_v34 = vld [vmem:[#allocation2 + $0xc0] sm:$0xff]  ;;  %v289_v37 = vld [vmem:[%s5312_s4 + $0x8] sm:$0xff] }
  0x3c   :  { %v288_v35 = vld [vmem:[%s5312_s4] sm:$0xff]  ;;  %vm291_vm1 = vcmp.eq.s32.totalorder %v289_v37, 0  ;;  %v3568_v12 = vld [vmem:[#allocation7 + $0xa8] sm:$0xf]  ;;  %v4121_v14 = vld [vmem:[#allocation7 + $0xac] sm:$0xf] }
  0x3d   :  { %503 = vmatpush.bf16.msra.mxu0 %v4072_v15  ;;  %517 = vmatpush.bf16.msra.mxu1 %v4080_v16  ;;  %vm290_vm0 = vcmp.eq.s32.totalorder %v288_v35, 0  ;;  %v295_v38 = vsel %vm291_vm1, 1, %v4719_v0  ;;  %v287_v47 = vld [vmem:[#allocation5] sm:$0xff]  ;;  %v3569_v15 = vor.u32 %v4122_v13, %v3568_v12  ;;  %v3570_v16 = vld [vmem:[#allocation7 + $0xb4] sm:$0xf0] }
  0x3e   :  { %193 = vperm.xlu0 %4255, %v183_v10   ;;  %531 = vmatpush.bf16.msra.mxu2 %v4088_v17  ;;  %v294_v36 = vsel %vm290_vm0, 1, %v4719_v0  ;;  %v4377_v52 = vld [vmem:[%s5313_s16] ss:$0 sm:$0xff]  ;;  %v4378_v53 = vld [vmem:[%s5313_s16 + $0x1] ss:$0 sm:$0xff]  ;;  %v4721_v10 = vmov 128.0  }
  0x3f   :  { %545 = vmatpush.bf16.msra.mxu3 %v4096_v18  ;;  %297 = vperm.xlu1 %4256, %v294_v36   ;;  %4394 = vrcp.f32 %v4721_v10  ;;  %v3576_v17 = vld [vmem:[#allocation7 + $0xb0] sm:$0xf]  ;;  %v4123_v18 = vld [vmem:[#allocation7 + $0xb8] sm:$0xf0]  ;;  %v3546_v36 = vld [vmem:[#allocation7 + $0x84] sm:$0xf0] }
  0x40   :  { %v3552_v37 = vld [vmem:[#allocation7 + $0x80] sm:$0xf]  ;;  %v4104_v13 = vld [vmem:[#allocation7 + $0x20] sm:$0xf0] }
  0x41   :  { %504 = vmatpush.bf16.msra.mxu0 %v4071_v19  ;;  %518 = vmatpush.bf16.msra.mxu1 %v4079_v20  ;;  %v3573_v19 = vor.u32 %v4121_v14, %v3570_v16  ;;  %v3577_v20 = vor.u32 %v4123_v18, %v3576_v17  ;;  %v4103_v14 = vld [vmem:[#allocation7 + $0x1c] sm:$0xf]  ;;  %v3498_v18 = vld [vmem:[#allocation7 + $0x24] sm:$0xf0] }
  0x42   :  { %532 = vmatpush.bf16.msra.mxu2 %v4087_v21 }
  0x43   :  { %546 = vmatpush.bf16.msra.mxu3 %v4095_v22  ;;  %v3556_v22 = vld [vmem:[#allocation7 + $0x90] sm:$0xf] }
  0x45   :  { %505 = vmatpush.bf16.msra.mxu0 %v4070_v23  ;;  %519 = vmatpush.bf16.msra.mxu1 %v4078_v24  ;;  %v4911_v11 = vpop.eup %4394  ;;  %v4119_v23 = vld [vmem:[#allocation7 + $0x98] sm:$0xf0]  ;;  %v4118_v24 = vld [vmem:[#allocation7 + $0x94] sm:$0xf] }
  0x46   :  { %533 = vmatpush.bf16.msra.mxu2 %v4086_v25  ;;  %v565_v21 = vmul.f32 128.0, %v4911_v11  ;;  %v3557_v25 = vor.u32 %v4119_v23, %v3556_v22  ;;  %vm569_vm0 = vweird.f32 %v4911_v11  ;;  %v3484_v23 = vld [vmem:[#allocation7] sm:$0xf] }
  0x47   :  { %547 = vmatpush.bf16.msra.mxu3 %v4094_v26  ;;  %300 = vperm.xlu1 %4256, %v295_v38   ;;  %v3558_v26 = vld [vmem:[#allocation7 + $0x9c] sm:$0xf0]  ;;  %v4117_v38 = vld [vmem:[#allocation7 + $0x88] sm:$0xf0] }
  0x49   :  { %506 = vmatpush.bf16.msra.mxu0 %v4069_v27  ;;  %520 = vmatpush.bf16.msra.mxu1 %v4077_v28  ;;  %v3564_v27 = vld [vmem:[#allocation7 + $0x98] sm:$0xf]  ;;  %v4120_v28 = vld [vmem:[#allocation7 + $0xa0] sm:$0xf0] }
  0x4a   :  { %534 = vmatpush.bf16.msra.mxu2 %v4085_v29  ;;  %v3561_v29 = vor.u32 %v4118_v24, %v3558_v26  ;;  %v4101_v24 = vld [vmem:[#allocation7 + $0x8] sm:$0xf0] }
  0x4b   :  { %548 = vmatpush.bf16.msra.mxu3 %v4093_v30  ;;  %v3565_v30 = vor.u32 %v4120_v28, %v3564_v27  ;;  %v3485_v27 = vor.u32 %v4101_v24, %v3484_v23  ;;  %v3486_v28 = vld [vmem:[#allocation7 + $0xc] sm:$0xf0] }
  0x4d   :  { %507 = vmatpush.bf16.msra.mxu0 %v4068_v31  ;;  %521 = vmatpush.bf16.msra.mxu1 %v4076_v32  ;;  %v566_v31 = vsub.f32 1.0, %v565_v21  ;;  %v3544_v32 = vld [vmem:[#allocation7 + $0x78] sm:$0xf]  ;;  %v3501_v21 = vor.u32 %v4103_v14, %v3498_v18 }
  0x4e   :  { %535 = vmatpush.bf16.msra.mxu2 %v4084_v33  ;;  %v4116_v33 = vld [vmem:[#allocation7 + $0x80] sm:$0xf0] }
  0x4f   :  { %549 = vmatpush.bf16.msra.mxu3 %v4092_v34  ;;  %v4115_v34 = vld [vmem:[#allocation7 + $0x7c] sm:$0xf]  ;;  %v3545_v35 = vor.u32 %v4116_v33, %v3544_v32 }
  0x50   :  { %v3549_v39 = vor.u32 %v4115_v34, %v3546_v36 }
  0x51   :  { %795 = vmatpush.bf16.msrb.mxu0 %v3569_v15  ;;  %809 = vmatpush.bf16.msrb.mxu1 %v3573_v19  ;;  %v3504_v19 = vld [vmem:[#allocation7 + $0x20] sm:$0xf] }
  0x52   :  { %823 = vmatpush.bf16.msrb.mxu2 %v3577_v20  ;;  %v4105_v20 = vld [vmem:[#allocation7 + $0x28] sm:$0xf0] }
  0x53   :  { %v3505_v22 = vor.u32 %v4105_v20, %v3504_v19 }
  0x55   :  { %796 = vmatpush.bf16.msrb.mxu0 %v3557_v25  ;;  %810 = vmatpush.bf16.msrb.mxu1 %v3561_v29  ;;  %v4100_v25 = vld [vmem:[#allocation7 + $0x4] sm:$0xf]  ;;  %v3492_v29 = vld [vmem:[#allocation7 + $0x8] sm:$0xf] }
  0x56   :  { %824 = vmatpush.bf16.msrb.mxu2 %v3565_v30  ;;  %v4102_v30 = vld [vmem:[#allocation7 + $0x10] sm:$0xf0] }
  0x57   :  { %v3493_v32 = vor.u32 %v4102_v30, %v3492_v29 }
  0x59   :  { %797 = vmatpush.bf16.msrb.mxu0 %v3545_v35  ;;  %811 = vmatpush.bf16.msrb.mxu1 %v3549_v39 }
  0xa8   :  { %v191_v40 = vpop.permute.xlu0 %190 }
  0xa9   :  { %vm195_vm2 = vcmp.eq.s32.totalorder %v185_v41, %v191_v40  ;;  %vm196_vm7 = vcmp.eq.s32.totalorder %v186_v42, %v191_v40  ;;  %vm197_vm10 = vcmp.eq.s32.totalorder %v187_v43, %v191_v40  ;;  %vm198_vm12 = vcmp.eq.s32.totalorder %v188_v45, %v191_v40 }
  0xaa   :  { %v3553_v40 = vor.u32 %v4117_v38, %v3552_v37 }
  0xac   :  { %825 = vmatpush.bf16.msrb.mxu2 %v3553_v40 }
  0xb0   :  { %v194_v44 = vpop.permute.xlu0 %193 }
  0xb1   :  { %vm199_vm3 = vcmp.eq.s32.totalorder %v185_v41, %v194_v44  ;;  %vm200_vm4 = vcmp.eq.s32.totalorder %v186_v42, %v194_v44  ;;  %vm201_vm5 = vcmp.eq.s32.totalorder %v187_v43, %v194_v44  ;;  %vm202_vm8 = vcmp.eq.s32.totalorder %v188_v45, %v194_v44  ;;  %v298_v50 = vpop.permute.xlu1 %297  ;;  %v3532_v42 = vld [vmem:[#allocation7 + $0x60] sm:$0xf]  ;;  %v4113_v43 = vld [vmem:[#allocation7 + $0x68] sm:$0xf0]  ;;  %v4112_v44 = vld [vmem:[#allocation7 + $0x64] sm:$0xf] }
  0xb2   :  { %vm3474_vm6 = vmpackc.low %vm199_vm3, %vm195_vm2  ;;  %vm302_vm14 = vcmp.eq.s32.totalorder %v298_v50, 1  ;;  %v567_v41 = vmul.f32 %v4911_v11, %v566_v31  ;;  %v3533_v45 = vor.u32 %v4113_v43, %v3532_v42  ;;  %v3489_v31 = vor.u32 %v4100_v25, %v3486_v28 }
  0xb3   :  { %3475 = vmatmul.msk.bf16.vlgmr.msra.gmra.mxu0 %vm3474_vm6, %v4720_v46  ;;  %vm3476_vm9 = vmpackc.low %vm200_vm4, %vm196_vm7  ;;  %v306_v59 = vsel %vm302_vm14, %v4377_v52, %v4378_v53  ;;  %vm921_vm7 = vcmask 261120  }
  0xb4   :  { %3477 = vmatmul.msk.bf16.vlgmr.msra.gmra.mxu1 %vm3476_vm9, %v4720_v46  ;;  %vm3478_vm11 = vmpackc.low %vm201_vm5, %vm197_vm10  ;;  %798 = vmatpush.bf16.msrb.mxu0 %v3533_v45  ;;  %vm1094_vm9 = vcmask 64512   ;;  %vm1370_vm10 = vcmask 523264  }
  0xb5   :  { %3479 = vmatmul.msk.bf16.vlgmr.msra.gmra.mxu2 %vm3478_vm11, %v4720_v46  ;;  %vm3480_vm13 = vmpackc.low %vm202_vm8, %vm198_vm12  ;;  %vm1194_vm8 = vcmask 1043456   ;;  %vm1373_vm11 = vcmask 785408  }
  0xb6   :  { %3481 = vmatmul.msk.bf16.vlgmr.msra.gmra.mxu3 %vm3480_vm13, %v4720_v46  ;;  %v3534_v46 = vld [vmem:[#allocation7 + $0x6c] sm:$0xf0] }
  0xb9   :  { %v301_v63 = vpop.permute.xlu1 %300 }
  0xba   :  { %vm303_vm15 = vcmp.eq.s32.totalorder %v301_v63, 1  ;;  %v3508_v63 = vld [vmem:[#allocation7 + $0x30] sm:$0xf] }
  0xbb   :  { %v307_v7 = vsel %vm303_vm15, %v4377_v52, %v4378_v53  ;;  %v3520_v52 = vld [vmem:[#allocation7 + $0x48] sm:$0xf]  ;;  %v4110_v53 = vld [vmem:[#allocation7 + $0x50] sm:$0xf0] }
 0x130   :  { %v509_v48 = vpop.f32.mrf.mxu0 }
 0x131   :  { %v510_v49 = vadd.f32 %v509_v48, %v287_v47  ;;  %v523_v51 = vpop.f32.mrf.mxu1  ;;  %v4114_v48 = vld [vmem:[#allocation7 + $0x70] sm:$0xf0] }
 0x133   :  { %v524_v54 = vadd.f32 %v523_v51, %v510_v49  ;;  %v3537_v49 = vor.u32 %v4112_v44, %v3534_v46  ;;  %v568_v51 = vadd.f32 %v4911_v11, %v567_v41 }
 0x135   :  { %812 = vmatpush.bf16.msrb.mxu1 %v3537_v49 }
 0x138   :  { %v537_v55 = vpop.f32.mrf.mxu2  ;;  %v511_v56 = vpop.f32.mrf.mxu0 }
 0x139   :  { %v538_v57 = vadd.f32 %v537_v55, %v524_v54  ;;  %v551_v58 = vpop.f32.mrf.mxu3  ;;  %v512_v61 = vadd.f32 %v511_v56, %v287_v47  ;;  %v525_v0 = vpop.f32.mrf.mxu1  ;;  %v3540_v47 = vld [vmem:[#allocation7 + $0x68] sm:$0xf]  ;;  %v4109_v54 = vld [vmem:[#allocation7 + $0x4c] sm:$0xf]  ;;  %v3521_v55 = vor.u32 %v4110_v53, %v3520_v52  ;;  %v3522_v56 = vld [vmem:[#allocation7 + $0x54] sm:$0xf0] }
 0x13a   :  { %v3541_v50 = vor.u32 %v4114_v48, %v3540_v47 }
 0x13b   :  { %v552_v60 = vadd.f32 %v551_v58, %v538_v57  ;;  %v526_v1 = vadd.f32 %v525_v0, %v512_v61  ;;  %v3528_v57 = vld [vmem:[#allocation7 + $0x50] sm:$0xf]  ;;  %v4111_v58 = vld [vmem:[#allocation7 + $0x58] sm:$0xf0]  ;;  %799 = vmatpush.bf16.msrb.mxu0 %v3521_v55  ;;  %v4918_v61 = vsel %vm569_vm0, %v4911_v11, %v568_v51  ;;  %v3496_v11 = vld [vmem:[#allocation7 + $0x18] sm:$0xf] }
 0x13c   :  { %826 = vmatpush.bf16.msrb.mxu2 %v3541_v50  ;;  %v4107_v0 = vld [vmem:[#allocation7 + $0x38] sm:$0xf0]  ;;  %v3497_v17 = vor.u32 %v4104_v13, %v3496_v11  ;;  %v4379_v55 = vld [vmem:[%s5314_s25] ss:$0 sm:$0xff] }
 0x13d   :  { %v4901_v62 = vadd.f32 %v552_v60, %v306_v59  ;;  %v3525_v59 = vor.u32 %v4109_v54, %v3522_v56  ;;  %v3529_v60 = vor.u32 %v4111_v58, %v3528_v57 }
 0x13f   :  { %560 = vadd.xlane.f32.xlu2 %v4901_v62  ;;  %v573_v2 = vmul.f32 %v4901_v62, %v4901_v62  ;;  %813 = vmatpush.bf16.msrb.mxu1 %v3525_v59 }
 0x140   :  { %v539_v3 = vpop.f32.mrf.mxu2  ;;  %827 = vmatpush.bf16.msrb.mxu2 %v3529_v60 }
 0x141   :  { %v540_v4 = vadd.f32 %v539_v3, %v526_v1  ;;  %575 = vadd.xlane.f32.xlu0 %v573_v2  ;;  %v553_v5 = vpop.f32.mrf.mxu3  ;;  %v4106_v1 = vld [vmem:[#allocation7 + $0x34] sm:$0xf]  ;;  %v3509_v2 = vor.u32 %v4107_v0, %v3508_v63  ;;  %v3510_v3 = vld [vmem:[#allocation7 + $0x3c] sm:$0xf0] }
 0x142   :  { %v4380_v63 = vld [vmem:[%s5281_s7] ss:$0 sm:$0xff]  ;;  %s4722_s7 = smov 32  }
 0x143   :  { %v554_v6 = vadd.f32 %v553_v5, %v540_v4  ;;  %v3516_v4 = vld [vmem:[#allocation7 + $0x38] sm:$0xf]  ;;  %v4108_v5 = vld [vmem:[#allocation7 + $0x40] sm:$0xf0]  ;;  %800 = vmatpush.bf16.msrb.mxu0 %v3509_v2 }
 0x145   :  { %v4906_v8 = vadd.f32 %v554_v6, %v307_v7  ;;  %v3513_v7 = vor.u32 %v4106_v1, %v3510_v3 }
 0x147   :  { %562 = vadd.xlane.f32.xlu2 %v4906_v8  ;;  %v574_v9 = vmul.f32 %v4906_v8, %v4906_v8  ;;  %814 = vmatpush.bf16.msrb.mxu1 %v3513_v7 }
 0x148   :  { %801 = vmatpush.bf16.msrb.mxu0 %v3497_v17 }
 0x149   :  { %577 = vadd.xlane.f32.xlu1 %v574_v9  ;;  %v3517_v9 = vor.u32 %v4108_v5, %v3516_v4 }
 0x14b   :  { %828 = vmatpush.bf16.msrb.mxu2 %v3517_v9  ;;  %815 = vmatpush.bf16.msrb.mxu1 %v3501_v21 }
 0x14c   :  { %802 = vmatpush.bf16.msrb.mxu0 %v3485_v27 }
 0x14f   :  { %829 = vmatpush.bf16.msrb.mxu2 %v3505_v22  ;;  %816 = vmatpush.bf16.msrb.mxu1 %v3489_v31 }
 0x153   :  { %830 = vmatpush.bf16.msrb.mxu2 %v3493_v32 }
 0x1b2   :  { %v561_v6 = vpop.xlane.xlu2 %560 }
 0x1b3   :  { %v571_v10 = vmul.f32 %v4918_v61, %v561_v6 }
 0x1b4   :  { %v576_v12 = vpop.xlane.xlu0 %575 }
 0x1b5   :  { %v581_v15 = vmul.f32 %v571_v10, %v571_v10  ;;  %v579_v16 = vmul.f32 %v576_v12, %v4918_v61  ;;  %v585_v52 = vsub.f32 %v4901_v62, %v571_v10 }
 0x1b7   :  { %v583_v26 = vsub.f32 %v579_v16, %v581_v15 }
 0x1b9   :  { %v587_v33 = vadd.f32 1e-12, %v583_v26 }
 0x1ba   :  { %v563_v34 = vpop.xlane.xlu2 %562 }
 0x1bb   :  { %4396 = vrsqrt.f32 %v587_v33  ;;  %v572_v35 = vmul.f32 %v4918_v61, %v563_v34  ;;  %vm595_vm2 = vweird.f32 %v587_v33 }
 0x1bc   :  { %v578_v36 = vpop.xlane.xlu1 %577 }
 0x1bd   :  { %v582_v37 = vmul.f32 %v572_v35, %v572_v35  ;;  %v580_v38 = vmul.f32 %v578_v36, %v4918_v61  ;;  %v586_v57 = vsub.f32 %v4906_v8, %v572_v35  ;;  %v659_v8 = vld [vmem:[%s5283_s9] sm:$0x7] }
 0x1be   :  { %v662_v3 = vperm.slane %v659_v8, 1  ;;  %v661_v9 = vperm.slane %v659_v8, 0  ;;  %v663_v19 = vperm.slane %v659_v8, 2  ;;  %v621_v8 = vld [vmem:[%s5315_s30] sm:$0x3] }
 0x1bf   :  { %v584_v39 = vsub.f32 %v580_v38, %v582_v37 }
 0x1c1   :  { %v4397_v40 = vpop.eup %4396  ;;  %v588_v41 = vadd.f32 1e-12, %v584_v39 }
 0x1c2   :  { %v590_v42 = vmul.f32 %v4397_v40, %v587_v33  ;;  %vm596_vm1 = vweird.f32 %v4397_v40 }
 0x1c3   :  { %4398 = vrsqrt.f32 %v588_v41  ;;  %vm597_vm3 = vmor %vm595_vm2, %vm596_vm1  ;;  %vm605_vm5 = vweird.f32 %v588_v41 }
 0x1c4   :  { %v591_v43 = vmul.f32 %v4397_v40, %v590_v42 }
 0x1c6   :  { %v592_v44 = vmul.f32 0.5, %v591_v43 }
 0x1c8   :  { %v593_v45 = vsub.f32 1.5, %v592_v44 }
 0x1c9   :  { %v4399_v46 = vpop.eup %4398 }
 0x1ca   :  { %v594_v47 = vmul.f32 %v4397_v40, %v593_v45  ;;  %v600_v48 = vmul.f32 %v4399_v46, %v588_v41  ;;  %vm606_vm4 = vweird.f32 %v4399_v46 }
 0x1cb   :  { %vm607_vm6 = vmor %vm605_vm5, %vm606_vm4 }
 0x1cc   :  { %v601_v49 = vmul.f32 %v4399_v46, %v600_v48  ;;  %v598_v50 = vsel %vm597_vm3, %v4397_v40, %v594_v47 }
 0x1cd   :  { %v609_v54 = vmul.f32 %v598_v50, %v585_v52 }
 0x1ce   :  { %v602_v51 = vmul.f32 0.5, %v601_v49 }
 0x1cf   :  { %v614_v60 = vmul.f32 %v4379_v55, %v609_v54 }
 0x1d0   :  { %v603_v53 = vsub.f32 1.5, %v602_v51 }
 0x1d1   :  { %v4932_v0 = vadd.f32 %v4380_v63, %v614_v60 }
 0x1d2   :  { %v604_v56 = vmul.f32 %v4399_v46, %v603_v53 }
 0x1d4   :  { %v608_v58 = vsel %vm607_vm6, %v4399_v46, %v604_v56 }
 0x1d5   :  { %v610_v59 = vmul.f32 %v608_v58, %v586_v57 }
 0x1d7   :  { %v615_v62 = vmul.f32 %v4379_v55, %v610_v59 }
 0x1d9   :  { %v4934_v1 = vadd.f32 %v4380_v63, %v615_v62 }
 0x1db   :  { %v626_v2 = vpack.c.bf16 %v4934_v1, %v4932_v0 }
 0x1dd   :  { %803 = vmatmul.bf16.vlgmr.msrb.gmra.mxu0 %v626_v2  ;;  %817 = vmatmul.bf16.vlgmr.msrb.gmra.mxu1 %v626_v2 }
 0x1de   :  { %831 = vmatmul.bf16.vlgmr.msrb.gmra.mxu2 %v626_v2 }
 0x25a   :  { %v804_v4 = vpop.f32.mrf.mxu0  ;;  %v818_v5 = vpop.f32.mrf.mxu1 }
 0x25b   :  { %v819_v6 = vadd.f32 %v818_v5, %v662_v3  ;;  %v805_v11 = vadd.f32 %v804_v4, %v661_v9  ;;  %v622_v5 = vsub.f32 1.0, %v621_v8 }
 0x25d   :  { %v885_v7 = vpack.c.bf16 %v819_v6, %v819_v6  ;;  %v857_v20 = vpack.c.bf16 %v805_v11, %v805_v11 }
 0x25f   :  { %v926_v10 = vsel %vm921_vm7, %v885_v7, 0 }
 0x260   :  { %935 = vmatpush.bf16.xpose.msrb.mxu3 %v926_v10 }
 0x261   :  { %v832_v12 = vpop.f32.mrf.mxu2 }
 0x262   :  { %v806_v13 = vpop.f32.mrf.mxu0  ;;  %v820_v14 = vpop.f32.mrf.mxu1  ;;  %v833_v24 = vadd.f32 %v832_v12, %v663_v19 }
 0x263   :  { %v807_v15 = vadd.f32 %v806_v13, %v661_v9  ;;  %v821_v16 = vadd.f32 %v820_v14, %v662_v3  ;;  %v623_v9 = vmul.f32 -1e+09, %v622_v5 }
 0x264   :  { %v913_v38 = vpack.c.bf16 %v833_v24, %v833_v24 }
 0x265   :  { %v4277_v17 = vpack.i.bf16 %v821_v16, %v819_v6  ;;  %v4282_v18 = vpack.i.bf16 %v807_v15, %v805_v11  ;;  %v886_v21 = vpack.c.bf16 %v821_v16, %v821_v16  ;;  %v858_v27 = vpack.c.bf16 %v807_v15, %v807_v15 }
 0x266   :  { %v1196_v44 = vsel %vm1194_vm8, %v913_v38, 0  ;;  %v4970_v10 = vperm.slane %v623_v9, 0  ;;  %v625_v16 = vrot.slane %v623_v9, 1 }
 0x267   :  { %4278 = vrot.lane.b32.xlu0 %v4277_v17, %s4722_s7  ;;  %4258 = vrot.lane.b32.xlu2 %v4277_v17, %s4723_s1  ;;  %v945_v22 = vsel %vm921_vm7, %v886_v21, 0 }
 0x268   :  { %4283 = vrot.lane.b32.xlu1 %v4282_v18, %s4722_s7  ;;  %3578 = vmatmul.msk.bf16.vlgmr.msrb.gmra.mxu3 %vm921_vm7, %v857_v20 }
 0x269   :  { %v834_v23 = vpop.f32.mrf.mxu2  ;;  %954 = vmatpush.bf16.xpose.msra.mxu3 %v945_v22 }
 0x26a   :  { %v835_v25 = vadd.f32 %v834_v23, %v663_v19 }
 0x26c   :  { %v4947_v26 = vpack.i.bf16 %v835_v25, %v833_v24  ;;  %v914_v39 = vpack.c.bf16 %v835_v25, %v835_v25 }
 0x26e   :  { %v1215_v45 = vsel %vm1194_vm8, %v914_v39, 0 }
 0x26f   :  { %4263 = vrot.lane.b32.xlu2 %v4277_v17, %s4710_s28  ;;  %v4974_v17 = vperm.slane %v625_v16, 0 }
 0x277   :  { %4268 = vrot.lane.b32.xlu2 %v4282_v18, %s4723_s1 }
 0x278   :  { %3579 = vmatmul.msk.bf16.vlgmr.msra.gmra.mxu3 %vm921_vm7, %v858_v27 }
 0x27f   :  { %4273 = vrot.lane.b32.xlu2 %v4282_v18, %s4710_s28 }
 0x2c1   :  { %v4259_v28 = vpop.permute.xlu2 %4258 }
 0x2c2   :  { %v4261_v29 = vunpack.i.h.bf16 %v4259_v28  ;;  %v4260_v30 = vunpack.i.l.bf16 %v4259_v28 }
 0x2c4   :  { %v888_v31 = vpack.c.bf16 %v4261_v29, %v4261_v29  ;;  %v887_v32 = vpack.c.bf16 %v4260_v30, %v4260_v30 }
 0x2c6   :  { %v964_v33 = vsel %vm921_vm7, %v887_v32, 0  ;;  %v983_v34 = vsel %vm921_vm7, %v888_v31, 0 }
 0x2c7   :  { %973 = vmatpush.bf16.xpose.msra.mxu0 %v964_v33  ;;  %992 = vmatpush.bf16.xpose.msra.mxu1 %v983_v34 }
 0x2c9   :  { %v4264_v35 = vpop.permute.xlu2 %4263 }
 0x2ca   :  { %v4266_v36 = vunpack.i.h.bf16 %v4264_v35  ;;  %v4265_v37 = vunpack.i.l.bf16 %v4264_v35 }
 0x2cc   :  { %v890_v40 = vpack.c.bf16 %v4266_v36, %v4266_v36  ;;  %v889_v41 = vpack.c.bf16 %v4265_v37, %v4265_v37 }
 0x2ce   :  { %v1002_v42 = vsel %vm921_vm7, %v889_v41, 0  ;;  %v1021_v43 = vsel %vm921_vm7, %v890_v40, 0 }
 0x2cf   :  { %1011 = vmatpush.bf16.xpose.msra.mxu2 %v1002_v42  ;;  %1030 = vmatpush.bf16.xpose.msrb.mxu3 %v1021_v43 }
 0x2d1   :  { %v4269_v46 = vpop.permute.xlu2 %4268 }
 0x2d2   :  { %v4271_v47 = vunpack.i.h.bf16 %v4269_v46  ;;  %v4270_v48 = vunpack.i.l.bf16 %v4269_v46 }
 0x2d4   :  { %v860_v49 = vpack.c.bf16 %v4271_v47, %v4271_v47  ;;  %v859_v50 = vpack.c.bf16 %v4270_v48, %v4270_v48 }
 0x2d6   :  { %3580 = vmatmul.msk.bf16.vlgmr.msra.gmra.mxu0 %vm921_vm7, %v859_v50  ;;  %3581 = vmatmul.msk.bf16.vlgmr.msra.gmra.mxu1 %vm921_vm7, %v860_v49 }
 0x2d7   :  { %1205 = vmatpush.bf16.msrb.mxu2 %v1196_v44  ;;  %1224 = vmatpush.bf16.msra.mxu3 %v1215_v45 }
 0x2d9   :  { %v4279_v51 = vpop.permute.xlu0 %4278  ;;  %v4274_v52 = vpop.permute.xlu2 %4273 }
 0x2da   :  { %v4281_v53 = vunpack.i.h.bf16 %v4279_v51  ;;  %v4280_v54 = vunpack.i.l.bf16 %v4279_v51  ;;  %v4276_v55 = vunpack.i.h.bf16 %v4274_v52  ;;  %v4275_v56 = vunpack.i.l.bf16 %v4274_v52  ;;  %v4284_v63 = vpop.permute.xlu1 %4283 }
 0x2db   :  { %v4286_v3 = vunpack.i.h.bf16 %v4284_v63  ;;  %v4285_v4 = vunpack.i.l.bf16 %v4284_v63 }
 0x2dc   :  { %v892_v57 = vpack.c.bf16 %v4281_v53, %v4281_v53  ;;  %v891_v58 = vpack.c.bf16 %v4280_v54, %v4280_v54  ;;  %v862_v59 = vpack.c.bf16 %v4276_v55, %v4276_v55  ;;  %v861_v60 = vpack.c.bf16 %v4275_v56, %v4275_v56 }
 0x2dd   :  { %v864_v6 = vpack.c.bf16 %v4286_v3, %v4286_v3  ;;  %v863_v7 = vpack.c.bf16 %v4285_v4, %v4285_v4 }
 0x2de   :  { %3582 = vmatmul.msk.bf16.vlgmr.msra.gmra.mxu2 %vm921_vm7, %v861_v60  ;;  %3583 = vmatmul.msk.bf16.vlgmr.msrb.gmra.mxu3 %vm921_vm7, %v862_v59  ;;  %v1040_v62 = vsel %vm921_vm7, %v891_v58, 0  ;;  %v1059_v2 = vsel %vm921_vm7, %v892_v57, 0 }
 0x2df   :  { %1049 = vmatpush.bf16.xpose.msrb.mxu0 %v1040_v62  ;;  %1068 = vmatpush.bf16.xpose.msrb.mxu1 %v1059_v2 }
 0x2e6   :  { %3584 = vmatmul.msk.bf16.vlgmr.msrb.gmra.mxu0 %vm921_vm7, %v863_v7  ;;  %3585 = vmatmul.msk.bf16.vlgmr.msrb.gmra.mxu1 %vm921_vm7, %v864_v6 }
 0x2eb   :  { %v937_v12 = vpop.f32.mrf.mxu3 }
 0x2ec   :  { %v1074_v11 = vmul.f32 0.17677669, %v937_v12 }
 0x2ee   :  { %v1086_v13 = vadd.f32 %v4970_v10, %v1074_v11 }
 0x2f0   :  { %v1095_v14 = vsel %vm1094_vm9, %v1086_v13, -inf }
 0x2f1   :  { %1096 = vmax.xlane.f32.xlu2 %v1095_v14 }
 0x2f3   :  { %v939_v15 = vpop.f32.mrf.mxu3 }
 0x2fb   :  { %v956_v18 = vpop.f32.mrf.mxu3 }
 0x2fc   :  { %v1075_v19 = vmul.f32 0.17677669, %v956_v18 }
 0x2fe   :  { %v1087_v20 = vadd.f32 %v4974_v17, %v1075_v19 }
 0x300   :  { %v1098_v21 = vsel %vm1094_vm9, %v1087_v20, -inf }
 0x301   :  { %1099 = vmax.xlane.f32.xlu0 %v1098_v21 }
 0x303   :  { %v958_v22 = vpop.f32.mrf.mxu3 }
 0x353   :  { %v975_v23 = vpop.f32.mrf.mxu0  ;;  %v994_v24 = vpop.f32.mrf.mxu1 }
 0x354   :  { %v1076_v25 = vmul.f32 0.17677669, %v975_v23  ;;  %v1077_v42 = vmul.f32 0.17677669, %v994_v24 }
 0x356   :  { %v1088_v27 = vadd.f32 %v4970_v10, %v1076_v25  ;;  %v1089_v50 = vadd.f32 %v4974_v17, %v1077_v42 }
 0x358   :  { %v1101_v28 = vsel %vm1094_vm9, %v1088_v27, -inf  ;;  %v1104_v54 = vsel %vm1094_vm9, %v1089_v50, -inf }
 0x359   :  { %1102 = vmax.xlane.f32.xlu1 %v1101_v28 }
 0x35b   :  { %v977_v29 = vpop.f32.mrf.mxu0  ;;  %v996_v30 = vpop.f32.mrf.mxu1 }
 0x361   :  { %v1013_v31 = vpop.f32.mrf.mxu2  ;;  %v1032_v32 = vpop.f32.mrf.mxu3 }
 0x362   :  { %v1078_v33 = vmul.f32 0.17677669, %v1013_v31  ;;  %v1079_v34 = vmul.f32 0.17677669, %v1032_v32 }
 0x363   :  { %v1051_v35 = vpop.f32.mrf.mxu0  ;;  %v1070_v36 = vpop.f32.mrf.mxu1 }
 0x364   :  { %v1081_v37 = vmul.f32 0.17677669, %v1070_v36  ;;  %v1097_v38 = vpop.xlane.xlu2 %1096  ;;  %v1090_v39 = vadd.f32 %v4970_v10, %v1078_v33  ;;  %v1091_v40 = vadd.f32 %v4974_v17, %v1079_v34  ;;  %v1080_v53 = vmul.f32 0.17677669, %v1051_v35 }
 0x365   :  { %v1119_v41 = vsub.f32 %v1086_v13, %v1097_v38 }
 0x366   :  { %v1107_v43 = vsel %vm1094_vm9, %v1090_v39, -inf  ;;  %v1110_v44 = vsel %vm1094_vm9, %v1091_v40, -inf  ;;  %v4985_v45 = vadd.f32 %v4974_v17, %v1081_v37  ;;  %v1092_v57 = vadd.f32 %v4970_v10, %v1080_v53 }
 0x367   :  { %v1127_v46 = vmul.f32 1.442695, %v1119_v41  ;;  %1108 = vmax.xlane.f32.xlu2 %v1107_v43  ;;  %1111 = vmax.xlane.f32.xlu0 %v1110_v44 }
 0x368   :  { %v1116_v47 = vsel %vm1094_vm9, %v4985_v45, -inf  ;;  %v1113_v58 = vsel %vm1094_vm9, %v1092_v57, -inf }
 0x369   :  { %4400 = vpow2.f32 %v1127_v46  ;;  %v1015_v48 = vpop.f32.mrf.mxu2  ;;  %1117 = vmax.xlane.f32.xlu1 %v1116_v47  ;;  %v1034_v49 = vpop.f32.mrf.mxu3 }
 0x36b   :  { %v1053_v51 = vpop.f32.mrf.mxu0  ;;  %v1072_v52 = vpop.f32.mrf.mxu1 }
 0x36f   :  { %v4401_v55 = vpop.eup %4400  ;;  %1105 = vmax.xlane.f32.xlu2 %v1104_v54 }
 0x370   :  { %v1143_v56 = vsel %vm1094_vm9, %v4401_v55, 0.0 }
 0x371   :  { %1144 = vadd.xlane.f32.xlu0 %v1143_v56 }
 0x374   :  { %v1100_v59 = vpop.xlane.xlu0 %1099 }
 0x375   :  { %v1120_v60 = vsub.f32 %v1087_v20, %v1100_v59 }
 0x377   :  { %1114 = vmax.xlane.f32.xlu2 %v1113_v58  ;;  %v1129_v63 = vmul.f32 1.442695, %v1120_v60 }
 0x379   :  { %4402 = vpow2.f32 %v1129_v63 }
 0x37f   :  { %v4996_v62 = vpop.eup %4402 }
 0x380   :  { %v1146_v2 = vsel %vm1094_vm9, %v4996_v62, 0.0 }
 0x38f   :  { %4288 = vrot.lane.b32.xlu2 %v4947_v26, %s4723_s1 }
 0x3b8   :  { %1147 = vadd.xlane.f32.xlu2 %v1146_v2 }
 0x3cc   :  { %v1103_v8 = vpop.xlane.xlu1 %1102 }
 0x3cd   :  { %v1121_v3 = vsub.f32 %v1088_v27, %v1103_v8 }
 0x3cf   :  { %v1131_v4 = vmul.f32 1.442695, %v1121_v3 }
 0x3d0   :  { %4298 = vrot.lane.b32.xlu2 %v4947_v26, %s4722_s7 }
 0x3d1   :  { %4404 = vpow2.f32 %v1131_v4 }
 0x3d7   :  { %v5002_v5 = vpop.eup %4404 }
 0x3d8   :  { %v1149_v6 = vsel %vm1094_vm9, %v5002_v5, 0.0 }
 0x3d9   :  { %1150 = vadd.xlane.f32.xlu1 %v1149_v6 }
 0x3da   :  { %v1109_v7 = vpop.xlane.xlu2 %1108  ;;  %v1112_v9 = vpop.xlane.xlu0 %1111 }
 0x3db   :  { %v1123_v12 = vsub.f32 %v1090_v39, %v1109_v7  ;;  %v1124_v18 = vsub.f32 %v1091_v40, %v1112_v9 }
 0x3dc   :  { %v1118_v31 = vpop.xlane.xlu1 %1117 }
 0x3dd   :  { %v1135_v11 = vmul.f32 1.442695, %v1123_v12  ;;  %v1137_v21 = vmul.f32 1.442695, %v1124_v18  ;;  %v1126_v36 = vsub.f32 %v4985_v45, %v1118_v31 }
 0x3df   :  { %4406 = vpow2.f32 %v1135_v11  ;;  %v1141_v42 = vmul.f32 1.442695, %v1126_v36 }
 0x3e2   :  { %v1106_v13 = vpop.xlane.xlu2 %1105 }
 0x3e3   :  { %v1122_v14 = vsub.f32 %v1089_v50, %v1106_v13 }
 0x3e4   :  { %v1145_v15 = vpop.xlane.xlu0 %1144 }
 0x3e5   :  { %v5006_v16 = vpop.eup %4406  ;;  %v1133_v19 = vmul.f32 1.442695, %v1122_v14  ;;  %4408 = vrcp.f32 %v1145_v15 }
 0x3e6   :  { %v1155_v20 = vsel %vm1094_vm9, %v5006_v16, 0.0 }
 0x3e7   :  { %4410 = vpow2.f32 %v1133_v19  ;;  %1156 = vadd.xlane.f32.xlu1 %v1155_v20 }
 0x3e8   :  { %4412 = vpow2.f32 %v1137_v21 }
 0x3ea   :  { %v1115_v22 = vpop.xlane.xlu2 %1114 }
 0x3eb   :  { %v4409_v23 = vpop.eup %4408  ;;  %v1125_v27 = vsub.f32 %v1092_v57, %v1115_v22 }
 0x3ec   :  { %v1175_v24 = vmul.f32 %v4409_v23, %v4401_v55 }
 0x3ed   :  { %v4411_v25 = vpop.eup %4410  ;;  %v1139_v30 = vmul.f32 1.442695, %v1125_v27 }
 0x3ee   :  { %v1183_v28 = vpack.c.bf16 %v1175_v24, %v1175_v24  ;;  %v1152_v29 = vsel %vm1094_vm9, %v4411_v25, 0.0  ;;  %v4413_v33 = vpop.eup %4412 }
 0x3ef   :  { %1153 = vadd.xlane.f32.xlu0 %v1152_v29  ;;  %4414 = vpow2.f32 %v1139_v30  ;;  %v1158_v39 = vsel %vm1094_vm9, %v4413_v33, 0.0 }
 0x3f0   :  { %3586 = vmatmul.msk.bf16.vlgmr.msrb.gmra.mxu2 %vm1094_vm9, %v1183_v28  ;;  %4416 = vpow2.f32 %v1141_v42 }
 0x3f2   :  { %v4289_v32 = vpop.permute.xlu2 %4288 }
 0x3f3   :  { %v4291_v34 = vunpack.i.h.bf16 %v4289_v32  ;;  %v4290_v35 = vunpack.i.l.bf16 %v4289_v32 }
 0x3f5   :  { %v916_v37 = vpack.c.bf16 %v4291_v34, %v4291_v34  ;;  %v915_v38 = vpack.c.bf16 %v4290_v35, %v4290_v35  ;;  %v4415_v43 = vpop.eup %4414 }
 0x3f6   :  { %v1161_v44 = vsel %vm1094_vm9, %v4415_v43, 0.0  ;;  %v4417_v45 = vpop.eup %4416 }
 0x3f7   :  { %1159 = vadd.xlane.f32.xlu0 %v1158_v39  ;;  %v1234_v40 = vsel %vm1194_vm8, %v915_v38, 0  ;;  %v1253_v41 = vsel %vm1194_vm8, %v916_v37, 0  ;;  %v1164_v46 = vsel %vm1094_vm9, %v4417_v45, 0.0 }
 0x3f8   :  { %1243 = vmatpush.bf16.msra.mxu0 %v1234_v40  ;;  %1262 = vmatpush.bf16.msra.mxu1 %v1253_v41 }
 0x3ff   :  { %1162 = vadd.xlane.f32.xlu0 %v1161_v44 }
 0x400   :  { %4293 = vrot.lane.b32.xlu1 %v4947_v26, %s4710_s28 }
 0x407   :  { %1165 = vadd.xlane.f32.xlu0 %v1164_v46 }
 0x42b   :  { %v1148_v47 = vpop.xlane.xlu2 %1147 }
 0x42c   :  { %4418 = vrcp.f32 %v1148_v47 }
 0x432   :  { %v4419_v48 = vpop.eup %4418 }
 0x433   :  { %v1176_v49 = vmul.f32 %v4419_v48, %v4996_v62  ;;  %v4299_v50 = vpop.permute.xlu2 %4298 }
 0x434   :  { %v4301_v51 = vunpack.i.h.bf16 %v4299_v50  ;;  %v4300_v52 = vunpack.i.l.bf16 %v4299_v50  ;;  %v4130_v50 = vld [vmem:[#allocation8 + $0x30] sm:$0xff] }
 0x435   :  { %v1184_v53 = vpack.c.bf16 %v1176_v49, %v1176_v49  ;;  %v4131_v49 = vld [vmem:[#allocation8 + $0x38] sm:$0xff] }
 0x436   :  { %v920_v54 = vpack.c.bf16 %v4301_v51, %v4301_v51  ;;  %v919_v55 = vpack.c.bf16 %v4300_v52, %v4300_v52  ;;  %v4129_v51 = vld [vmem:[#allocation8 + $0x28] sm:$0xff]  ;;  %v4128_v52 = vld [vmem:[#allocation8 + $0x20] sm:$0xff] }
 0x437   :  { %3587 = vmatmul.msk.bf16.vlgmr.msra.gmra.mxu3 %vm1094_vm9, %v1184_v53  ;;  %v4127_v53 = vld [vmem:[#allocation8 + $0x18] sm:$0xff] }
 0x438   :  { %v1310_v56 = vsel %vm1194_vm8, %v919_v55, 0  ;;  %v1329_v26 = vsel %vm1194_vm8, %v920_v54, 0  ;;  %v4126_v54 = vld [vmem:[#allocation8 + $0x10] sm:$0xff]  ;;  %v4125_v55 = vld [vmem:[#allocation8 + $0x8] sm:$0xff] }
 0x439   :  { %1319 = vmatpush.bf16.msrb.mxu0 %v1310_v56  ;;  %1338 = vmatpush.bf16.msrb.mxu1 %v1329_v26  ;;  %v4124_v56 = vld [vmem:[#allocation8] sm:$0xff] }
 0x44c   :  { %v1151_v57 = vpop.xlane.xlu1 %1150 }
 0x44d   :  { %4420 = vrcp.f32 %v1151_v57 }
 0x453   :  { %v4421_v58 = vpop.eup %4420 }
 0x454   :  { %v1177_v59 = vmul.f32 %v4421_v58, %v5002_v5 }
 0x456   :  { %v1185_v60 = vpack.c.bf16 %v1177_v59, %v1177_v59 }
 0x458   :  { %3588 = vmatmul.msk.bf16.vlgmr.msra.gmra.mxu0 %vm1094_vm9, %v1185_v60 }
 0x45a   :  { %v1157_v62 = vpop.xlane.xlu1 %1156 }
 0x462   :  { %v1154_v63 = vpop.xlane.xlu0 %1153 }
 0x463   :  { %4422 = vrcp.f32 %v1154_v63 }
 0x464   :  { %4424 = vrcp.f32 %v1157_v62 }
 0x469   :  { %v4423_v2 = vpop.eup %4422 }
 0x46a   :  { %v1178_v8 = vmul.f32 %v4423_v2, %v4411_v25  ;;  %v1160_v3 = vpop.xlane.xlu0 %1159  ;;  %v4425_v6 = vpop.eup %4424 }
 0x46b   :  { %4426 = vrcp.f32 %v1160_v3  ;;  %v1179_v14 = vmul.f32 %v4425_v6, %v5006_v16 }
 0x46c   :  { %v1186_v4 = vpack.c.bf16 %v1178_v8, %v1178_v8 }
 0x46d   :  { %v1187_v23 = vpack.c.bf16 %v1179_v14, %v1179_v14 }
 0x46e   :  { %3589 = vmatmul.msk.bf16.vlgmr.msra.gmra.mxu1 %vm1094_vm9, %v1186_v4 }
 0x471   :  { %v4427_v7 = vpop.eup %4426 }
 0x472   :  { %v4294_v9 = vpop.permute.xlu1 %4293  ;;  %v1163_v12 = vpop.xlane.xlu0 %1162  ;;  %v1180_v15 = vmul.f32 %v4427_v7, %v4413_v33 }
 0x473   :  { %v4296_v11 = vunpack.i.h.bf16 %v4294_v9  ;;  %v4295_v5 = vunpack.i.l.bf16 %v4294_v9  ;;  %v5027_v13 = vpop.f32.mrf.mxu2  ;;  %4428 = vrcp.f32 %v1163_v12 }
 0x474   :  { %v1188_v24 = vpack.c.bf16 %v1180_v15, %v1180_v15 }
 0x475   :  { %v918_v18 = vpack.c.bf16 %v4296_v11, %v4296_v11  ;;  %v917_v19 = vpack.c.bf16 %v4295_v5, %v4295_v5  ;;  %v4381_v5 = vld [vmem:[%s5285_s11] ss:$0 sm:$0xff] }
 0x477   :  { %v1272_v20 = vsel %vm1194_vm8, %v917_v19, 0  ;;  %v1291_v21 = vsel %vm1194_vm8, %v918_v18, 0 }
 0x478   :  { %1281 = vmatpush.bf16.msra.mxu2 %v1272_v20  ;;  %1300 = vmatpush.bf16.msrb.mxu3 %v1291_v21 }
 0x479   :  { %v4429_v22 = vpop.eup %4428 }
 0x47a   :  { %v1181_v25 = vmul.f32 %v4429_v22, %v4415_v43  ;;  %v1166_v27 = vpop.xlane.xlu0 %1165 }
 0x47b   :  { %v1209_v28 = vpop.f32.mrf.mxu2  ;;  %4430 = vrcp.f32 %v1166_v27  ;;  %3590 = vmatmul.msk.bf16.vlgmr.msra.gmra.mxu2 %vm1094_vm9, %v1187_v23  ;;  %3591 = vmatmul.msk.bf16.vlgmr.msrb.gmra.mxu3 %vm1094_vm9, %v1188_v24  ;;  %v3684_v23 = vld [vmem:[#allocation10 + $0x70] sm:$0xf]  ;;  %v4146_v24 = vld [vmem:[#allocation10 + $0x74] sm:$0xf]  ;;  %v3686_v27 = vld [vmem:[#allocation10 + $0x78] sm:$0xf0] }
 0x47c   :  { %v1189_v16 = vpack.c.bf16 %v1181_v25, %v1181_v25  ;;  %1445 = vmatpush.bf16.msrb.mxu2 %v4131_v49  ;;  %v3689_v28 = vor.u32 %v4146_v24, %v3686_v27  ;;  %v3654_v49 = vld [vmem:[#allocation10 + $0x38] sm:$0xf0] }
 0x47e   :  { %3592 = vmatmul.msk.bf16.vlgmr.msrb.gmra.mxu0 %vm1094_vm9, %v1189_v16  ;;  %v3676_v16 = vld [vmem:[#allocation10 + $0x60] sm:$0xf] }
 0x47f   :  { %1634 = vmatpush.bf16.msra.mxu0 %v3689_v28 }
 0x480   :  { %1446 = vmatpush.bf16.msrb.mxu2 %v4130_v50 }
 0x481   :  { %v4431_v29 = vpop.eup %4430 }
 0x482   :  { %v1182_v30 = vmul.f32 %v4431_v29, %v4417_v45  ;;  %v4145_v29 = vld [vmem:[#allocation10 + $0x64] sm:$0xf0] }
 0x484   :  { %v1190_v31 = vpack.c.bf16 %v1182_v30, %v1182_v30  ;;  %1447 = vmatpush.bf16.msrb.mxu2 %v4129_v51  ;;  %v4144_v30 = vld [vmem:[#allocation10 + $0x64] sm:$0xf]  ;;  %v3644_v51 = vld [vmem:[#allocation10 + $0x20] sm:$0xf] }
 0x486   :  { %3593 = vmatmul.msk.bf16.vlgmr.msrb.gmra.mxu1 %vm1094_vm9, %v1190_v31  ;;  %v3677_v31 = vor.u32 %v4145_v29, %v3676_v16 }
 0x488   :  { %1448 = vmatpush.bf16.msrb.mxu2 %v4128_v52  ;;  %v4137_v52 = vld [vmem:[#allocation10 + $0x24] sm:$0xf0] }
 0x48c   :  { %1449 = vmatpush.bf16.msrb.mxu2 %v4127_v53  ;;  %v4136_v53 = vld [vmem:[#allocation10 + $0x24] sm:$0xf] }
 0x490   :  { %1450 = vmatpush.bf16.msrb.mxu2 %v4126_v54 }
 0x494   :  { %1451 = vmatpush.bf16.msrb.mxu2 %v4125_v55  ;;  %v3645_v55 = vor.u32 %v4137_v52, %v3644_v51  ;;  %v4154_v51 = vld [vmem:[#allocation11 + $0x30] sm:$0xff]  ;;  %v4160_v52 = vld [vmem:[#allocation11 + $0x60] sm:$0xff] }
 0x498   :  { %1452 = vmatpush.bf16.msrb.mxu2 %v4124_v56  ;;  %v3646_v56 = vld [vmem:[#allocation10 + $0x28] sm:$0xf0] }
 0x4ba   :  { %v1226_v32 = vpop.f32.mrf.mxu3 }
 0x4c2   :  { %v1228_v33 = vpop.f32.mrf.mxu3 }
 0x4c3   :  { %v3668_v33 = vld [vmem:[#allocation10 + $0x50] sm:$0xf] }
 0x4d5   :  { %v1245_v34 = vpop.f32.mrf.mxu0 }
 0x4dd   :  { %v1247_v35 = vpop.f32.mrf.mxu0 }
 0x4de   :  { %v4142_v35 = vld [vmem:[#allocation10 + $0x54] sm:$0xf] }
 0x4eb   :  { %v1264_v36 = vpop.f32.mrf.mxu1 }
 0x4ec   :  { %v4302_v37 = vpack.i.bf16 %v1264_v36, %v1245_v34  ;;  %v4143_v34 = vld [vmem:[#allocation10 + $0x54] sm:$0xf0] }
 0x4ed   :  { %v3669_v36 = vor.u32 %v4143_v34, %v3668_v33 }
 0x4ee   :  { %4303 = vrot.lane.b32.xlu0 %v4302_v37, %s4722_s7  ;;  %v3670_v37 = vld [vmem:[#allocation10 + $0x58] sm:$0xf0] }
 0x4f3   :  { %v1266_v38 = vpop.f32.mrf.mxu1 }
 0x4f4   :  { %v3673_v38 = vor.u32 %v4142_v35, %v3670_v37 }
 0x4fb   :  { %v1321_v39 = vpop.f32.mrf.mxu0 }
 0x4fe   :  { %v1283_v40 = vpop.f32.mrf.mxu2  ;;  %v1302_v41 = vpop.f32.mrf.mxu3 }
 0x4ff   :  { %v4307_v42 = vpack.i.bf16 %v1302_v41, %v1283_v40  ;;  %v4141_v40 = vld [vmem:[#allocation10 + $0x44] sm:$0xf0]  ;;  %v4140_v41 = vld [vmem:[#allocation10 + $0x44] sm:$0xf] }
 0x501   :  { %4308 = vrot.lane.b32.xlu2 %v4307_v42, %s4710_s28 }
 0x503   :  { %v1323_v43 = vpop.f32.mrf.mxu0  ;;  %v1340_v44 = vpop.f32.mrf.mxu1 }
 0x504   :  { %v4312_v45 = vpack.i.bf16 %v1340_v44, %v1321_v39  ;;  %v3660_v39 = vld [vmem:[#allocation10 + $0x40] sm:$0xf]  ;;  %v3662_v43 = vld [vmem:[#allocation10 + $0x48] sm:$0xf0] }
 0x505   :  { %v3661_v42 = vor.u32 %v4141_v40, %v3660_v39  ;;  %v3665_v44 = vor.u32 %v4140_v41, %v3662_v43 }
 0x506   :  { %v1285_v46 = vpop.f32.mrf.mxu2  ;;  %4313 = vrot.lane.b32.xlu1 %v4312_v45, %s4723_s1  ;;  %v1304_v47 = vpop.f32.mrf.mxu3  ;;  %v3652_v45 = vld [vmem:[#allocation10 + $0x30] sm:$0xf] }
 0x507   :  { %v4139_v46 = vld [vmem:[#allocation10 + $0x34] sm:$0xf0]  ;;  %v4138_v47 = vld [vmem:[#allocation10 + $0x34] sm:$0xf] }
 0x508   :  { %v3657_v50 = vor.u32 %v4138_v47, %v3654_v49  ;;  %v4155_v49 = vld [vmem:[#allocation11 + $0x38] sm:$0xff] }
 0x509   :  { %1818 = vmatpush.bf16.msra.mxu1 %v4155_v49 }
 0x50b   :  { %v1342_v48 = vpop.f32.mrf.mxu1 }
 0x50c   :  { %v3653_v48 = vor.u32 %v4139_v46, %v3652_v45 }
 0x50d   :  { %1819 = vmatpush.bf16.msra.mxu1 %v4154_v51 }
 0x55b   :  { %v4309_v59 = vpop.permute.xlu2 %4308 }
 0x55c   :  { %v4311_v62 = vunpack.i.h.bf16 %v4309_v59  ;;  %v4310_v2 = vunpack.i.l.bf16 %v4309_v59 }
 0x560   :  { %v4304_v26 = vpop.permute.xlu0 %4303 }
 0x561   :  { %v4306_v57 = vunpack.i.h.bf16 %v4304_v26  ;;  %v4305_v58 = vunpack.i.l.bf16 %v4304_v26 }
 0x563   :  { %v1368_v60 = vsel %vm921_vm7, %v5027_v13, %v4305_v58  ;;  %v1369_v63 = vsel %vm921_vm7, %v1226_v32, %v4306_v57  ;;  %v3649_v57 = vor.u32 %v4136_v53, %v3646_v56  ;;  %v4153_v53 = vld [vmem:[#allocation11 + $0x28] sm:$0xff]  ;;  %v4158_v56 = vld [vmem:[#allocation11 + $0x50] sm:$0xff] }
 0x564   :  { %v1371_v6 = vsel %vm1370_vm10, %v1368_v60, %v4310_v2  ;;  %v1372_v7 = vsel %vm1370_vm10, %v1369_v63, %v4311_v62  ;;  %v3636_v63 = vld [vmem:[#allocation10 + $0x10] sm:$0xf]  ;;  %v4135_v62 = vld [vmem:[#allocation10 + $0x14] sm:$0xf0]  ;;  %v4134_v2 = vld [vmem:[#allocation10 + $0x14] sm:$0xf]  ;;  %1820 = vmatpush.bf16.msra.mxu1 %v4153_v53 }
 0x565   :  { %v4384_v53 = vld [vmem:[%s5291_s17] ss:$0 sm:$0xff] }
 0x578   :  { %v4314_v8 = vpop.permute.xlu1 %4313 }
 0x579   :  { %v4316_v3 = vunpack.i.h.bf16 %v4314_v8  ;;  %v4315_v4 = vunpack.i.l.bf16 %v4314_v8  ;;  %v3637_v8 = vor.u32 %v4135_v62, %v3636_v63 }
 0x57b   :  { %v1374_v9 = vsel %vm1373_vm11, %v1371_v6, %v4315_v4  ;;  %v1375_v12 = vsel %vm1373_vm11, %v1372_v7, %v4316_v3  ;;  %v3638_v3 = vld [vmem:[#allocation10 + $0x18] sm:$0xf0]  ;;  %v3628_v4 = vld [vmem:[#allocation10] sm:$0xf]  ;;  %v4133_v6 = vld [vmem:[#allocation10 + $0x4] sm:$0xf0] }
 0x57c   :  { %v1376_v11 = vpack.c.bf16 %v1375_v12, %v1374_v9  ;;  %v3641_v9 = vor.u32 %v4134_v2, %v3638_v3  ;;  %v4132_v12 = vld [vmem:[#allocation10 + $0x4] sm:$0xf] }
 0x57d   :  { %v4156_v2 = vld [vmem:[#allocation11 + $0x40] sm:$0xff] }
 0x57e   :  { %1453 = vmatmul.bf16.vlgmr.msrb.gmra.mxu2 %v1376_v11  ;;  %v3630_v11 = vld [vmem:[#allocation10 + $0x8] sm:$0xf0] }
 0x601   :  { %v1454_v13 = vpop.f32.mrf.mxu2 }
 0x602   :  { %v1455_v14 = vadd.f32 %v4381_v5, %v1454_v13 }
 0x604   :  { %v5050_v15 = vadd.f32 %v1455_v14, %v4932_v0  ;;  %v4147_v0 = vld [vmem:[#allocation10 + $0x74] sm:$0xf0]  ;;  %v3633_v14 = vor.u32 %v4132_v12, %v3630_v11 }
 0x605   :  { %v3685_v25 = vor.u32 %v4147_v0, %v3684_v23 }
 0x606   :  { %1463 = vadd.xlane.f32.xlu2 %v5050_v15  ;;  %v1469_v18 = vmul.f32 %v5050_v15, %v5050_v15 }
 0x607   :  { %1620 = vmatpush.bf16.msra.mxu3 %v3685_v25 }
 0x608   :  { %1471 = vadd.xlane.f32.xlu0 %v1469_v18 }
 0x609   :  { %v1456_v19 = vpop.f32.mrf.mxu2 }
 0x60a   :  { %v1457_v20 = vadd.f32 %v4381_v5, %v1456_v19  ;;  %v3629_v5 = vor.u32 %v4133_v6, %v3628_v4  ;;  %v4149_v4 = vld [vmem:[#allocation11 + $0x8] sm:$0xff] }
 0x60b   :  { %1621 = vmatpush.bf16.msra.mxu3 %v3677_v31 }
 0x60c   :  { %v5056_v21 = vadd.f32 %v1457_v20, %v4934_v1  ;;  %v3678_v1 = vld [vmem:[#allocation10 + $0x68] sm:$0xf0] }
 0x60d   :  { %v3681_v32 = vor.u32 %v4144_v30, %v3678_v1 }
 0x60e   :  { %1465 = vadd.xlane.f32.xlu1 %v5056_v21  ;;  %v1470_v22 = vmul.f32 %v5056_v21, %v5056_v21 }
 0x60f   :  { %1635 = vmatpush.bf16.msra.mxu0 %v3681_v32  ;;  %1622 = vmatpush.bf16.msra.mxu3 %v3669_v36 }
 0x610   :  { %1473 = vadd.xlane.f32.xlu2 %v1470_v22 }
 0x613   :  { %1636 = vmatpush.bf16.msra.mxu0 %v3673_v38  ;;  %1623 = vmatpush.bf16.msra.mxu3 %v3661_v42  ;;  %v4382_v38 = vld [vmem:[%s5286_s12] ss:$0 sm:$0xff] }
 0x617   :  { %1637 = vmatpush.bf16.msra.mxu0 %v3665_v44  ;;  %1624 = vmatpush.bf16.msra.mxu3 %v3653_v48  ;;  %v4383_v44 = vld [vmem:[%s5287_s13] ss:$0 sm:$0xff]  ;;  %v4163_v48 = vld [vmem:[#allocation11 + $0x78] sm:$0xff] }
 0x618   :  { %1832 = vmatpush.bf16.msra.mxu2 %v4163_v48 }
 0x61b   :  { %1638 = vmatpush.bf16.msra.mxu0 %v3657_v50  ;;  %1625 = vmatpush.bf16.msra.mxu3 %v3645_v55  ;;  %v4161_v50 = vld [vmem:[#allocation11 + $0x68] sm:$0xff]  ;;  %v4152_v55 = vld [vmem:[#allocation11 + $0x20] sm:$0xff] }
 0x61c   :  { %1821 = vmatpush.bf16.msra.mxu1 %v4152_v55 }
 0x61f   :  { %1639 = vmatpush.bf16.msra.mxu0 %v3649_v57  ;;  %1626 = vmatpush.bf16.msra.mxu3 %v3637_v8  ;;  %v4151_v57 = vld [vmem:[#allocation11 + $0x18] sm:$0xff] }
 0x620   :  { %1822 = vmatpush.bf16.msra.mxu1 %v4151_v57 }
 0x623   :  { %1640 = vmatpush.bf16.msra.mxu0 %v3641_v9  ;;  %1627 = vmatpush.bf16.msra.mxu3 %v3629_v5  ;;  %v4148_v9 = vld [vmem:[#allocation11] sm:$0xff] }
 0x627   :  { %1641 = vmatpush.bf16.msra.mxu0 %v3633_v14 }
 0x679   :  { %v1464_v54 = vpop.xlane.xlu2 %1463 }
 0x67a   :  { %v1467_v26 = vmul.f32 %v1464_v54, %v4918_v61  ;;  %v4159_v54 = vld [vmem:[#allocation11 + $0x58] sm:$0xff] }
 0x67b   :  { %v1472_v58 = vpop.xlane.xlu0 %1471 }
 0x67c   :  { %v1477_v59 = vmul.f32 %v1467_v26, %v1467_v26  ;;  %v1475_v60 = vmul.f32 %v1472_v58, %v4918_v61  ;;  %v1481_v35 = vsub.f32 %v5050_v15, %v1467_v26  ;;  %v1534_v26 = vld [vmem:[%s5289_s15] sm:$0x3] }
 0x67d   :  { %v1537_v58 = vperm.slane %v1534_v26, 1  ;;  %v1536_v3 = vperm.slane %v1534_v26, 0 }
 0x67e   :  { %v1479_v7 = vsub.f32 %v1475_v60, %v1477_v59  ;;  %v4157_v59 = vld [vmem:[#allocation11 + $0x48] sm:$0xff]  ;;  %v4150_v60 = vld [vmem:[#allocation11 + $0x10] sm:$0xff] }
 0x67f   :  { %1823 = vmatpush.bf16.msra.mxu1 %v4150_v60 }
 0x680   :  { %v1483_v13 = vadd.f32 1e-12, %v1479_v7 }
 0x681   :  { %v1466_v18 = vpop.xlane.xlu1 %1465 }
 0x682   :  { %4432 = vrsqrt.f32 %v1483_v13  ;;  %v1468_v19 = vmul.f32 %v1466_v18, %v4918_v61  ;;  %vm1491_vm13 = vweird.f32 %v1483_v13 }
 0x683   :  { %v1474_v20 = vpop.xlane.xlu2 %1473  ;;  %1824 = vmatpush.bf16.msra.mxu1 %v4149_v4  ;;  %v4185_v4 = vld [vmem:[#allocation7 + $0x16c] sm:$0xf] }
 0x684   :  { %v1478_v22 = vmul.f32 %v1468_v19, %v1468_v19  ;;  %v1476_v23 = vmul.f32 %v1474_v20, %v4918_v61  ;;  %v1482_v40 = vsub.f32 %v5056_v21, %v1468_v19  ;;  %v4162_v21 = vld [vmem:[#allocation11 + $0x70] sm:$0xff] }
 0x685   :  { %1833 = vmatpush.bf16.msra.mxu2 %v4162_v21 }
 0x686   :  { %v1480_v0 = vsub.f32 %v1476_v23, %v1478_v22 }
 0x687   :  { %1825 = vmatpush.bf16.msra.mxu1 %v4148_v9  ;;  %v3849_v9 = vld [vmem:[#allocation7 + $0x170] sm:$0xf] }
 0x688   :  { %v4433_v24 = vpop.eup %4432  ;;  %v1484_v25 = vadd.f32 1e-12, %v1480_v0 }
 0x689   :  { %v1486_v27 = vmul.f32 %v4433_v24, %v1483_v13  ;;  %vm1492_vm12 = vweird.f32 %v4433_v24  ;;  %1834 = vmatpush.bf16.msra.mxu2 %v4161_v50 }
 0x68a   :  { %4434 = vrsqrt.f32 %v1484_v25  ;;  %vm1493_vm14 = vmor %vm1491_vm13, %vm1492_vm12  ;;  %vm1501_vm0 = vweird.f32 %v1484_v25 }
 0x68b   :  { %v1487_v28 = vmul.f32 %v4433_v24, %v1486_v27 }
 0x68d   :  { %v1488_v16 = vmul.f32 0.5, %v1487_v28  ;;  %1835 = vmatpush.bf16.msra.mxu2 %v4160_v52 }
 0x68f   :  { %v1489_v29 = vsub.f32 1.5, %v1488_v16 }
 0x690   :  { %v4435_v30 = vpop.eup %4434 }
 0x691   :  { %v1490_v31 = vmul.f32 %v4433_v24, %v1489_v29  ;;  %v1496_v1 = vmul.f32 %v4435_v30, %v1484_v25  ;;  %vm1502_vm15 = vweird.f32 %v4435_v30  ;;  %1836 = vmatpush.bf16.msra.mxu2 %v4159_v54 }
 0x692   :  { %vm1503_vm1 = vmor %vm1501_vm0, %vm1502_vm15 }
 0x693   :  { %v1497_v32 = vmul.f32 %v4435_v30, %v1496_v1  ;;  %v1494_v33 = vsel %vm1493_vm14, %v4433_v24, %v1490_v31 }
 0x694   :  { %v1505_v37 = vmul.f32 %v1494_v33, %v1481_v35 }
 0x695   :  { %v1498_v34 = vmul.f32 0.5, %v1497_v32  ;;  %1837 = vmatpush.bf16.msra.mxu2 %v4158_v56 }
 0x696   :  { %v1510_v43 = vmul.f32 %v4382_v38, %v1505_v37 }
 0x697   :  { %v1499_v36 = vsub.f32 1.5, %v1498_v34 }
 0x698   :  { %v5073_v45 = vadd.f32 %v4383_v44, %v1510_v43 }
 0x699   :  { %v1500_v39 = vmul.f32 %v4435_v30, %v1499_v36  ;;  %1838 = vmatpush.bf16.msra.mxu2 %v4157_v59 }
 0x69b   :  { %v1504_v41 = vsel %vm1503_vm1, %v4435_v30, %v1500_v39 }
 0x69c   :  { %v1506_v42 = vmul.f32 %v1504_v41, %v1482_v40 }
 0x69d   :  { %1839 = vmatpush.bf16.msra.mxu2 %v4156_v2 }
 0x69e   :  { %v1511_v15 = vmul.f32 %v4382_v38, %v1506_v42 }
 0x6a0   :  { %v5075_v46 = vadd.f32 %v4383_v44, %v1511_v15 }
 0x6a2   :  { %v1517_v47 = vpack.c.bf16 %v5075_v46, %v5073_v45 }
 0x6a4   :  { %1628 = vmatmul.bf16.vlgmr.msra.gmra.mxu3 %v1517_v47  ;;  %1642 = vmatmul.bf16.vlgmr.msra.gmra.mxu0 %v1517_v47 }
 0x721   :  { %v1643_v63 = vpop.f32.mrf.mxu0 }
 0x722   :  { %v1644_v62 = vadd.f32 %v1643_v63, %v1537_v58 }
 0x724   :  { %v1649_v8 = vmul.f32 %v1644_v62, %v1644_v62 }
 0x726   :  { %v1653_v6 = vmul.f32 %v1649_v8, %v1644_v62 }
 0x727   :  { %v1629_v7 = vpop.f32.mrf.mxu3 }
 0x728   :  { %v1657_v12 = vmul.f32 0.044715, %v1653_v6  ;;  %v1630_v11 = vadd.f32 %v1629_v7, %v1536_v3  ;;  %v3843_v7 = vld [vmem:[#allocation7 + $0x174] sm:$0xf0] }
 0x729   :  { %v1645_v5 = vpop.f32.mrf.mxu0 }
 0x72a   :  { %v1661_v13 = vadd.f32 %v1657_v12, %v1644_v62  ;;  %v1648_v14 = vmul.f32 %v1630_v11, %v1630_v11  ;;  %v1646_v18 = vadd.f32 %v1645_v5, %v1537_v58  ;;  %v4187_v12 = vld [vmem:[#allocation7 + $0x178] sm:$0xf0] }
 0x72b   :  { %v3850_v5 = vor.u32 %v4187_v12, %v3849_v9  ;;  %v3777_v9 = vld [vmem:[#allocation7 + $0xe0] sm:$0xf]  ;;  %v4169_v12 = vld [vmem:[#allocation7 + $0xe8] sm:$0xf0] }
 0x72c   :  { %v1665_v19 = vmul.f32 0.7978846, %v1661_v13  ;;  %v1652_v20 = vmul.f32 %v1648_v14, %v1630_v11  ;;  %v1651_v22 = vmul.f32 %v1646_v18, %v1646_v18  ;;  %v4183_v13 = vld [vmem:[#allocation7 + $0x158] sm:$0xf0]  ;;  %v4182_v14 = vld [vmem:[#allocation7 + $0x154] sm:$0xf] }
 0x72d   :  { %2103 = vmatpush.bf16.msrb.mxu1 %v3850_v5 }
 0x72e   :  { %v1656_v23 = vmul.f32 0.044715, %v1652_v20  ;;  %v1655_v0 = vmul.f32 %v1651_v22, %v1646_v18  ;;  %4436 = vtanh.f32 %v1665_v19  ;;  %v3831_v19 = vld [vmem:[#allocation7 + $0x15c] sm:$0xf0]  ;;  %v3837_v20 = vld [vmem:[#allocation7 + $0x158] sm:$0xf] }
 0x72f   :  { %v1631_v24 = vpop.f32.mrf.mxu3  ;;  %v4184_v22 = vld [vmem:[#allocation7 + $0x160] sm:$0xf0] }
 0x730   :  { %v1660_v25 = vadd.f32 %v1656_v23, %v1630_v11  ;;  %v1659_v27 = vmul.f32 0.044715, %v1655_v0  ;;  %v1632_v28 = vadd.f32 %v1631_v24, %v1536_v3  ;;  %v4186_v3 = vld [vmem:[#allocation7 + $0x170] sm:$0xf0]  ;;  %v3834_v23 = vor.u32 %v4182_v14, %v3831_v19  ;;  %v3817_v24 = vld [vmem:[#allocation7 + $0x138] sm:$0xf] }
 0x731   :  { %v3838_v0 = vor.u32 %v4184_v22, %v3837_v20  ;;  %v4165_v14 = vld [vmem:[#allocation7 + $0xc8] sm:$0xf0]  ;;  %v3759_v20 = vld [vmem:[#allocation7 + $0xcc] sm:$0xf0]  ;;  %v3765_v22 = vld [vmem:[#allocation7 + $0xc8] sm:$0xf] }
 0x732   :  { %v1664_v16 = vmul.f32 0.7978846, %v1660_v25  ;;  %v1663_v29 = vadd.f32 %v1659_v27, %v1646_v18  ;;  %v1650_v30 = vmul.f32 %v1632_v28, %v1632_v28  ;;  %v4180_v25 = vld [vmem:[#allocation7 + $0x140] sm:$0xf0]  ;;  %v4179_v27 = vld [vmem:[#allocation7 + $0x13c] sm:$0xf] }
 0x733   :  { %2104 = vmatpush.bf16.msrb.mxu1 %v3838_v0 }
 0x734   :  { %v1667_v31 = vmul.f32 0.7978846, %v1663_v29  ;;  %v1654_v1 = vmul.f32 %v1650_v30, %v1632_v28  ;;  %4438 = vtanh.f32 %v1664_v16  ;;  %v4437_v32 = vpop.eup %4436  ;;  %v3819_v16 = vld [vmem:[#allocation7 + $0x144] sm:$0xf0]  ;;  %v3825_v29 = vld [vmem:[#allocation7 + $0x140] sm:$0xf] }
 0x735   :  { %v1673_v35 = vadd.f32 1.0, %v4437_v32  ;;  %v4181_v30 = vld [vmem:[#allocation7 + $0x148] sm:$0xf0]  ;;  %v3805_v32 = vld [vmem:[#allocation7 + $0x120] sm:$0xf] }
 0x736   :  { %4440 = vtanh.f32 %v1667_v31  ;;  %v1658_v33 = vmul.f32 0.044715, %v1654_v1  ;;  %v3822_v31 = vor.u32 %v4179_v27, %v3819_v16  ;;  %v3826_v1 = vor.u32 %v4181_v30, %v3825_v29 }
 0x737   :  { %v1677_v39 = vmul.f32 0.5, %v1673_v35 }
 0x738   :  { %v1662_v34 = vadd.f32 %v1658_v33, %v1632_v28  ;;  %2105 = vmatpush.bf16.msrb.mxu1 %v3826_v1  ;;  %v4177_v33 = vld [vmem:[#allocation7 + $0x128] sm:$0xf0] }
 0x739   :  { %v1681_v43 = vmul.f32 %v1677_v39, %v1644_v62  ;;  %v3806_v35 = vor.u32 %v4177_v33, %v3805_v32 }
 0x73a   :  { %v1666_v36 = vmul.f32 0.7978846, %v1662_v34  ;;  %v4439_v37 = vpop.eup %4438  ;;  %v4176_v34 = vld [vmem:[#allocation7 + $0x124] sm:$0xf] }
 0x73b   :  { %v1672_v41 = vadd.f32 1.0, %v4439_v37  ;;  %v3813_v37 = vld [vmem:[#allocation7 + $0x128] sm:$0xf] }
 0x73c   :  { %v4441_v38 = vpop.eup %4440  ;;  %4442 = vtanh.f32 %v1666_v36  ;;  %v3807_v36 = vld [vmem:[#allocation7 + $0x12c] sm:$0xf0] }
 0x73d   :  { %v1675_v40 = vadd.f32 1.0, %v4441_v38  ;;  %v1676_v47 = vmul.f32 0.5, %v1672_v41  ;;  %v4178_v38 = vld [vmem:[#allocation7 + $0x130] sm:$0xf0]  ;;  %v3810_v39 = vor.u32 %v4176_v34, %v3807_v36  ;;  %v3793_v41 = vld [vmem:[#allocation7 + $0x108] sm:$0xf] }
 0x73f   :  { %v1679_v42 = vmul.f32 0.5, %v1675_v40  ;;  %v1680_v50 = vmul.f32 %v1676_v47, %v1630_v11  ;;  %v3846_v11 = vor.u32 %v4185_v4, %v3843_v7  ;;  %v3814_v40 = vor.u32 %v4178_v38, %v3813_v37  ;;  %v3801_v47 = vld [vmem:[#allocation7 + $0x110] sm:$0xf]  ;;  %v4167_v4 = vld [vmem:[#allocation7 + $0xdc] sm:$0xf] }
 0x740   :  { %v3771_v7 = vld [vmem:[#allocation7 + $0xe4] sm:$0xf0] }
 0x741   :  { %v1683_v44 = vmul.f32 %v1679_v42, %v1646_v18  ;;  %2089 = vmatpush.bf16.msrb.mxu0 %v3846_v11  ;;  %2106 = vmatpush.bf16.msrb.mxu1 %v3814_v40  ;;  %v4174_v42 = vld [vmem:[#allocation7 + $0x110] sm:$0xf0]  ;;  %v3774_v5 = vor.u32 %v4167_v4, %v3771_v7 }
 0x742   :  { %v4443_v15 = vpop.eup %4442 }
 0x743   :  { %v1674_v48 = vadd.f32 1.0, %v4443_v15  ;;  %v1685_v21 = vpack.c.bf16 %v1683_v44, %v1681_v43  ;;  %v4173_v43 = vld [vmem:[#allocation7 + $0x10c] sm:$0xf]  ;;  %v3794_v44 = vor.u32 %v4174_v42, %v3793_v41  ;;  %v3795_v15 = vld [vmem:[#allocation7 + $0x114] sm:$0xf0] }
 0x745   :  { %v1678_v49 = vmul.f32 0.5, %v1674_v48  ;;  %1840 = vmatmul.bf16.vlgmr.msra.gmra.mxu2 %v1685_v21  ;;  %2090 = vmatpush.bf16.msrb.mxu0 %v3834_v23  ;;  %v4175_v48 = vld [vmem:[#allocation7 + $0x118] sm:$0xf0]  ;;  %v3798_v21 = vor.u32 %v4173_v43, %v3795_v15  ;;  %v4166_v23 = vld [vmem:[#allocation7 + $0xd0] sm:$0xf0] }
 0x747   :  { %v1682_v51 = vmul.f32 %v1678_v49, %v1632_v28  ;;  %v3818_v28 = vor.u32 %v4180_v25, %v3817_v24  ;;  %v3802_v49 = vor.u32 %v4175_v48, %v3801_v47  ;;  %v3766_v25 = vor.u32 %v4166_v23, %v3765_v22  ;;  %v4385_v47 = vld [vmem:[%s5292_s18] ss:$0 sm:$0xff] }
 0x749   :  { %v1684_v52 = vpack.c.bf16 %v1682_v51, %v1680_v50  ;;  %2091 = vmatpush.bf16.msrb.mxu0 %v3822_v31  ;;  %2107 = vmatpush.bf16.msrb.mxu1 %v3802_v49  ;;  %v3781_v50 = vld [vmem:[#allocation7 + $0xf0] sm:$0xf]  ;;  %v4171_v51 = vld [vmem:[#allocation7 + $0xf8] sm:$0xf0] }
 0x74b   :  { %1826 = vmatmul.bf16.vlgmr.msra.gmra.mxu1 %v1684_v52  ;;  %v4170_v52 = vld [vmem:[#allocation7 + $0xf4] sm:$0xf] }
 0x74d   :  { %2092 = vmatpush.bf16.msrb.mxu0 %v3810_v39 }
 0x751   :  { %2093 = vmatpush.bf16.msrb.mxu0 %v3798_v21 }
 0x7c8   :  { %v1827_v54 = vpop.f32.mrf.mxu1  ;;  %v1841_v55 = vpop.f32.mrf.mxu2 }
 0x7c9   :  { %v1828_v56 = vadd.f32 %v4384_v53, %v1827_v54  ;;  %v3782_v54 = vor.u32 %v4171_v51, %v3781_v50 }
 0x7cb   :  { %v1842_v26 = vadd.f32 %v1841_v55, %v1828_v56  ;;  %v3783_v55 = vld [vmem:[#allocation7 + $0xfc] sm:$0xf0]  ;;  %v3789_v56 = vld [vmem:[#allocation7 + $0xf8] sm:$0xf] }
 0x7cd   :  { %v5086_v57 = vadd.f32 %v1842_v26, %v5073_v45  ;;  %v3841_v45 = vld [vmem:[#allocation7 + $0x168] sm:$0xf]  ;;  %v4172_v26 = vld [vmem:[#allocation7 + $0x100] sm:$0xf0] }
 0x7ce   :  { %v3842_v6 = vor.u32 %v4186_v3, %v3841_v45  ;;  %v3769_v45 = vld [vmem:[#allocation7 + $0xd8] sm:$0xf]  ;;  %v4168_v3 = vld [vmem:[#allocation7 + $0xe0] sm:$0xf0] }
 0x7cf   :  { %1850 = vadd.xlane.f32.xlu1 %v5086_v57  ;;  %v1856_v58 = vmul.f32 %v5086_v57, %v5086_v57 }
 0x7d0   :  { %v1829_v59 = vpop.f32.mrf.mxu1  ;;  %v1843_v63 = vpop.f32.mrf.mxu2  ;;  %2075 = vmatpush.bf16.msrb.mxu3 %v3842_v6  ;;  %v3770_v6 = vor.u32 %v4168_v3, %v3769_v45 }
 0x7d1   :  { %v1830_v60 = vadd.f32 %v4384_v53, %v1829_v59  ;;  %1858 = vadd.xlane.f32.xlu0 %v1856_v58  ;;  %v3786_v59 = vor.u32 %v4170_v52, %v3783_v55  ;;  %v4386_v52 = vld [vmem:[%s5293_s19] ss:$0 sm:$0xff] }
 0x7d3   :  { %v1844_v62 = vadd.f32 %v1843_v63, %v1830_v60  ;;  %v3790_v60 = vor.u32 %v4172_v26, %v3789_v56  ;;  %2094 = vmatpush.bf16.msrb.mxu0 %v3786_v59 }
 0x7d5   :  { %v5092_v2 = vadd.f32 %v1844_v62, %v5075_v46  ;;  %v3829_v46 = vld [vmem:[#allocation7 + $0x150] sm:$0xf]  ;;  %2108 = vmatpush.bf16.msrb.mxu1 %v3790_v60 }
 0x7d6   :  { %v3830_v18 = vor.u32 %v4183_v13, %v3829_v46  ;;  %v3778_v46 = vor.u32 %v4169_v12, %v3777_v9  ;;  %v3757_v13 = vld [vmem:[#allocation7 + $0xc0] sm:$0xf] }
 0x7d7   :  { %1852 = vadd.xlane.f32.xlu2 %v5092_v2  ;;  %v1857_v8 = vmul.f32 %v5092_v2, %v5092_v2  ;;  %v3758_v19 = vor.u32 %v4165_v14, %v3757_v13  ;;  %2095 = vmatpush.bf16.msrb.mxu0 %v3774_v5 }
 0x7d8   :  { %2076 = vmatpush.bf16.msrb.mxu3 %v3830_v18  ;;  %v4164_v18 = vld [vmem:[#allocation7 + $0xc4] sm:$0xf] }
 0x7d9   :  { %1860 = vadd.xlane.f32.xlu1 %v1857_v8  ;;  %2109 = vmatpush.bf16.msrb.mxu1 %v3778_v46  ;;  %v3762_v24 = vor.u32 %v4164_v18, %v3759_v20 }
 0x7db   :  { %2096 = vmatpush.bf16.msrb.mxu0 %v3762_v24 }
 0x7dc   :  { %2077 = vmatpush.bf16.msrb.mxu3 %v3818_v28 }
 0x7dd   :  { %2110 = vmatpush.bf16.msrb.mxu1 %v3766_v25 }
 0x7e0   :  { %2078 = vmatpush.bf16.msrb.mxu3 %v3806_v35 }
 0x7e4   :  { %2079 = vmatpush.bf16.msrb.mxu3 %v3794_v44 }
 0x7e8   :  { %2080 = vmatpush.bf16.msrb.mxu3 %v3782_v54 }
 0x7ec   :  { %2081 = vmatpush.bf16.msrb.mxu3 %v3770_v6 }
 0x7f0   :  { %2082 = vmatpush.bf16.msrb.mxu3 %v3758_v19 }
 0x842   :  { %v1851_v53 = vpop.xlane.xlu1 %1850 }
 0x843   :  { %v1854_v58 = vmul.f32 %v1851_v53, %v4918_v61 }
 0x844   :  { %v1859_v63 = vpop.xlane.xlu0 %1858 }
 0x845   :  { %v1864_v62 = vmul.f32 %v1854_v58, %v1854_v58  ;;  %v1862_v8 = vmul.f32 %v1859_v63, %v4918_v61  ;;  %v1868_v43 = vsub.f32 %v5086_v57, %v1854_v58 }
 0x847   :  { %v1866_v11 = vsub.f32 %v1862_v8, %v1864_v62 }
 0x849   :  { %v1870_v0 = vadd.f32 1e-12, %v1866_v11 }
 0x84a   :  { %v1853_v27 = vpop.xlane.xlu2 %1852 }
 0x84b   :  { %4444 = vrsqrt.f32 %v1870_v0  ;;  %v1855_v28 = vmul.f32 %v1853_v27, %v4918_v61  ;;  %vm1878_vm3 = vweird.f32 %v1870_v0 }
 0x84c   :  { %v1861_v16 = vpop.xlane.xlu1 %1860 }
 0x84d   :  { %v1865_v29 = vmul.f32 %v1855_v28, %v1855_v28  ;;  %v1863_v30 = vmul.f32 %v1861_v16, %v4918_v61  ;;  %v1869_v21 = vsub.f32 %v5092_v2, %v1855_v28  ;;  %v3754_v2 = vld [vmem:[%s5283_s9 + $0x3] sm:$0x7] }
 0x84e   :  { %v1942_v56 = vperm.slane %v3754_v2, 1  ;;  %v1941_v63 = vperm.slane %v3754_v2, 0  ;;  %v1943_v8 = vperm.slane %v3754_v2, 2 }
 0x84f   :  { %v1867_v31 = vsub.f32 %v1863_v30, %v1865_v29 }
 0x851   :  { %v4445_v1 = vpop.eup %4444  ;;  %v1871_v32 = vadd.f32 1e-12, %v1867_v31 }
 0x852   :  { %v1873_v33 = vmul.f32 %v4445_v1, %v1870_v0  ;;  %vm1879_vm2 = vweird.f32 %v4445_v1 }
 0x853   :  { %4446 = vrsqrt.f32 %v1871_v32  ;;  %vm1880_vm4 = vmor %vm1878_vm3, %vm1879_vm2  ;;  %vm1888_vm6 = vweird.f32 %v1871_v32 }
 0x854   :  { %v1874_v34 = vmul.f32 %v4445_v1, %v1873_v33 }
 0x856   :  { %v1875_v35 = vmul.f32 0.5, %v1874_v34 }
 0x858   :  { %v1876_v36 = vsub.f32 1.5, %v1875_v35 }
 0x859   :  { %v4447_v37 = vpop.eup %4446 }
 0x85a   :  { %v1877_v38 = vmul.f32 %v4445_v1, %v1876_v36  ;;  %v1883_v39 = vmul.f32 %v4447_v37, %v1871_v32  ;;  %vm1889_vm5 = vweird.f32 %v4447_v37 }
 0x85b   :  { %vm1890_vm12 = vmor %vm1888_vm6, %vm1889_vm5 }
 0x85c   :  { %v1884_v40 = vmul.f32 %v4447_v37, %v1883_v39  ;;  %v1881_v41 = vsel %vm1880_vm4, %v4445_v1, %v1877_v38 }
 0x85d   :  { %v1892_v15 = vmul.f32 %v1881_v41, %v1868_v43 }
 0x85e   :  { %v1885_v42 = vmul.f32 0.5, %v1884_v40 }
 0x85f   :  { %v1897_v51 = vmul.f32 %v4385_v47, %v1892_v15 }
 0x860   :  { %v1886_v44 = vsub.f32 1.5, %v1885_v42 }
 0x861   :  { %v5109_v53 = vadd.f32 %v4386_v52, %v1897_v51 }
 0x862   :  { %v1887_v48 = vmul.f32 %v4447_v37, %v1886_v44 }
 0x864   :  { %v1891_v49 = vsel %vm1890_vm12, %v4447_v37, %v1887_v48 }
 0x865   :  { %v1893_v50 = vmul.f32 %v1891_v49, %v1869_v21 }
 0x867   :  { %v1898_v57 = vmul.f32 %v4385_v47, %v1893_v50 }
 0x869   :  { %v5111_v54 = vadd.f32 %v4386_v52, %v1898_v57 }
 0x86b   :  { %v1904_v55 = vpack.c.bf16 %v5111_v54, %v5109_v53 }
 0x86d   :  { %2083 = vmatmul.bf16.vlgmr.msrb.gmra.mxu3 %v1904_v55  ;;  %2097 = vmatmul.bf16.vlgmr.msrb.gmra.mxu0 %v1904_v55 }
 0x86e   :  { %2111 = vmatmul.bf16.vlgmr.msrb.gmra.mxu1 %v1904_v55 }
 0x8ea   :  { %v2098_v26 = vpop.f32.mrf.mxu0 }
 0x8eb   :  { %v2099_v58 = vadd.f32 %v2098_v26, %v1942_v56  ;;  %v2112_v59 = vpop.f32.mrf.mxu1 }
 0x8ec   :  { %v2113_v9 = vadd.f32 %v2112_v59, %v1943_v8 }
 0x8ed   :  { %v2165_v60 = vpack.c.bf16 %v2099_v58, %v2099_v58 }
 0x8ee   :  { %v2193_v38 = vpack.c.bf16 %v2113_v9, %v2113_v9 }
 0x8ef   :  { %v2205_v62 = vsel %vm921_vm7, %v2165_v60, 0 }
 0x8f0   :  { %v2084_v45 = vpop.f32.mrf.mxu3  ;;  %2214 = vmatpush.bf16.xpose.msrb.mxu2 %v2205_v62  ;;  %v2469_v15 = vsel %vm1194_vm8, %v2193_v38, 0 }
 0x8f1   :  { %v2085_v3 = vadd.f32 %v2084_v45, %v1941_v63 }
 0x8f2   :  { %v2100_v4 = vpop.f32.mrf.mxu0 }
 0x8f3   :  { %v2101_v6 = vadd.f32 %v2100_v4, %v1942_v56  ;;  %v2114_v7 = vpop.f32.mrf.mxu1  ;;  %v2137_v46 = vpack.c.bf16 %v2085_v3, %v2085_v3 }
 0x8f4   :  { %v2115_v12 = vadd.f32 %v2114_v7, %v1943_v8 }
 0x8f5   :  { %v4322_v11 = vpack.i.bf16 %v2101_v6, %v2099_v58  ;;  %v2166_v5 = vpack.c.bf16 %v2101_v6, %v2101_v6 }
 0x8f6   :  { %v5119_v13 = vpack.i.bf16 %v2115_v12, %v2113_v9  ;;  %v2194_v39 = vpack.c.bf16 %v2115_v12, %v2115_v12 }
 0x8f7   :  { %4323 = vrot.lane.b32.xlu0 %v4322_v11, %s4710_s28  ;;  %4318 = vrot.lane.b32.xlu2 %v4322_v11, %s4723_s1  ;;  %v2224_v14 = vsel %vm921_vm7, %v2166_v5, 0 }
 0x8f8   :  { %3851 = vmatmul.msk.bf16.vlgmr.msrb.gmra.mxu2 %vm921_vm7, %v2137_v46  ;;  %v2086_v18 = vpop.f32.mrf.mxu3  ;;  %2233 = vmatpush.bf16.xpose.msra.mxu3 %v2224_v14  ;;  %v2488_v47 = vsel %vm1194_vm8, %v2194_v39, 0 }
 0x8f9   :  { %v2087_v19 = vadd.f32 %v2086_v18, %v1941_v63 }
 0x8fb   :  { %v4327_v20 = vpack.i.bf16 %v2087_v19, %v2085_v3  ;;  %v2138_v22 = vpack.c.bf16 %v2087_v19, %v2087_v19 }
 0x8fd   :  { %4328 = vrot.lane.b32.xlu1 %v4327_v20, %s4723_s1 }
 0x8ff   :  { %4338 = vrot.lane.b32.xlu2 %v4322_v11, %s4722_s7  ;;  %3852 = vmatmul.msk.bf16.vlgmr.msra.gmra.mxu3 %vm921_vm7, %v2138_v22 }
 0x900   :  { %4333 = vrot.lane.b32.xlu0 %v4327_v20, %s4710_s28 }
 0x905   :  { %4343 = vrot.lane.b32.xlu1 %v4327_v20, %s4722_s7 }
 0x951   :  { %v4319_v23 = vpop.permute.xlu2 %4318 }
 0x952   :  { %v4321_v0 = vunpack.i.h.bf16 %v4319_v23  ;;  %v4320_v24 = vunpack.i.l.bf16 %v4319_v23 }
 0x954   :  { %v2168_v25 = vpack.c.bf16 %v4321_v0, %v4321_v0  ;;  %v2167_v27 = vpack.c.bf16 %v4320_v24, %v4320_v24 }
 0x956   :  { %v2243_v28 = vsel %vm921_vm7, %v2167_v27, 0  ;;  %v2262_v16 = vsel %vm921_vm7, %v2168_v25, 0 }
 0x957   :  { %2252 = vmatpush.bf16.xpose.msra.mxu0 %v2243_v28  ;;  %2271 = vmatpush.bf16.xpose.msra.mxu1 %v2262_v16 }
 0x959   :  { %v4339_v29 = vpop.permute.xlu2 %4338 }
 0x95a   :  { %v4341_v30 = vunpack.i.h.bf16 %v4339_v29  ;;  %v4340_v31 = vunpack.i.l.bf16 %v4339_v29 }
 0x95c   :  { %v2172_v1 = vpack.c.bf16 %v4341_v30, %v4341_v30  ;;  %v2171_v32 = vpack.c.bf16 %v4340_v31, %v4340_v31 }
 0x95e   :  { %v2319_v33 = vsel %vm921_vm7, %v2171_v32, 0  ;;  %v2338_v34 = vsel %vm921_vm7, %v2172_v1, 0 }
 0x95f   :  { %2328 = vmatpush.bf16.xpose.msrb.mxu0 %v2319_v33  ;;  %2347 = vmatpush.bf16.xpose.msrb.mxu1 %v2338_v34 }
 0x969   :  { %v4324_v35 = vpop.permute.xlu0 %4323 }
 0x96a   :  { %v4326_v36 = vunpack.i.h.bf16 %v4324_v35  ;;  %v4325_v37 = vunpack.i.l.bf16 %v4324_v35 }
 0x96c   :  { %v2170_v40 = vpack.c.bf16 %v4326_v36, %v4326_v36  ;;  %v2169_v41 = vpack.c.bf16 %v4325_v37, %v4325_v37 }
 0x96e   :  { %v2281_v42 = vsel %vm921_vm7, %v2169_v41, 0  ;;  %v2300_v43 = vsel %vm921_vm7, %v2170_v40, 0 }
 0x96f   :  { %2290 = vmatpush.bf16.xpose.msra.mxu2 %v2281_v42  ;;  %2309 = vmatpush.bf16.xpose.msrb.mxu3 %v2300_v43  ;;  %v4329_v44 = vpop.permute.xlu1 %4328 }
 0x970   :  { %v4331_v48 = vunpack.i.h.bf16 %v4329_v44  ;;  %v4330_v21 = vunpack.i.l.bf16 %v4329_v44 }
 0x972   :  { %v2140_v49 = vpack.c.bf16 %v4331_v48, %v4331_v48  ;;  %v2139_v50 = vpack.c.bf16 %v4330_v21, %v4330_v21  ;;  %v4334_v51 = vpop.permute.xlu0 %4333 }
 0x973   :  { %v4336_v52 = vunpack.i.h.bf16 %v4334_v51  ;;  %v4335_v57 = vunpack.i.l.bf16 %v4334_v51 }
 0x974   :  { %3853 = vmatmul.msk.bf16.vlgmr.msra.gmra.mxu0 %vm921_vm7, %v2139_v50  ;;  %3854 = vmatmul.msk.bf16.vlgmr.msra.gmra.mxu1 %vm921_vm7, %v2140_v49 }
 0x975   :  { %v2142_v55 = vpack.c.bf16 %v4336_v52, %v4336_v52  ;;  %v2141_v2 = vpack.c.bf16 %v4335_v57, %v4335_v57 }
 0x977   :  { %2478 = vmatpush.bf16.msrb.mxu2 %v2469_v15  ;;  %2497 = vmatpush.bf16.msra.mxu3 %v2488_v47  ;;  %v4344_v56 = vpop.permute.xlu1 %4343 }
 0x978   :  { %3855 = vmatmul.msk.bf16.vlgmr.msra.gmra.mxu2 %vm921_vm7, %v2141_v2  ;;  %3856 = vmatmul.msk.bf16.vlgmr.msrb.gmra.mxu3 %vm921_vm7, %v2142_v55  ;;  %v4346_v59 = vunpack.i.h.bf16 %v4344_v56  ;;  %v4345_v60 = vunpack.i.l.bf16 %v4344_v56 }
 0x97a   :  { %v2144_v8 = vpack.c.bf16 %v4346_v59, %v4346_v59  ;;  %v2143_v45 = vpack.c.bf16 %v4345_v60, %v4345_v60 }
 0x97b   :  { %v2216_v26 = vpop.f32.mrf.mxu2 }
 0x97c   :  { %v2353_v58 = vmul.f32 0.17677669, %v2216_v26 }
 0x97e   :  { %v2361_v63 = vadd.f32 %v2353_v58, %v4970_v10 }
 0x980   :  { %v2369_v62 = vsel %vm1094_vm9, %v2361_v63, -inf }
 0x981   :  { %2370 = vmax.xlane.f32.xlu0 %v2369_v62 }
 0x982   :  { %v2235_v3 = vpop.f32.mrf.mxu3 }
 0x983   :  { %v2218_v4 = vpop.f32.mrf.mxu2  ;;  %v2354_v6 = vmul.f32 0.17677669, %v2235_v3 }
 0x984   :  { %3857 = vmatmul.msk.bf16.vlgmr.msrb.gmra.mxu0 %vm921_vm7, %v2143_v45  ;;  %3858 = vmatmul.msk.bf16.vlgmr.msrb.gmra.mxu1 %vm921_vm7, %v2144_v8 }
 0x985   :  { %v2362_v7 = vadd.f32 %v2354_v6, %v4974_v17 }
 0x987   :  { %v2372_v9 = vsel %vm1094_vm9, %v2362_v7, -inf }
 0x988   :  { %2373 = vmax.xlane.f32.xlu2 %v2372_v9 }
 0x98a   :  { %v2237_v12 = vpop.f32.mrf.mxu3 }
 0x9f1   :  { %v2254_v11 = vpop.f32.mrf.mxu0  ;;  %v2273_v5 = vpop.f32.mrf.mxu1 }
 0x9f2   :  { %v2355_v46 = vmul.f32 0.17677669, %v2254_v11  ;;  %v2356_v14 = vmul.f32 0.17677669, %v2273_v5 }
 0x9f4   :  { %v2371_v18 = vpop.xlane.xlu0 %2370  ;;  %v2364_v19 = vadd.f32 %v2356_v14, %v4974_v17  ;;  %v2363_v20 = vadd.f32 %v2355_v46, %v4970_v10 }
 0x9f5   :  { %v2393_v22 = vsub.f32 %v2361_v63, %v2371_v18 }
 0x9f6   :  { %v2378_v23 = vsel %vm1094_vm9, %v2364_v19, -inf  ;;  %v2375_v0 = vsel %vm1094_vm9, %v2363_v20, -inf }
 0x9f7   :  { %2379 = vmax.xlane.f32.xlu2 %v2378_v23  ;;  %2376 = vmax.xlane.f32.xlu1 %v2375_v0  ;;  %v2401_v27 = vmul.f32 1.442695, %v2393_v22 }
 0x9f9   :  { %v2256_v24 = vpop.f32.mrf.mxu0  ;;  %v2275_v25 = vpop.f32.mrf.mxu1  ;;  %4448 = vpow2.f32 %v2401_v27 }
 0x9fb   :  { %v2292_v28 = vpop.f32.mrf.mxu2  ;;  %v2311_v16 = vpop.f32.mrf.mxu3 }
 0x9fc   :  { %v2357_v29 = vmul.f32 0.17677669, %v2292_v28  ;;  %v2358_v30 = vmul.f32 0.17677669, %v2311_v16  ;;  %v2374_v21 = vpop.xlane.xlu2 %2373 }
 0x9fd   :  { %v2394_v49 = vsub.f32 %v2362_v7, %v2374_v21 }
 0x9fe   :  { %v2366_v31 = vadd.f32 %v2358_v30, %v4974_v17  ;;  %v2365_v1 = vadd.f32 %v2357_v29, %v4970_v10 }
 0x9ff   :  { %v4449_v40 = vpop.eup %4448  ;;  %v2403_v50 = vmul.f32 1.442695, %v2394_v49 }
 0xa00   :  { %v2384_v32 = vsel %vm1094_vm9, %v2366_v31, -inf  ;;  %v2381_v33 = vsel %vm1094_vm9, %v2365_v1, -inf  ;;  %v2417_v15 = vsel %vm1094_vm9, %v4449_v40, 0.0 }
 0xa01   :  { %2385 = vmax.xlane.f32.xlu1 %v2384_v32  ;;  %2382 = vmax.xlane.f32.xlu0 %v2381_v33  ;;  %v2330_v34 = vpop.f32.mrf.mxu0  ;;  %v2349_v35 = vpop.f32.mrf.mxu1  ;;  %4450 = vpow2.f32 %v2403_v50 }
 0xa02   :  { %v2359_v38 = vmul.f32 0.17677669, %v2330_v34  ;;  %v2360_v39 = vmul.f32 0.17677669, %v2349_v35 }
 0xa03   :  { %v2294_v36 = vpop.f32.mrf.mxu2  ;;  %v2313_v37 = vpop.f32.mrf.mxu3 }
 0xa04   :  { %v2367_v41 = vadd.f32 %v2359_v38, %v4970_v10  ;;  %v2368_v42 = vadd.f32 %v2360_v39, %v4974_v17 }
 0xa06   :  { %v2387_v43 = vsel %vm1094_vm9, %v2367_v41, -inf  ;;  %v2390_v44 = vsel %vm1094_vm9, %v2368_v42, -inf }
 0xa07   :  { %2388 = vmax.xlane.f32.xlu2 %v2387_v43  ;;  %v5163_v10 = vpop.eup %4450 }
 0xa08   :  { %v2420_v17 = vsel %vm1094_vm9, %v5163_v10, 0.0 }
 0xa09   :  { %2418 = vadd.xlane.f32.xlu1 %v2417_v15  ;;  %2391 = vmax.xlane.f32.xlu0 %v2390_v44  ;;  %v2332_v47 = vpop.f32.mrf.mxu0  ;;  %v2351_v48 = vpop.f32.mrf.mxu1 }
 0xa1f   :  { %4348 = vrot.lane.b32.xlu2 %v5119_v13, %s4723_s1 }
 0xa48   :  { %2421 = vadd.xlane.f32.xlu2 %v2420_v17 }
 0xa60   :  { %4358 = vrot.lane.b32.xlu2 %v5119_v13, %s4722_s7 }
 0xa6a   :  { %v2380_v51 = vpop.xlane.xlu2 %2379  ;;  %v2377_v52 = vpop.xlane.xlu1 %2376 }
 0xa6b   :  { %v2396_v57 = vsub.f32 %v2364_v19, %v2380_v51  ;;  %v2395_v55 = vsub.f32 %v2363_v20, %v2377_v52 }
 0xa6d   :  { %v2407_v2 = vmul.f32 1.442695, %v2396_v57  ;;  %v2405_v56 = vmul.f32 1.442695, %v2395_v55 }
 0xa6f   :  { %4452 = vpow2.f32 %v2407_v2 }
 0xa70   :  { %4454 = vpow2.f32 %v2405_v56 }
 0xa74   :  { %v2386_v26 = vpop.xlane.xlu1 %2385  ;;  %v2383_v58 = vpop.xlane.xlu0 %2382 }
 0xa75   :  { %v2398_v59 = vsub.f32 %v2366_v31, %v2386_v26  ;;  %v2397_v60 = vsub.f32 %v2365_v1, %v2383_v58  ;;  %v5169_v63 = vpop.eup %4452 }
 0xa76   :  { %v5171_v62 = vpop.eup %4454  ;;  %v2426_v3 = vsel %vm1094_vm9, %v5169_v63, 0.0 }
 0xa77   :  { %v2411_v8 = vmul.f32 1.442695, %v2398_v59  ;;  %v2409_v45 = vmul.f32 1.442695, %v2397_v60  ;;  %2427 = vadd.xlane.f32.xlu1 %v2426_v3  ;;  %v2423_v4 = vsel %vm1094_vm9, %v5171_v62, 0.0 }
 0xa78   :  { %2424 = vadd.xlane.f32.xlu0 %v2423_v4 }
 0xa79   :  { %4456 = vpow2.f32 %v2411_v8 }
 0xa7a   :  { %4458 = vpow2.f32 %v2409_v45  ;;  %v2389_v6 = vpop.xlane.xlu2 %2388 }
 0xa7b   :  { %v2399_v7 = vsub.f32 %v2367_v41, %v2389_v6 }
 0xa7c   :  { %v2419_v9 = vpop.xlane.xlu1 %2418  ;;  %v2392_v12 = vpop.xlane.xlu0 %2391 }
 0xa7d   :  { %4460 = vrcp.f32 %v2419_v9  ;;  %v2413_v11 = vmul.f32 1.442695, %v2399_v7  ;;  %v2400_v46 = vsub.f32 %v2368_v42, %v2392_v12 }
 0xa7f   :  { %v5177_v5 = vpop.eup %4456  ;;  %4462 = vpow2.f32 %v2413_v11  ;;  %v2415_v22 = vmul.f32 1.442695, %v2400_v46 }
 0xa80   :  { %v5179_v14 = vpop.eup %4458  ;;  %v2432_v18 = vsel %vm1094_vm9, %v5177_v5, 0.0 }
 0xa81   :  { %2433 = vadd.xlane.f32.xlu1 %v2432_v18  ;;  %v2429_v19 = vsel %vm1094_vm9, %v5179_v14, 0.0  ;;  %4464 = vpow2.f32 %v2415_v22 }
 0xa82   :  { %2430 = vadd.xlane.f32.xlu0 %v2429_v19  ;;  %v4349_v23 = vpop.permute.xlu2 %4348 }
 0xa83   :  { %v4461_v20 = vpop.eup %4460  ;;  %v4351_v24 = vunpack.i.h.bf16 %v4349_v23  ;;  %v4350_v25 = vunpack.i.l.bf16 %v4349_v23 }
 0xa84   :  { %v2449_v0 = vmul.f32 %v4461_v20, %v4449_v40 }
 0xa85   :  { %v4463_v27 = vpop.eup %4462  ;;  %v2196_v16 = vpack.c.bf16 %v4351_v24, %v4351_v24  ;;  %v2195_v29 = vpack.c.bf16 %v4350_v25, %v4350_v25 }
 0xa86   :  { %v2457_v28 = vpack.c.bf16 %v2449_v0, %v2449_v0  ;;  %v2435_v30 = vsel %vm1094_vm9, %v4463_v27, 0.0 }
 0xa87   :  { %v2507_v31 = vsel %vm1194_vm8, %v2195_v29, 0  ;;  %v2526_v1 = vsel %vm1194_vm8, %v2196_v16, 0  ;;  %v4465_v32 = vpop.eup %4464 }
 0xa88   :  { %3859 = vmatmul.msk.bf16.vlgmr.msrb.gmra.mxu2 %vm1094_vm9, %v2457_v28  ;;  %2516 = vmatpush.bf16.msra.mxu0 %v2507_v31  ;;  %v2438_v33 = vsel %vm1094_vm9, %v4465_v32, 0.0 }
 0xa89   :  { %2436 = vadd.xlane.f32.xlu1 %v2435_v30  ;;  %2535 = vmatpush.bf16.msra.mxu1 %v2526_v1 }
 0xa91   :  { %2439 = vadd.xlane.f32.xlu1 %v2438_v33 }
 0xa96   :  { %4353 = vrot.lane.b32.xlu0 %v5119_v13, %s4710_s28 }
 0xabb   :  { %v2422_v34 = vpop.xlane.xlu2 %2421 }
 0xabc   :  { %4466 = vrcp.f32 %v2422_v34  ;;  %v4195_v34 = vld [vmem:[#allocation8 + $0x78] sm:$0xff] }
 0xac2   :  { %v4467_v35 = vpop.eup %4466 }
 0xac3   :  { %v2450_v36 = vmul.f32 %v4467_v35, %v5163_v10  ;;  %v4359_v37 = vpop.permute.xlu2 %4358  ;;  %v4194_v35 = vld [vmem:[#allocation8 + $0x70] sm:$0xff] }
 0xac4   :  { %v4361_v38 = vunpack.i.h.bf16 %v4359_v37  ;;  %v4360_v39 = vunpack.i.l.bf16 %v4359_v37  ;;  %v4192_v37 = vld [vmem:[#allocation8 + $0x60] sm:$0xff] }
 0xac5   :  { %v2458_v40 = vpack.c.bf16 %v2450_v36, %v2450_v36  ;;  %v4193_v36 = vld [vmem:[#allocation8 + $0x68] sm:$0xff] }
 0xac6   :  { %v2200_v41 = vpack.c.bf16 %v4361_v38, %v4361_v38  ;;  %v2199_v42 = vpack.c.bf16 %v4360_v39, %v4360_v39  ;;  %v4191_v38 = vld [vmem:[#allocation8 + $0x58] sm:$0xff]  ;;  %v4190_v39 = vld [vmem:[#allocation8 + $0x50] sm:$0xff] }
 0xac7   :  { %3860 = vmatmul.msk.bf16.vlgmr.msra.gmra.mxu3 %vm1094_vm9, %v2458_v40  ;;  %v4189_v40 = vld [vmem:[#allocation8 + $0x48] sm:$0xff] }
 0xac8   :  { %v2583_v43 = vsel %vm1194_vm8, %v2199_v42, 0  ;;  %v2602_v44 = vsel %vm1194_vm8, %v2200_v41, 0  ;;  %v4188_v41 = vld [vmem:[#allocation8 + $0x40] sm:$0xff] }
 0xac9   :  { %2592 = vmatpush.bf16.msrb.mxu0 %v2583_v43  ;;  %2611 = vmatpush.bf16.msrb.mxu1 %v2602_v44 }
 0xaea   :  { %v2428_v13 = vpop.xlane.xlu1 %2427 }
 0xaeb   :  { %4468 = vrcp.f32 %v2428_v13  ;;  %v2425_v15 = vpop.xlane.xlu0 %2424 }
 0xaec   :  { %4470 = vrcp.f32 %v2425_v15 }
 0xaf1   :  { %v4469_v47 = vpop.eup %4468 }
 0xaf2   :  { %v4471_v48 = vpop.eup %4470  ;;  %v2452_v21 = vmul.f32 %v4469_v47, %v5169_v63 }
 0xaf3   :  { %v2451_v49 = vmul.f32 %v4471_v48, %v5171_v62 }
 0xaf4   :  { %v2434_v50 = vpop.xlane.xlu1 %2433  ;;  %v2460_v10 = vpack.c.bf16 %v2452_v21, %v2452_v21 }
 0xaf5   :  { %v2459_v17 = vpack.c.bf16 %v2451_v49, %v2451_v49  ;;  %v2431_v52 = vpop.xlane.xlu0 %2430 }
 0xaf6   :  { %3862 = vmatmul.msk.bf16.vlgmr.msra.gmra.mxu1 %vm1094_vm9, %v2460_v10 }
 0xaf7   :  { %3861 = vmatmul.msk.bf16.vlgmr.msra.gmra.mxu0 %vm1094_vm9, %v2459_v17 }
 0xafc   :  { %v2437_v51 = vpop.xlane.xlu1 %2436 }
 0xafd   :  { %4472 = vrcp.f32 %v2437_v51 }
 0xafe   :  { %4474 = vrcp.f32 %v2434_v50 }
 0xaff   :  { %4476 = vrcp.f32 %v2431_v52 }
 0xb03   :  { %v4473_v57 = vpop.eup %4472 }
 0xb04   :  { %v2455_v55 = vmul.f32 %v4473_v57, %v4463_v27  ;;  %v2440_v2 = vpop.xlane.xlu1 %2439  ;;  %v4475_v26 = vpop.eup %4474 }
 0xb05   :  { %4478 = vrcp.f32 %v2440_v2  ;;  %v4477_v58 = vpop.eup %4476  ;;  %v2454_v8 = vmul.f32 %v4475_v26, %v5177_v5  ;;  %v4387_v2 = vld [vmem:[%s5285_s11 + $0x1] ss:$0 sm:$0xff] }
 0xb06   :  { %v2463_v56 = vpack.c.bf16 %v2455_v55, %v2455_v55  ;;  %v2453_v45 = vmul.f32 %v4477_v58, %v5179_v14 }
 0xb07   :  { %v2462_v46 = vpack.c.bf16 %v2454_v8, %v2454_v8 }
 0xb08   :  { %v4354_v59 = vpop.permute.xlu0 %4353  ;;  %3865 = vmatmul.msk.bf16.vlgmr.msrb.gmra.mxu0 %vm1094_vm9, %v2463_v56  ;;  %v2461_v18 = vpack.c.bf16 %v2453_v45, %v2453_v45  ;;  %v3961_v45 = vld [vmem:[#allocation10 + $0xf0] sm:$0xf] }
 0xb09   :  { %v4356_v60 = vunpack.i.h.bf16 %v4354_v59  ;;  %v4355_v63 = vunpack.i.l.bf16 %v4354_v59 }
 0xb0b   :  { %v4479_v62 = vpop.eup %4478  ;;  %v2198_v3 = vpack.c.bf16 %v4356_v60, %v4356_v60  ;;  %v2197_v4 = vpack.c.bf16 %v4355_v63, %v4355_v63  ;;  %v2480_v6 = vpop.f32.mrf.mxu2 }
 0xb0c   :  { %v2456_v7 = vmul.f32 %v4479_v62, %v4465_v32 }
 0xb0d   :  { %v2545_v9 = vsel %vm1194_vm8, %v2197_v4, 0  ;;  %v2564_v12 = vsel %vm1194_vm8, %v2198_v3, 0  ;;  %v4210_v3 = vld [vmem:[#allocation10 + $0xf4] sm:$0xf] }
 0xb0e   :  { %v2464_v11 = vpack.c.bf16 %v2456_v7, %v2456_v7  ;;  %2554 = vmatpush.bf16.msra.mxu2 %v2545_v9  ;;  %2573 = vmatpush.bf16.msrb.mxu3 %v2564_v12  ;;  %v3953_v9 = vld [vmem:[#allocation10 + $0xe0] sm:$0xf]  ;;  %v4209_v12 = vld [vmem:[#allocation10 + $0xe4] sm:$0xf0] }
 0xb10   :  { %3866 = vmatmul.msk.bf16.vlgmr.msrb.gmra.mxu1 %vm1094_vm9, %v2464_v11  ;;  %v4208_v11 = vld [vmem:[#allocation10 + $0xe4] sm:$0xf] }
 0xb11   :  { %3863 = vmatmul.msk.bf16.vlgmr.msra.gmra.mxu2 %vm1094_vm9, %v2461_v18  ;;  %3864 = vmatmul.msk.bf16.vlgmr.msrb.gmra.mxu3 %vm1094_vm9, %v2462_v46  ;;  %v3954_v46 = vor.u32 %v4209_v12, %v3953_v9 }
 0xb12   :  { %2718 = vmatpush.bf16.msrb.mxu2 %v4195_v34  ;;  %v3921_v34 = vld [vmem:[#allocation10 + $0xa0] sm:$0xf] }
 0xb13   :  { %v2482_v5 = vpop.f32.mrf.mxu2 }
 0xb14   :  { %v3945_v5 = vld [vmem:[#allocation10 + $0xd0] sm:$0xf] }
 0xb16   :  { %2719 = vmatpush.bf16.msrb.mxu2 %v4194_v35  ;;  %v4201_v35 = vld [vmem:[#allocation10 + $0xa4] sm:$0xf0] }
 0xb1a   :  { %2720 = vmatpush.bf16.msrb.mxu2 %v4193_v36  ;;  %v4200_v36 = vld [vmem:[#allocation10 + $0xa4] sm:$0xf] }
 0xb1e   :  { %2721 = vmatpush.bf16.msrb.mxu2 %v4192_v37  ;;  %v3922_v37 = vor.u32 %v4201_v35, %v3921_v34  ;;  %v4217_v34 = vld [vmem:[#allocation11 + $0xa8] sm:$0xff]  ;;  %v4223_v35 = vld [vmem:[#allocation11 + $0xd8] sm:$0xff] }
 0xb22   :  { %2722 = vmatpush.bf16.msrb.mxu2 %v4191_v38  ;;  %v3923_v38 = vld [vmem:[#allocation10 + $0xa8] sm:$0xf0] }
 0xb26   :  { %2723 = vmatpush.bf16.msrb.mxu2 %v4190_v39  ;;  %v3926_v39 = vor.u32 %v4200_v36, %v3923_v38  ;;  %v4216_v36 = vld [vmem:[#allocation11 + $0xa0] sm:$0xff]  ;;  %v4215_v38 = vld [vmem:[#allocation11 + $0x98] sm:$0xff] }
 0xb2a   :  { %2724 = vmatpush.bf16.msrb.mxu2 %v4189_v40 }
 0xb2e   :  { %2725 = vmatpush.bf16.msrb.mxu2 %v4188_v41 }
 0xb4a   :  { %v2499_v14 = vpop.f32.mrf.mxu3 }
 0xb52   :  { %v2501_v19 = vpop.f32.mrf.mxu3 }
 0xb53   :  { %v4206_v19 = vld [vmem:[#allocation10 + $0xd4] sm:$0xf] }
 0xb73   :  { %v2537_v20 = vpop.f32.mrf.mxu1 }
 0xb74   :  { %v2518_v22 = vpop.f32.mrf.mxu0 }
 0xb75   :  { %v4362_v23 = vpack.i.bf16 %v2537_v20, %v2518_v22  ;;  %v3947_v22 = vld [vmem:[#allocation10 + $0xd8] sm:$0xf0] }
 0xb77   :  { %4363 = vrot.lane.b32.xlu0 %v4362_v23, %s4722_s7  ;;  %v3950_v23 = vor.u32 %v4206_v19, %v3947_v22  ;;  %v4388_v19 = vld [vmem:[%s5286_s12 + $0x1] ss:$0 sm:$0xff] }
 0xb7b   :  { %v2539_v0 = vpop.f32.mrf.mxu1 }
 0xb7c   :  { %v2520_v24 = vpop.f32.mrf.mxu0  ;;  %v3937_v0 = vld [vmem:[#allocation10 + $0xc0] sm:$0xf] }
 0xb7d   :  { %v4205_v24 = vld [vmem:[#allocation10 + $0xc4] sm:$0xf0] }
 0xb85   :  { %v2594_v25 = vpop.f32.mrf.mxu0 }
 0xb8d   :  { %v2596_v27 = vpop.f32.mrf.mxu0  ;;  %v2613_v28 = vpop.f32.mrf.mxu1 }
 0xb8e   :  { %v4372_v16 = vpack.i.bf16 %v2613_v28, %v2594_v25  ;;  %v4204_v25 = vld [vmem:[#allocation10 + $0xc4] sm:$0xf]  ;;  %v3938_v27 = vor.u32 %v4205_v24, %v3937_v0  ;;  %v3939_v28 = vld [vmem:[#allocation10 + $0xc8] sm:$0xf0] }
 0xb90   :  { %4373 = vrot.lane.b32.xlu2 %v4372_v16, %s4723_s1  ;;  %v3942_v16 = vor.u32 %v4204_v25, %v3939_v28 }
 0xb94   :  { %v2556_v29 = vpop.f32.mrf.mxu2  ;;  %v2575_v30 = vpop.f32.mrf.mxu3 }
 0xb95   :  { %v4367_v31 = vpack.i.bf16 %v2575_v30, %v2556_v29  ;;  %v2615_v1 = vpop.f32.mrf.mxu1  ;;  %v3929_v29 = vld [vmem:[#allocation10 + $0xb0] sm:$0xf]  ;;  %v4203_v30 = vld [vmem:[#allocation10 + $0xb4] sm:$0xf0] }
 0xb96   :  { %v3930_v1 = vor.u32 %v4203_v30, %v3929_v29  ;;  %v4227_v30 = vld [vmem:[#allocation11 + $0xf8] sm:$0xff] }
 0xb97   :  { %4368 = vrot.lane.b32.xlu1 %v4367_v31, %s4710_s28  ;;  %v4202_v31 = vld [vmem:[#allocation10 + $0xb4] sm:$0xf]  ;;  %3111 = vmatpush.bf16.msra.mxu2 %v4227_v30 }
 0xb9c   :  { %v2558_v32 = vpop.f32.mrf.mxu2  ;;  %v2577_v33 = vpop.f32.mrf.mxu3 }
 0xb9d   :  { %v3931_v32 = vld [vmem:[#allocation10 + $0xb8] sm:$0xf0] }
 0xb9e   :  { %v3934_v33 = vor.u32 %v4202_v31, %v3931_v32  ;;  %v4219_v31 = vld [vmem:[#allocation11 + $0xb8] sm:$0xff]  ;;  %v4218_v32 = vld [vmem:[#allocation11 + $0xb0] sm:$0xff] }
 0xb9f   :  { %3097 = vmatpush.bf16.msra.mxu1 %v4219_v31 }
 0xba3   :  { %3098 = vmatpush.bf16.msra.mxu1 %v4218_v32  ;;  %v4390_v32 = vld [vmem:[%s5291_s17 + $0x1] ss:$0 sm:$0xff] }
 0xba7   :  { %3099 = vmatpush.bf16.msra.mxu1 %v4217_v34 }
 0xbab   :  { %3100 = vmatpush.bf16.msra.mxu1 %v4216_v36 }
 0xbaf   :  { %3101 = vmatpush.bf16.msra.mxu1 %v4215_v38 }
 0xbe9   :  { %v4364_v42 = vpop.permute.xlu0 %4363 }
 0xbea   :  { %v4366_v43 = vunpack.i.h.bf16 %v4364_v42  ;;  %v4365_v44 = vunpack.i.l.bf16 %v4364_v42  ;;  %v4374_v13 = vpop.permute.xlu2 %4373  ;;  %v3913_v42 = vld [vmem:[#allocation10 + $0x90] sm:$0xf] }
 0xbeb   :  { %v4376_v21 = vunpack.i.h.bf16 %v4374_v13  ;;  %v4375_v49 = vunpack.i.l.bf16 %v4374_v13 }
 0xbec   :  { %v2642_v50 = vsel %vm921_vm7, %v2499_v14, %v4366_v43  ;;  %v2641_v10 = vsel %vm921_vm7, %v2480_v6, %v4365_v44  ;;  %v3963_v6 = vld [vmem:[#allocation10 + $0xf8] sm:$0xf0]  ;;  %v4207_v14 = vld [vmem:[#allocation10 + $0xd4] sm:$0xf0]  ;;  %v4198_v44 = vld [vmem:[#allocation10 + $0x94] sm:$0xf] }
 0xbed   :  { %v3966_v7 = vor.u32 %v4210_v3, %v3963_v6  ;;  %v3946_v20 = vor.u32 %v4207_v14, %v3945_v5  ;;  %v4199_v43 = vld [vmem:[#allocation10 + $0x94] sm:$0xf0] }
 0xbef   :  { %2911 = vmatpush.bf16.msra.mxu0 %v3966_v7 }
 0xc09   :  { %v4369_v15 = vpop.permute.xlu1 %4368 }
 0xc0a   :  { %v4371_v47 = vunpack.i.h.bf16 %v4369_v15  ;;  %v4370_v48 = vunpack.i.l.bf16 %v4369_v15  ;;  %v3914_v15 = vor.u32 %v4199_v43, %v3913_v42  ;;  %v4214_v42 = vld [vmem:[#allocation11 + $0x90] sm:$0xff]  ;;  %v4220_v43 = vld [vmem:[#allocation11 + $0xc0] sm:$0xff] }
 0xc0b   :  { %3102 = vmatpush.bf16.msra.mxu1 %v4214_v42 }
 0xc0c   :  { %v2644_v17 = vsel %vm1370_vm10, %v2642_v50, %v4371_v47  ;;  %v2643_v51 = vsel %vm1370_vm10, %v2641_v10, %v4370_v48  ;;  %v3915_v47 = vld [vmem:[#allocation10 + $0x98] sm:$0xf0]  ;;  %v3905_v10 = vld [vmem:[#allocation10 + $0x80] sm:$0xf] }
 0xc0d   :  { %v2645_v52 = vsel %vm1373_vm11, %v2643_v51, %v4375_v49  ;;  %v2646_v57 = vsel %vm1373_vm11, %v2644_v17, %v4376_v21  ;;  %v3918_v49 = vor.u32 %v4198_v44, %v3915_v47  ;;  %v4197_v17 = vld [vmem:[#allocation10 + $0x84] sm:$0xf0]  ;;  %v4196_v51 = vld [vmem:[#allocation10 + $0x84] sm:$0xf] }
 0xc0e   :  { %v2647_v55 = vpack.c.bf16 %v2646_v57, %v2645_v52  ;;  %v3906_v52 = vor.u32 %v4197_v17, %v3905_v10  ;;  %v3907_v57 = vld [vmem:[#allocation10 + $0x88] sm:$0xf0] }
 0xc10   :  { %2726 = vmatmul.bf16.vlgmr.msrb.gmra.mxu2 %v2647_v55 }
 0xc93   :  { %v2727_v56 = vpop.f32.mrf.mxu2 }
 0xc94   :  { %v2728_v26 = vadd.f32 %v4387_v2, %v2727_v56 }
 0xc96   :  { %v5221_v58 = vadd.f32 %v2728_v26, %v5109_v53  ;;  %v4211_v53 = vld [vmem:[#allocation10 + $0xf4] sm:$0xf0] }
 0xc97   :  { %v3962_v4 = vor.u32 %v4211_v53, %v3961_v45 }
 0xc98   :  { %2738 = vadd.xlane.f32.xlu0 %v5221_v58  ;;  %v2744_v59 = vmul.f32 %v5221_v58, %v5221_v58 }
 0xc99   :  { %2897 = vmatpush.bf16.msra.mxu3 %v3962_v4 }
 0xc9a   :  { %2746 = vadd.xlane.f32.xlu1 %v2744_v59 }
 0xc9b   :  { %v2729_v60 = vpop.f32.mrf.mxu2 }
 0xc9c   :  { %v2730_v63 = vadd.f32 %v4387_v2, %v2729_v60  ;;  %v3910_v2 = vor.u32 %v4196_v51, %v3907_v57 }
 0xc9d   :  { %2898 = vmatpush.bf16.msra.mxu3 %v3954_v46 }
 0xc9e   :  { %v5227_v62 = vadd.f32 %v2730_v63, %v5111_v54  ;;  %v3955_v54 = vld [vmem:[#allocation10 + $0xe8] sm:$0xf0] }
 0xc9f   :  { %v3958_v18 = vor.u32 %v4208_v11, %v3955_v54 }
 0xca0   :  { %2740 = vadd.xlane.f32.xlu2 %v5227_v62  ;;  %v2745_v8 = vmul.f32 %v5227_v62, %v5227_v62 }
 0xca1   :  { %2912 = vmatpush.bf16.msra.mxu0 %v3958_v18  ;;  %2899 = vmatpush.bf16.msra.mxu3 %v3946_v20 }
 0xca2   :  { %2748 = vadd.xlane.f32.xlu0 %v2745_v8 }
 0xca5   :  { %2913 = vmatpush.bf16.msra.mxu0 %v3950_v23  ;;  %2900 = vmatpush.bf16.msra.mxu3 %v3938_v27  ;;  %v4389_v27 = vld [vmem:[%s5287_s13 + $0x1] ss:$0 sm:$0xff] }
 0xca9   :  { %2914 = vmatpush.bf16.msra.mxu0 %v3942_v16  ;;  %2901 = vmatpush.bf16.msra.mxu3 %v3930_v1  ;;  %v4225_v1 = vld [vmem:[#allocation11 + $0xe8] sm:$0xff] }
 0xcad   :  { %2915 = vmatpush.bf16.msra.mxu0 %v3934_v33  ;;  %2902 = vmatpush.bf16.msra.mxu3 %v3922_v37  ;;  %v4224_v33 = vld [vmem:[#allocation11 + $0xe0] sm:$0xff]  ;;  %v4222_v37 = vld [vmem:[#allocation11 + $0xd0] sm:$0xff] }
 0xcb1   :  { %2916 = vmatpush.bf16.msra.mxu0 %v3926_v39  ;;  %2903 = vmatpush.bf16.msra.mxu3 %v3914_v15  ;;  %v3902_v39 = vld [vmem:[%s5289_s15 + $0x2] sm:$0x3]  ;;  %v4213_v15 = vld [vmem:[#allocation11 + $0x88] sm:$0xff] }
 0xcb2   :  { %3103 = vmatpush.bf16.msra.mxu1 %v4213_v15 }
 0xcb5   :  { %2917 = vmatpush.bf16.msra.mxu0 %v3918_v49  ;;  %2904 = vmatpush.bf16.msra.mxu3 %v3906_v52  ;;  %v4212_v49 = vld [vmem:[#allocation11 + $0x80] sm:$0xff] }
 0xcb6   :  { %3104 = vmatpush.bf16.msra.mxu1 %v4212_v49 }
 0xcb9   :  { %2918 = vmatpush.bf16.msra.mxu0 %v3910_v2 }
 0xd0b   :  { %v2739_v40 = vpop.xlane.xlu0 %2738 }
 0xd0c   :  { %v2742_v41 = vmul.f32 %v2739_v40, %v4918_v61  ;;  %v4221_v40 = vld [vmem:[#allocation11 + $0xc8] sm:$0xff] }
 0xd0d   :  { %v2747_v13 = vpop.xlane.xlu1 %2746 }
 0xd0e   :  { %v2752_v48 = vmul.f32 %v2742_v41, %v2742_v41  ;;  %v2750_v21 = vmul.f32 %v2747_v13, %v4918_v61  ;;  %v2756_v5 = vsub.f32 %v5221_v58, %v2742_v41  ;;  %v2814_v41 = vperm.slane %v3902_v39, 1 }
 0xd10   :  { %v2754_v50 = vsub.f32 %v2750_v21, %v2752_v48  ;;  %v2813_v48 = vperm.slane %v3902_v39, 0 }
 0xd12   :  { %v2758_v55 = vadd.f32 1e-12, %v2754_v50 }
 0xd13   :  { %v2741_v56 = vpop.xlane.xlu2 %2740 }
 0xd14   :  { %4480 = vrsqrt.f32 %v2758_v55  ;;  %v2743_v26 = vmul.f32 %v2741_v56, %v4918_v61  ;;  %vm2766_vm8 = vweird.f32 %v2758_v55 }
 0xd15   :  { %v2749_v59 = vpop.xlane.xlu0 %2748 }
 0xd16   :  { %v2753_v60 = vmul.f32 %v2743_v26, %v2743_v26  ;;  %v2751_v63 = vmul.f32 %v2749_v59, %v4918_v61  ;;  %v2757_v23 = vsub.f32 %v5227_v62, %v2743_v26  ;;  %v4226_v62 = vld [vmem:[#allocation11 + $0xf0] sm:$0xff] }
 0xd17   :  { %3112 = vmatpush.bf16.msra.mxu2 %v4226_v62 }
 0xd18   :  { %v2755_v8 = vsub.f32 %v2751_v63, %v2753_v60 }
 0xd1a   :  { %v4481_v45 = vpop.eup %4480  ;;  %v2759_v53 = vadd.f32 1e-12, %v2755_v8 }
 0xd1b   :  { %v2761_v3 = vmul.f32 %v4481_v45, %v2758_v55  ;;  %vm2767_vm7 = vweird.f32 %v4481_v45  ;;  %3113 = vmatpush.bf16.msra.mxu2 %v4225_v1 }
 0xd1c   :  { %4482 = vrsqrt.f32 %v2759_v53  ;;  %vm2768_vm9 = vmor %vm2766_vm8, %vm2767_vm7  ;;  %vm2776_vm11 = vweird.f32 %v2759_v53 }
 0xd1d   :  { %v2762_v4 = vmul.f32 %v4481_v45, %v2761_v3 }
 0xd1f   :  { %v2763_v6 = vmul.f32 0.5, %v2762_v4  ;;  %3114 = vmatpush.bf16.msra.mxu2 %v4224_v33 }
 0xd21   :  { %v2764_v7 = vsub.f32 1.5, %v2763_v6 }
 0xd22   :  { %v4483_v9 = vpop.eup %4482 }
 0xd23   :  { %v2765_v12 = vmul.f32 %v4481_v45, %v2764_v7  ;;  %v2771_v11 = vmul.f32 %v4483_v9, %v2759_v53  ;;  %vm2777_vm10 = vweird.f32 %v4483_v9  ;;  %3115 = vmatpush.bf16.msra.mxu2 %v4223_v35 }
 0xd24   :  { %vm2778_vm13 = vmor %vm2776_vm11, %vm2777_vm10  ;;  %vm3252_vm11 = vcmask 1041409  }
 0xd25   :  { %v2772_v46 = vmul.f32 %v4483_v9, %v2771_v11  ;;  %v2769_v54 = vsel %vm2768_vm9, %v4481_v45, %v2765_v12 }
 0xd26   :  { %v2780_v20 = vmul.f32 %v2769_v54, %v2756_v5 }
 0xd27   :  { %v2773_v18 = vmul.f32 0.5, %v2772_v46  ;;  %3116 = vmatpush.bf16.msra.mxu2 %v4222_v37 }
 0xd28   :  { %v2785_v24 = vmul.f32 %v4388_v19, %v2780_v20 }
 0xd29   :  { %v2774_v14 = vsub.f32 1.5, %v2773_v18 }
 0xd2a   :  { %v5244_v28 = vadd.f32 %v4389_v27, %v2785_v24 }
 0xd2b   :  { %v2775_v22 = vmul.f32 %v4483_v9, %v2774_v14  ;;  %3117 = vmatpush.bf16.msra.mxu2 %v4221_v40 }
 0xd2d   :  { %v2779_v0 = vsel %vm2778_vm13, %v4483_v9, %v2775_v22 }
 0xd2e   :  { %v2781_v25 = vmul.f32 %v2779_v0, %v2757_v23 }
 0xd2f   :  { %3118 = vmatpush.bf16.msra.mxu2 %v4220_v43 }
 0xd30   :  { %v2786_v58 = vmul.f32 %v4388_v19, %v2781_v25 }
 0xd32   :  { %v5246_v16 = vadd.f32 %v4389_v27, %v2786_v58 }
 0xd34   :  { %v2792_v29 = vpack.c.bf16 %v5246_v16, %v5244_v28 }
 0xd36   :  { %2905 = vmatmul.bf16.vlgmr.msra.gmra.mxu3 %v2792_v29  ;;  %2919 = vmatmul.bf16.vlgmr.msra.gmra.mxu0 %v2792_v29 }
 0xdb3   :  { %v2920_v44 = vpop.f32.mrf.mxu0 }
 0xdb4   :  { %v2921_v13 = vadd.f32 %v2920_v44, %v2814_v41 }
 0xdb6   :  { %v2926_v47 = vmul.f32 %v2921_v13, %v2921_v13 }
 0xdb8   :  { %v2930_v21 = vmul.f32 %v2926_v47, %v2921_v13 }
 0xdb9   :  { %v2906_v50 = vpop.f32.mrf.mxu3 }
 0xdba   :  { %v2934_v10 = vmul.f32 0.044715, %v2930_v21  ;;  %v2907_v17 = vadd.f32 %v2906_v50, %v2813_v48 }
 0xdbb   :  { %v2922_v51 = vpop.f32.mrf.mxu0 }
 0xdbc   :  { %v2938_v52 = vadd.f32 %v2934_v10, %v2921_v13  ;;  %v2925_v57 = vmul.f32 %v2907_v17, %v2907_v17  ;;  %v2923_v55 = vadd.f32 %v2922_v51, %v2814_v41 }
 0xdbe   :  { %v2942_v2 = vmul.f32 0.7978846, %v2938_v52  ;;  %v2929_v56 = vmul.f32 %v2925_v57, %v2907_v17  ;;  %v2928_v26 = vmul.f32 %v2923_v55, %v2923_v55 }
 0xdc0   :  { %v2933_v59 = vmul.f32 0.044715, %v2929_v56  ;;  %v2932_v60 = vmul.f32 %v2928_v26, %v2923_v55  ;;  %4484 = vtanh.f32 %v2942_v2  ;;  %v4235_v2 = vld [vmem:[#allocation13 + $0x38] sm:$0xff] }
 0xdc1   :  { %v2908_v63 = vpop.f32.mrf.mxu3  ;;  %3304 = vmatpush.bf16.msrb.mxu3 %v4235_v2 }
 0xdc2   :  { %v2937_v8 = vadd.f32 %v2933_v59, %v2907_v17  ;;  %v2936_v45 = vmul.f32 0.044715, %v2932_v60  ;;  %v2909_v53 = vadd.f32 %v2908_v63, %v2813_v48  ;;  %v4234_v59 = vld [vmem:[#allocation13 + $0x30] sm:$0xff] }
 0xdc4   :  { %v2941_v3 = vmul.f32 0.7978846, %v2937_v8  ;;  %v2940_v4 = vadd.f32 %v2936_v45, %v2923_v55  ;;  %v2927_v6 = vmul.f32 %v2909_v53, %v2909_v53  ;;  %v4233_v45 = vld [vmem:[#allocation13 + $0x28] sm:$0xff] }
 0xdc5   :  { %3305 = vmatpush.bf16.msrb.mxu3 %v4234_v59 }
 0xdc6   :  { %v2944_v7 = vmul.f32 0.7978846, %v2940_v4  ;;  %v2931_v9 = vmul.f32 %v2927_v6, %v2909_v53  ;;  %4486 = vtanh.f32 %v2941_v3  ;;  %v4485_v12 = vpop.eup %4484 }
 0xdc7   :  { %v2950_v54 = vadd.f32 1.0, %v4485_v12 }
 0xdc8   :  { %4488 = vtanh.f32 %v2944_v7  ;;  %v2935_v11 = vmul.f32 0.044715, %v2931_v9  ;;  %v4392_v9 = vld [vmem:[%s5293_s19 + $0x1] ss:$0 sm:$0xff] }
 0xdc9   :  { %v2954_v19 = vmul.f32 0.5, %v2950_v54  ;;  %3306 = vmatpush.bf16.msrb.mxu3 %v4233_v45 }
 0xdca   :  { %v2939_v46 = vadd.f32 %v2935_v11, %v2909_v53  ;;  %v4232_v11 = vld [vmem:[#allocation13 + $0x20] sm:$0xff] }
 0xdcb   :  { %v2958_v0 = vmul.f32 %v2954_v19, %v2921_v13 }
 0xdcc   :  { %v2943_v18 = vmul.f32 0.7978846, %v2939_v46  ;;  %v4487_v5 = vpop.eup %4486 }
 0xdcd   :  { %v2949_v22 = vadd.f32 1.0, %v4487_v5  ;;  %3307 = vmatpush.bf16.msrb.mxu3 %v4232_v11 }
 0xdce   :  { %v4489_v14 = vpop.eup %4488  ;;  %4490 = vtanh.f32 %v2943_v18 }
 0xdcf   :  { %v2952_v20 = vadd.f32 1.0, %v4489_v14  ;;  %v2953_v27 = vmul.f32 0.5, %v2949_v22  ;;  %v4231_v14 = vld [vmem:[#allocation13 + $0x18] sm:$0xff] }
 0xdd1   :  { %v2956_v23 = vmul.f32 0.5, %v2952_v20  ;;  %v2957_v62 = vmul.f32 %v2953_v27, %v2907_v17  ;;  %3308 = vmatpush.bf16.msrb.mxu3 %v4231_v14  ;;  %v4229_v27 = vld [vmem:[#allocation13 + $0x8] sm:$0xff] }
 0xdd3   :  { %v2960_v24 = vmul.f32 %v2956_v23, %v2923_v55 }
 0xdd4   :  { %v4491_v25 = vpop.eup %4490 }
 0xdd5   :  { %v2962_v58 = vpack.c.bf16 %v2960_v24, %v2958_v0  ;;  %v2951_v29 = vadd.f32 1.0, %v4491_v25  ;;  %v4230_v24 = vld [vmem:[#allocation13 + $0x10] sm:$0xff] }
 0xdd6   :  { %3309 = vmatpush.bf16.msrb.mxu3 %v4230_v24 }
 0xdd7   :  { %v2955_v30 = vmul.f32 0.5, %v2951_v29  ;;  %3119 = vmatmul.bf16.vlgmr.msra.gmra.mxu2 %v2962_v58 }
 0xdd9   :  { %v2959_v31 = vmul.f32 %v2955_v30, %v2909_v53 }
 0xdda   :  { %3310 = vmatpush.bf16.msrb.mxu3 %v4229_v27 }
 0xddb   :  { %v2961_v1 = vpack.c.bf16 %v2959_v31, %v2957_v62  ;;  %v4228_v62 = vld [vmem:[#allocation13] sm:$0xff] }
 0xddd   :  { %3105 = vmatmul.bf16.vlgmr.msra.gmra.mxu1 %v2961_v1 }
 0xdde   :  { %3311 = vmatpush.bf16.msrb.mxu3 %v4228_v62 }
 0xe5a   :  { %v3106_v33 = vpop.f32.mrf.mxu1  ;;  %v3120_v34 = vpop.f32.mrf.mxu2 }
 0xe5b   :  { %v3107_v35 = vadd.f32 %v4390_v32, %v3106_v33 }
 0xe5d   :  { %v3121_v36 = vadd.f32 %v3120_v34, %v3107_v35 }
 0xe5f   :  { %v3125_v37 = vadd.f32 %v3121_v36, %v5244_v28 }
 0xe61   :  { %3131 = vadd.xlane.f32.xlu0 %v3125_v37  ;;  %v3137_v43 = vmul.f32 %v3125_v37, %v3125_v37 }
 0xe62   :  { %v3108_v38 = vpop.f32.mrf.mxu1  ;;  %v3122_v40 = vpop.f32.mrf.mxu2 }
 0xe63   :  { %v3109_v39 = vadd.f32 %v4390_v32, %v3108_v38 }
 0xe65   :  { %v3123_v41 = vadd.f32 %v3122_v40, %v3109_v39 }
 0xe67   :  { %v3126_v42 = vadd.f32 %v3123_v41, %v5246_v16 }
 0xe69   :  { %3133 = vadd.xlane.f32.xlu2 %v3126_v42  ;;  %3139 = vadd.xlane.f32.xlu0 %v3137_v43  ;;  %v3138_v44 = vmul.f32 %v3126_v42, %v3126_v42 }
 0xe71   :  { %3141 = vadd.xlane.f32.xlu2 %v3138_v44 }
 0xed4   :  { %v3132_v13 = vpop.xlane.xlu0 %3131 }
 0xed5   :  { %v3135_v15 = vmul.f32 %v3132_v13, %v4918_v61 }
 0xed7   :  { %v3145_v21 = vmul.f32 %v3135_v15, %v3135_v15  ;;  %v3149_v4 = vsub.f32 %v3125_v37, %v3135_v15 }
 0xedc   :  { %v3134_v47 = vpop.xlane.xlu2 %3133  ;;  %v3140_v48 = vpop.xlane.xlu0 %3139 }
 0xedd   :  { %v3143_v28 = vmul.f32 %v3140_v48, %v4918_v61  ;;  %v3136_v50 = vmul.f32 %v3134_v47, %v4918_v61 }
 0xedf   :  { %v3147_v49 = vsub.f32 %v3143_v28, %v3145_v21  ;;  %v3146_v16 = vmul.f32 %v3136_v50, %v3136_v50  ;;  %v3150_v20 = vsub.f32 %v3126_v42, %v3136_v50 }
 0xee1   :  { %v3151_v10 = vadd.f32 1e-12, %v3147_v49 }
 0xee3   :  { %4492 = vrsqrt.f32 %v3151_v10  ;;  %vm3159_vm15 = vweird.f32 %v3151_v10 }
 0xee4   :  { %v3142_v17 = vpop.xlane.xlu2 %3141 }
 0xee5   :  { %v3144_v51 = vmul.f32 %v3142_v17, %v4918_v61  ;;  %v4391_v61 = vld [vmem:[%s5292_s18 + $0x1] ss:$0 sm:$0xff] }
 0xee7   :  { %v3148_v52 = vsub.f32 %v3144_v51, %v3146_v16 }
 0xee9   :  { %v4493_v57 = vpop.eup %4492  ;;  %v3152_v55 = vadd.f32 1e-12, %v3148_v52 }
 0xeea   :  { %v3154_v56 = vmul.f32 %v4493_v57, %v3151_v10  ;;  %vm3160_vm14 = vweird.f32 %v4493_v57 }
 0xeeb   :  { %4494 = vrsqrt.f32 %v3152_v55  ;;  %vm3161_vm0 = vmor %vm3159_vm15, %vm3160_vm14  ;;  %vm3169_vm2 = vweird.f32 %v3152_v55 }
 0xeec   :  { %v3155_v26 = vmul.f32 %v4493_v57, %v3154_v56 }
 0xeee   :  { %v3156_v60 = vmul.f32 0.5, %v3155_v26  ;;  %v4393_v26 = vld [vmem:[%s5295_s21] ss:$0 sm:$0xff] }
 0xef0   :  { %v3157_v63 = vsub.f32 1.5, %v3156_v60 }
 0xef1   :  { %v4495_v8 = vpop.eup %4494 }
 0xef2   :  { %v3158_v53 = vmul.f32 %v4493_v57, %v3157_v63  ;;  %v3164_v3 = vmul.f32 %v4495_v8, %v3152_v55  ;;  %vm3170_vm1 = vweird.f32 %v4495_v8 }
 0xef3   :  { %vm3171_vm3 = vmor %vm3169_vm2, %vm3170_vm1 }
 0xef4   :  { %v3162_v6 = vsel %vm3161_vm0, %v4493_v57, %v3158_v53  ;;  %v3165_v7 = vmul.f32 %v4495_v8, %v3164_v3 }
 0xef5   :  { %v3173_v12 = vmul.f32 %v3162_v6, %v3149_v4 }
 0xef6   :  { %v3166_v46 = vmul.f32 0.5, %v3165_v7 }
 0xef7   :  { %v3178_v54 = vmul.f32 %v4391_v61, %v3173_v12 }
 0xef8   :  { %v3167_v18 = vsub.f32 1.5, %v3166_v46 }
 0xef9   :  { %v3183_v5 = vadd.f32 %v4392_v9, %v3178_v54 }
 0xefa   :  { %v3168_v19 = vmul.f32 %v4495_v8, %v3167_v18 }
 0xefb   :  { %v4034_v22 = vmul.f32 -1.442695, %v3183_v5 }
 0xefc   :  { %v3172_v23 = vsel %vm3171_vm3, %v4495_v8, %v3168_v19 }
 0xefd   :  { %4496 = vpow2.f32 %v4034_v22  ;;  %v3174_v0 = vmul.f32 %v3172_v23, %v3150_v20 }
 0xeff   :  { %v3179_v25 = vmul.f32 %v4391_v61, %v3174_v0 }
 0xf01   :  { %v3184_v58 = vadd.f32 %v4392_v9, %v3179_v25 }
 0xf03   :  { %v4497_v29 = vpop.eup %4496  ;;  %v4035_v30 = vmul.f32 -1.442695, %v3184_v58 }
 0xf04   :  { %v3191_v31 = vadd.f32 1.0, %v4497_v29 }
 0xf05   :  { %4498 = vpow2.f32 %v4035_v30 }
 0xf06   :  { %4500 = vrcp.f32 %v3191_v31  ;;  %v3204_v39 = vand.u32 2147483648, %v3191_v31  ;;  %vm3198_vm5 = vweird.f32 %v3191_v31  ;;  %v3202_v41 = vand.u32 2147483647, %v3191_v31 }
 0xf08   :  { %v3205_v13 = vor.u32 1.1754944e-38, %v3204_v39  ;;  %vm3203_vm7 = vcmp.eq.f32.partialorder %v3202_v41, 8.507059e+37 }
 0xf0b   :  { %v4499_v1 = vpop.eup %4498 }
 0xf0c   :  { %v4501_v32 = vpop.eup %4500  ;;  %v3192_v33 = vadd.f32 1.0, %v4499_v1 }
 0xf0d   :  { %v3194_v34 = vmul.f32 %v4501_v32, %v3191_v31  ;;  %vm3199_vm4 = vweird.f32 %v4501_v32 }
 0xf0e   :  { %4502 = vrcp.f32 %v3192_v33  ;;  %vm3200_vm6 = vmor %vm3198_vm5, %vm3199_vm4  ;;  %v3219_v44 = vand.u32 2147483648, %v3192_v33  ;;  %v3217_v47 = vand.u32 2147483647, %v3192_v33  ;;  %vm3213_vm8 = vweird.f32 %v3192_v33 }
 0xf0f   :  { %v3195_v35 = vsub.f32 1.0, %v3194_v34 }
 0xf10   :  { %v3220_v28 = vor.u32 1.1754944e-38, %v3219_v44  ;;  %vm3218_vm10 = vcmp.eq.f32.partialorder %v3217_v47, 8.507059e+37 }
 0xf11   :  { %v3196_v36 = vmul.f32 %v4501_v32, %v3195_v35 }
 0xf13   :  { %v3197_v37 = vadd.f32 %v4501_v32, %v3196_v36 }
 0xf14   :  { %v4503_v38 = vpop.eup %4502 }
 0xf15   :  { %v3209_v40 = vmul.f32 %v4503_v38, %v3192_v33  ;;  %v3201_v43 = vsel %vm3200_vm6, %v4501_v32, %v3197_v37  ;;  %vm3214_vm12 = vweird.f32 %v4503_v38 }
 0xf16   :  { %v3206_v48 = vsel %vm3203_vm7, %v3205_v13, %v3201_v43  ;;  %vm3215_vm9 = vmor %vm3213_vm8, %vm3214_vm12 }
 0xf17   :  { %v3210_v42 = vsub.f32 1.0, %v3209_v40  ;;  %v3223_v50 = vmul.f32 %v3206_v48, %v3183_v5 }
 0xf19   :  { %v3211_v15 = vmul.f32 %v4503_v38, %v3210_v42  ;;  %v3225_v16 = vpack.c.bf16 %v3223_v50, %v3223_v50 }
 0xf1b   :  { %v3212_v21 = vadd.f32 %v4503_v38, %v3211_v15  ;;  %v3249_v57 = vunpack.c.l.b16 %v3225_v16 }
 0xf1d   :  { %v3216_v49 = vsel %vm3215_vm9, %v4503_v38, %v3212_v21 }
 0xf1e   :  { %v3221_v10 = vsel %vm3218_vm10, %v3220_v28, %v3216_v49 }
 0xf1f   :  { %v3224_v17 = vmul.f32 %v3221_v10, %v3184_v58 }
 0xf21   :  { %v3226_v51 = vpack.c.bf16 %v3224_v17, %v3224_v17 }
 0xf23   :  { %v3250_v52 = vunpack.c.l.b16 %v3226_v51 }
 0xf25   :  { %v3251_v55 = vrot.slane %v3250_v52, 7 }
 0xf27   :  { %v3253_v2 = vsel %vm3252_vm11, %v3251_v55, %v3249_v57 }
 0xf28   :  { %v3254_v56 = vpack.c.b16 %v3253_v2, %v3253_v2 }
 0xf2a   :  { %3312 = vmatmul.bf16.vlgmr.msrb.gmra.mxu3 %v3254_v56 }
 0xfad   :  { %v3313_v59 = vpop.f32.mrf.mxu3 }
 0xfae   :  { %v3314_v60 = vadd.f32 %v4393_v26, %v3313_v59 }
 0xfb0   :  { %3317 = vst [vmem:[#allocation14] sm:$0x3] %v3314_v60 }
 0xfb1   :  { %3328 = dma.vmem_to_hbm [thread:$0]  %s3324_s24, 32, %s3326_s2, [#allocation4]  }
 0xfb5   :  { %v3315_v63 = vpop.f32.mrf.mxu3 }
 0xfb6   :  { %4704 = dma.done.wait [#allocation4], 32  }
 0xfb7   :  { %4705 = vsyncadd [#allocation4], 4294967264 }
 0xfb8   :  { %3333 = vsyncpa [#allocation3], 1 }
 0xfb9   :  { %3334 = vsyncpa [#allocation6], 1 }
 0xfba   :  { %3335 = vsyncpa [#allocation9], 1 }
 0xfbb   :  { %3336 = vsyncpa [#allocation12], 1 }
 0xfbc   :  { %3337 = vsyncpa [#allocation4], 1 }

</bundles_post_ra>
